<compile_context>
chip_gen: v6e
topology: v6e:2x2x1
jax: 0.10.0
libtpu: 0.0.40
codegen_flags: <defaults>
</compile_context>

<pallas_src>
import functools

import jax
import jax.numpy as jnp
from jax import lax
from jax.experimental import pallas as pl
from jax.experimental.pallas import tpu as pltpu

EPS = 1e-5


def _vmem_limit_bytes():
    # ~3/4 of physical VMEM: ~48 MiB on v7x (64 MiB phys), ~96 MiB on v5e/v6e (128 MiB).
    try:
        cap = int(pltpu.get_tpu_info().vmem_capacity_bytes)
    except Exception:
        cap = 64 * 1024 * 1024
    return cap * 3 // 4


# --------------------------------------------------------------------------
# Fused kernel: one batch image per grid step, everything stays in VMEM.
# --------------------------------------------------------------------------
def _make_fused_kernel(*, H, W, stride, groups, densify, has_ds, has_xds,
                       inner, compute_dtype):
    Wp = W + 2                              # padded image width
    Ho = (H - 1) // stride + 1
    Wo = (W - 1) // stride + 1
    Hcomp = H if stride == 1 else stride * Ho   # rows of the wide stride-1 grid
    Mw = Hcomp * Wp                              # flat rows of the wide grid
    cpg = inner // groups                        # channels per group for conv2

    def kernel(*refs):
        it = iter(refs)
        x_ref = next(it)
        xds_ref = next(it) if has_xds else None
        w1_ref = next(it)
        w2_ref = next(it)
        w3_ref = next(it)
        wd_ref = next(it) if has_ds else None
        b1_ref = next(it)
        b2_ref = next(it)
        b3_ref = next(it)
        o_ref = next(it)
        h1_scr = next(it)

        # ---- stage 1: 1x1 conv (BN1 scale folded into w1) + shift + ReLU ----
        x_in = x_ref[0]                                      # (H*W, Cin), caller dtype
        xc = x_in.astype(compute_dtype)
        h1 = jnp.dot(xc, w1_ref[...], preferred_element_type=jnp.float32)
        h1 = jnp.maximum(h1 + b1_ref[...], 0.0).astype(compute_dtype)   # (H*W, inner)

        # ---- build the zero-padded, row-flattened h1 image in VMEM scratch ----
        # scratch flat index = u * Wp + v over the (H+2, Wp) padded image.
        h1_scr[...] = jnp.zeros(h1_scr.shape, h1_scr.dtype)   # halo + slack zeros
        h1_3d = h1.reshape(H, W, inner)
        zcols = jnp.zeros((H, 2, inner), compute_dtype)
        h1_wide = jnp.concatenate([h1_3d, zcols], axis=1).reshape(H * Wp, inner)
        h1_scr[pl.ds(Wp + 1, H * Wp), :] = h1_wide            # one contiguous store

        # ---- stage 2: 3x3 grouped conv as 9 accumulating matmuls ----
        # Tap (ky,kx) of the stride-1 conv over the wide (Hcomp, Wp) grid is a
        # CONTIGUOUS slice of the flat padded image at row offset ky*Wp+kx.
        # Columns j >= W of each wide row are garbage and dropped below.
        if densify:
            acc = jnp.zeros((Mw, inner), jnp.float32)
            for t in range(9):
                off = (t // 3) * Wp + (t % 3)
                slab = h1_scr[pl.ds(off, Mw), :]
                acc = acc + jnp.dot(slab, w2_ref[t],
                                    preferred_element_type=jnp.float32)
        else:
            # TODO(synk): per-group matmuls are lane-sparse for large cardinality;
            # pad cog to a 128 multiple or move groups onto a grid axis.
            accs = [jnp.zeros((Mw, cpg), jnp.float32) for _ in range(groups)]
            for t in range(9):
                off = (t // 3) * Wp + (t % 3)
                slab = h1_scr[pl.ds(off, Mw), :]
                for g in range(groups):
                    accs[g] = accs[g] + jnp.dot(
                        slab[:, g * cpg:(g + 1) * cpg], w2_ref[t, g],
                        preferred_element_type=jnp.float32)
            acc = jnp.concatenate(accs, axis=-1)
        h2 = jnp.maximum(acc + b2_ref[...], 0.0).astype(compute_dtype)   # (Mw, inner)

        # ---- drop wide-grid garbage columns and apply the conv2 stride ----
        # (reshape + plain slices only; no strided memory access)
        h2 = h2.reshape(Ho, stride * Wp, inner)[:, :Wp, :]               # rows 0,s,2s,..
        h2 = h2[:, :stride * Wo, :].reshape(Ho, Wo, stride, inner)[:, :, 0, :]
        h2 = h2.reshape(Ho * Wo, inner)

        # ---- stage 3: 1x1 conv + BN3 shift + residual + ReLU ----
        out = jnp.dot(h2, w3_ref[...], preferred_element_type=jnp.float32)
        out = out + b3_ref[...]                      # bn3 shift (+ bnd shift if ds)
        if has_ds:
            xres = xds_ref[0].astype(compute_dtype) if has_xds else xc
            out = out + jnp.dot(xres, wd_ref[...],
                                preferred_element_type=jnp.float32)
        else:
            out = out + x_in.astype(jnp.float32)     # identity residual kept in f32
        o_ref[0] = jnp.maximum(out, 0.0).astype(o_ref.dtype)

    return kernel


# --------------------------------------------------------------------------
# Parameter construction & glue
# --------------------------------------------------------------------------
def _fold_bn(bn):
    gamma, beta, mean, var = bn
    scale = gamma / jnp.sqrt(var + EPS)
    shift = beta - mean * scale
    return scale.astype(jnp.float32), shift.astype(jnp.float32)


def init_params(key, in_channels, out_channels, stride, cardinality):
    inner = in_channels // 4 // cardinality * cardinality
    ks = list(jax.random.split(key, 20))

    def nrm(k, shape, s=0.1):
        return jax.random.normal(k, shape, jnp.float32) * s

    def bn_params(k, c):
        k1, k2, k3, k4 = jax.random.split(k, 4)
        gamma = 1.0 + nrm(k1, (c,))
        beta = nrm(k2, (c,))
        mean = nrm(k3, (c,))
        var = 0.5 + jnp.abs(nrm(k4, (c,), 0.5))
        return (gamma, beta, mean, var)

    p = {
        # PyTorch conv weight layouts (OIHW)
        "w1": nrm(ks[0], (inner, in_channels, 1, 1)),
        "bn1": bn_params(ks[1], inner),
        "w2": nrm(ks[2], (inner, inner // cardinality, 3, 3)),
        "bn2": bn_params(ks[3], inner),
        "w3": nrm(ks[4], (out_channels, inner, 1, 1)),
        "bn3": bn_params(ks[5], out_channels),
    }
    if in_channels != out_channels or stride != 1:
        p["wd"] = nrm(ks[6], (out_channels, in_channels, 1, 1))
        p["bnd"] = bn_params(ks[7], out_channels)
    return p, inner


def dual_path_block_pallas(x_nchw, params, *, stride, cardinality,
                           compute_dtype=jnp.bfloat16, out_dtype=jnp.float32,
                           densify_groups_up_to=4):
    N, Cin, H, W = x_nchw.shape
    inner = params["w1"].shape[0]
    Cout = params["w3"].shape[0]
    G = cardinality
    cpg = inner // G
    Ho = (H - 1) // stride + 1
    Wo = (W - 1) // stride + 1
    has_ds = "wd" in params
    has_xds = has_ds and stride > 1
    densify = G <= densify_groups_up_to

    # NCHW -> NHWC once at the block boundary (see TODO in header).
    x_nhwc = jnp.transpose(x_nchw, (0, 2, 3, 1))
    x_flat = x_nhwc.reshape(N, H * W, Cin)

    # ---- fold eval-mode BN scales into the conv weights; keep the shifts ----
    s1, b1 = _fold_bn(params["bn1"])
    w1 = (params["w1"][:, :, 0, 0].T * s1[None, :]).astype(compute_dtype)   # (Cin, inner)
    s2, b2 = _fold_bn(params["bn2"])
    # (inner, cpg, 3, 3) -> (tap, group, cin_g, cout_g)
    w2_t = params["w2"].reshape(G, cpg, cpg, 3, 3).transpose(3, 4, 0, 2, 1)
    w2_t = w2_t.reshape(9, G, cpg, cpg)
    if densify:
        eye = jnp.eye(G, dtype=w2_t.dtype)
        w2k = jnp.einsum("tgio,gh->tgiho", w2_t, eye).reshape(9, inner, inner)
        w2k = (w2k * s2[None, None, :]).astype(compute_dtype)     # block-diag dense
    else:
        w2k = (w2_t * s2.reshape(1, G, 1, cpg)).astype(compute_dtype)
    s3, b3 = _fold_bn(params["bn3"])
    w3 = (params["w3"][:, :, 0, 0].T * s3[None, :]).astype(compute_dtype)   # (inner, Cout)
    wd = None
    if has_ds:
        sd, bd = _fold_bn(params["bnd"])
        wd = (params["wd"][:, :, 0, 0].T * sd[None, :]).astype(compute_dtype)
        b3 = b3 + bd                                  # one fused shift for stage 3

    def per_image(shape):
        return pl.BlockSpec(shape, lambda n: (n, 0, 0))

    def resident(arr):
        nd = arr.ndim
        return pl.BlockSpec(arr.shape, lambda n, _nd=nd: (0,) * _nd)

    inputs = [x_flat]
    in_specs = [per_image((1, H * W, Cin))]
    if has_xds:
        x_ds = x_nhwc[:, ::stride, ::stride, :][:, :Ho, :Wo, :]
        x_ds = x_ds.reshape(N, Ho * Wo, Cin)
        inputs.append(x_ds)
        in_specs.append(per_image((1, Ho * Wo, Cin)))
    inputs += [w1, w2k, w3]
    in_specs += [resident(w1), resident(w2k), resident(w3)]
    if has_ds:
        inputs.append(wd)
        in_specs.append(resident(wd))
    b1r, b2r, b3r = b1.reshape(1, -1), b2.reshape(1, -1), b3.reshape(1, -1)
    inputs += [b1r, b2r, b3r]
    in_specs += [resident(b1r), resident(b2r), resident(b3r)]

    Wp = W + 2
    Hcomp = H if stride == 1 else stride * Ho
    m1 = (Hcomp + 3) * Wp      # padded flat image rows + slack for wide-grid taps

    kernel = _make_fused_kernel(
        H=H, W=W, stride=stride, groups=G, densify=densify, has_ds=has_ds,
        has_xds=has_xds, inner=inner, compute_dtype=compute_dtype)

    out = pl.pallas_call(
        kernel,
        out_shape=jax.ShapeDtypeStruct((N, Ho * Wo, Cout), out_dtype),
        grid=(N,),
        in_specs=in_specs,
        out_specs=per_image((1, Ho * Wo, Cout)),
        scratch_shapes=[pltpu.VMEM((m1, inner), compute_dtype)],
        compiler_params=pltpu.CompilerParams(
            dimension_semantics=("parallel",),
            vmem_limit_bytes=_vmem_limit_bytes()),
    )(*inputs)

    out = out.reshape(N, Ho, Wo, Cout)
    return jnp.transpose(out, (0, 3, 1, 2))            # back to NCHW


# --------------------------------------------------------------------------
# Pure-JAX reference (eval-mode BatchNorm) for correctness check
# --------------------------------------------------------------------------
def ref_dual_path_block(x, params, *, stride, cardinality):
    def conv(x, w, stride=1, padding="VALID", groups=1):
        return lax.conv_general_dilated(
            x, w, window_strides=(stride, stride), padding=padding,
            dimension_numbers=("NCHW", "OIHW", "NCHW"),
            feature_group_count=groups)

    def bn(x, bnp):
        gamma, beta, mean, var = bnp
        s = gamma / jnp.sqrt(var + EPS)
        return x * s[None, :, None, None] + (beta - mean * s)[None, :, None, None]

    relu = lambda t: jnp.maximum(t, 0.0)
    out = relu(bn(conv(x, params["w1"]), params["bn1"]))
    out = relu(bn(conv(out, params["w2"], stride=stride,
                       padding=((1, 1), (1, 1)), groups=cardinality), params["bn2"]))
    out = bn(conv(out, params["w3"]), params["bn3"])
    residual = x
    if "wd" in params:
        residual = bn(conv(x, params["wd"], stride=stride), params["bnd"])
    return relu(out + residual)


# --------------------------------------------------------------------------
if __name__ == "__main__":
    key = jax.random.PRNGKey(0)

    def run_case(N, Cin, H, W, Cout, stride, cardinality, kseed, check_bf16):
        kx, kp = jax.random.split(jax.random.fold_in(key, kseed))
        x = jax.random.normal(kx, (N, Cin, H, W), jnp.float32)
        params, _ = init_params(kp, Cin, Cout, stride, cardinality)
        ref = ref_dual_path_block(x, params, stride=stride, cardinality=cardinality)

        # f32 path: strict numerical check.
        fwd32 = jax.jit(functools.partial(
            dual_path_block_pallas, stride=stride, cardinality=cardinality,
            compute_dtype=jnp.float32))
        out32 = jax.block_until_ready(fwd32(x, params))
        assert out32.shape == ref.shape, (out32.shape, ref.shape)
        assert jnp.allclose(out32, ref, rtol=1e-4, atol=1e-4), \
            float(jnp.max(jnp.abs(out32 - ref)))

        if check_bf16:
            # bf16 fast path (f32 accumulation): loose check vs f32 reference.
            fwd16 = jax.jit(functools.partial(
                dual_path_block_pallas, stride=stride, cardinality=cardinality,
                compute_dtype=jnp.bfloat16))
            out16 = jax.block_until_ready(fwd16(x, params))
            assert out16.shape == ref.shape, (out16.shape, ref.shape)
            assert jnp.allclose(out16, ref, rtol=5e-2, atol=1e-1), \
                float(jnp.max(jnp.abs(out16 - ref)))

    # Downsample branch (Cin != Cout), stride 1; also exercises the bf16 fast path.
    run_case(2, 32, 16, 16, 64, stride=1, cardinality=2, kseed=0, check_bf16=True)
    # Identity residual (Cin == Cout, stride 1), f32 residual kept exact.
    run_case(2, 64, 8, 8, 64, stride=1, cardinality=2, kseed=1, check_bf16=False)
    # Strided block with downsample.
    run_case(2, 32, 8, 8, 64, stride=2, cardinality=2, kseed=2, check_bf16=False)

    print("KERNEL_OK")
</pallas_src>

<mosaic_0001>
module attributes {stable_mosaic.version = 11 : i64} {
  func.func @kernel(%arg0: i32, %arg1: memref<1x256x32xf32, #tpu.memory_space<vmem>>, %arg2: memref<32x8xf32, #tpu.memory_space<vmem>>, %arg3: memref<9x8x8xf32, #tpu.memory_space<vmem>>, %arg4: memref<8x64xf32, #tpu.memory_space<vmem>>, %arg5: memref<32x64xf32, #tpu.memory_space<vmem>>, %arg6: memref<1x8xf32, #tpu.memory_space<vmem>>, %arg7: memref<1x8xf32, #tpu.memory_space<vmem>>, %arg8: memref<1x64xf32, #tpu.memory_space<vmem>>, %arg9: memref<1x256x64xf32, #tpu.memory_space<vmem>>, %arg10: memref<342x8xf32, #tpu.memory_space<vmem>>) attributes {dimension_semantics = [#tpu.dimension_semantics<parallel>], iteration_bounds = array<i64: 2>, scalar_prefetch = 0 : i64, scratch_operands = 1 : i64, tpu.core_type = #tpu.core_type<tc>, window_params = [{transform_indices = @transform_0, window_bounds = array<i64: 1, 256, 32>}, {pipeline_mode = #tpu.pipeline_mode<synchronous>, transform_indices = @transform_1, window_bounds = array<i64: 32, 8>}, {pipeline_mode = #tpu.pipeline_mode<synchronous>, transform_indices = @transform_2, window_bounds = array<i64: 9, 8, 8>}, {pipeline_mode = #tpu.pipeline_mode<synchronous>, transform_indices = @transform_3, window_bounds = array<i64: 8, 64>}, {pipeline_mode = #tpu.pipeline_mode<synchronous>, transform_indices = @transform_4, window_bounds = array<i64: 32, 64>}, {pipeline_mode = #tpu.pipeline_mode<synchronous>, transform_indices = @transform_5, window_bounds = array<i64: 1, 8>}, {pipeline_mode = #tpu.pipeline_mode<synchronous>, transform_indices = @transform_6, window_bounds = array<i64: 1, 8>}, {pipeline_mode = #tpu.pipeline_mode<synchronous>, transform_indices = @transform_7, window_bounds = array<i64: 1, 64>}, {transform_indices = @transform_8, window_bounds = array<i64: 1, 256, 64>}]} {
    %c0 = arith.constant 0 : index
    %c0_0 = arith.constant 0 : index
    %c0_1 = arith.constant 0 : index
    %0 = vector.load %arg1[%c0, %c0_0, %c0_1] : memref<1x256x32xf32, #tpu.memory_space<vmem>>, vector<1x256x32xf32>
    %1 = vector.shape_cast %0 : vector<1x256x32xf32> to vector<256x32xf32>
    %c0_2 = arith.constant 0 : index
    %c0_3 = arith.constant 0 : index
    %2 = vector.load %arg2[%c0_2, %c0_3] : memref<32x8xf32, #tpu.memory_space<vmem>>, vector<32x8xf32>
    %cst = arith.constant dense<0.000000e+00> : vector<256x8xf32>
    %3 = tpu.matmul %1, %2, %cst {dimension_numbers = #tpu.dot_dimension_numbers<[1], [0], [0], [1], [0, 0, 1, 1], [], []>} : vector<256x32xf32>, vector<32x8xf32>, vector<256x8xf32> -> vector<256x8xf32>
    %c0_4 = arith.constant 0 : index
    %c0_5 = arith.constant 0 : index
    %4 = vector.load %arg6[%c0_4, %c0_5] : memref<1x8xf32, #tpu.memory_space<vmem>>, vector<1x8xf32>
    %5 = vector.broadcast %4 : vector<1x8xf32> to vector<256x8xf32>
    %6 = arith.addf %3, %5 : vector<256x8xf32>
    %cst_6 = arith.constant 0.000000e+00 : f32
    %7 = vector.broadcast %cst_6 : f32 to vector<256x8xf32>
    %8 = arith.maximumf %6, %7 : vector<256x8xf32>
    %cst_7 = arith.constant 0.000000e+00 : f32
    %9 = vector.broadcast %cst_7 : f32 to vector<342x8xf32>
    %c0_8 = arith.constant 0 : index
    %c0_9 = arith.constant 0 : index
    %10 = vector.load %arg10[%c0_8, %c0_9] : memref<342x8xf32, #tpu.memory_space<vmem>>, vector<342x8xf32>
    tpu.vector_store %arg10[%c0_8, %c0_9], %9 {strides = array<i32>} : memref<342x8xf32, #tpu.memory_space<vmem>>, vector<342x8xf32>,
    %11 = vector.shape_cast %8 : vector<256x8xf32> to vector<16x16x8xf32>
    %cst_10 = arith.constant 0.000000e+00 : f32
    %12 = vector.broadcast %cst_10 : f32 to vector<16x2x8xf32>
    %13 = tpu.concatenate %11, %12 in 1 : vector<16x16x8xf32>, vector<16x2x8xf32> -> vector<16x18x8xf32>
    %14 = vector.shape_cast %13 : vector<16x18x8xf32> to vector<288x8xf32>
    %c19 = arith.constant 19 : index
    %c0_11 = arith.constant 0 : index
    %15 = vector.load %arg10[%c19, %c0_11] : memref<342x8xf32, #tpu.memory_space<vmem>>, vector<288x8xf32>
    tpu.vector_store %arg10[%c19, %c0_11], %14 {strides = array<i32>} : memref<342x8xf32, #tpu.memory_space<vmem>>, vector<288x8xf32>,
    %cst_12 = arith.constant 0.000000e+00 : f32
    %16 = vector.broadcast %cst_12 : f32 to vector<288x8xf32>
    %c0_13 = arith.constant 0 : index
    %c0_14 = arith.constant 0 : index
    %17 = vector.load %arg10[%c0_13, %c0_14] : memref<342x8xf32, #tpu.memory_space<vmem>>, vector<288x8xf32>
    %c0_15 = arith.constant 0 : index
    %c0_16 = arith.constant 0 : index
    %c0_17 = arith.constant 0 : index
    %18 = vector.load %arg3[%c0_15, %c0_16, %c0_17] : memref<9x8x8xf32, #tpu.memory_space<vmem>>, vector<1x8x8xf32>
    %19 = vector.shape_cast %18 : vector<1x8x8xf32> to vector<8x8xf32>
    %cst_18 = arith.constant dense<0.000000e+00> : vector<288x8xf32>
    %20 = tpu.matmul %17, %19, %cst_18 {dimension_numbers = #tpu.dot_dimension_numbers<[1], [0], [0], [1], [0, 0, 1, 1], [], []>} : vector<288x8xf32>, vector<8x8xf32>, vector<288x8xf32> -> vector<288x8xf32>
    %21 = arith.addf %16, %20 : vector<288x8xf32>
    %c1 = arith.constant 1 : index
    %c0_19 = arith.constant 0 : index
    %22 = vector.load %arg10[%c1, %c0_19] : memref<342x8xf32, #tpu.memory_space<vmem>>, vector<288x8xf32>
    %c1_20 = arith.constant 1 : index
    %c0_21 = arith.constant 0 : index
    %c0_22 = arith.constant 0 : index
    %23 = vector.load %arg3[%c1_20, %c0_21, %c0_22] : memref<9x8x8xf32, #tpu.memory_space<vmem>>, vector<1x8x8xf32>
    %24 = vector.shape_cast %23 : vector<1x8x8xf32> to vector<8x8xf32>
    %cst_23 = arith.constant dense<0.000000e+00> : vector<288x8xf32>
    %25 = tpu.matmul %22, %24, %cst_23 {dimension_numbers = #tpu.dot_dimension_numbers<[1], [0], [0], [1], [0, 0, 1, 1], [], []>} : vector<288x8xf32>, vector<8x8xf32>, vector<288x8xf32> -> vector<288x8xf32>
    %26 = arith.addf %21, %25 : vector<288x8xf32>
    %c2 = arith.constant 2 : index
    %c0_24 = arith.constant 0 : index
    %27 = vector.load %arg10[%c2, %c0_24] : memref<342x8xf32, #tpu.memory_space<vmem>>, vector<288x8xf32>
    %c2_25 = arith.constant 2 : index
    %c0_26 = arith.constant 0 : index
    %c0_27 = arith.constant 0 : index
    %28 = vector.load %arg3[%c2_25, %c0_26, %c0_27] : memref<9x8x8xf32, #tpu.memory_space<vmem>>, vector<1x8x8xf32>
    %29 = vector.shape_cast %28 : vector<1x8x8xf32> to vector<8x8xf32>
    %cst_28 = arith.constant dense<0.000000e+00> : vector<288x8xf32>
    %30 = tpu.matmul %27, %29, %cst_28 {dimension_numbers = #tpu.dot_dimension_numbers<[1], [0], [0], [1], [0, 0, 1, 1], [], []>} : vector<288x8xf32>, vector<8x8xf32>, vector<288x8xf32> -> vector<288x8xf32>
    %31 = arith.addf %26, %30 : vector<288x8xf32>
    %c18 = arith.constant 18 : index
    %c0_29 = arith.constant 0 : index
    %32 = vector.load %arg10[%c18, %c0_29] : memref<342x8xf32, #tpu.memory_space<vmem>>, vector<288x8xf32>
    %c3 = arith.constant 3 : index
    %c0_30 = arith.constant 0 : index
    %c0_31 = arith.constant 0 : index
    %33 = vector.load %arg3[%c3, %c0_30, %c0_31] : memref<9x8x8xf32, #tpu.memory_space<vmem>>, vector<1x8x8xf32>
    %34 = vector.shape_cast %33 : vector<1x8x8xf32> to vector<8x8xf32>
    %cst_32 = arith.constant dense<0.000000e+00> : vector<288x8xf32>
    %35 = tpu.matmul %32, %34, %cst_32 {dimension_numbers = #tpu.dot_dimension_numbers<[1], [0], [0], [1], [0, 0, 1, 1], [], []>} : vector<288x8xf32>, vector<8x8xf32>, vector<288x8xf32> -> vector<288x8xf32>
    %36 = arith.addf %31, %35 : vector<288x8xf32>
    %c19_33 = arith.constant 19 : index
    %c0_34 = arith.constant 0 : index
    %37 = vector.load %arg10[%c19_33, %c0_34] : memref<342x8xf32, #tpu.memory_space<vmem>>, vector<288x8xf32>
    %c4 = arith.constant 4 : index
    %c0_35 = arith.constant 0 : index
    %c0_36 = arith.constant 0 : index
    %38 = vector.load %arg3[%c4, %c0_35, %c0_36] : memref<9x8x8xf32, #tpu.memory_space<vmem>>, vector<1x8x8xf32>
    %39 = vector.shape_cast %38 : vector<1x8x8xf32> to vector<8x8xf32>
    %cst_37 = arith.constant dense<0.000000e+00> : vector<288x8xf32>
    %40 = tpu.matmul %37, %39, %cst_37 {dimension_numbers = #tpu.dot_dimension_numbers<[1], [0], [0], [1], [0, 0, 1, 1], [], []>} : vector<288x8xf32>, vector<8x8xf32>, vector<288x8xf32> -> vector<288x8xf32>
    %41 = arith.addf %36, %40 : vector<288x8xf32>
    %c20 = arith.constant 20 : index
    %c0_38 = arith.constant 0 : index
    %42 = vector.load %arg10[%c20, %c0_38] : memref<342x8xf32, #tpu.memory_space<vmem>>, vector<288x8xf32>
    %c5 = arith.constant 5 : index
    %c0_39 = arith.constant 0 : index
    %c0_40 = arith.constant 0 : index
    %43 = vector.load %arg3[%c5, %c0_39, %c0_40] : memref<9x8x8xf32, #tpu.memory_space<vmem>>, vector<1x8x8xf32>
    %44 = vector.shape_cast %43 : vector<1x8x8xf32> to vector<8x8xf32>
    %cst_41 = arith.constant dense<0.000000e+00> : vector<288x8xf32>
    %45 = tpu.matmul %42, %44, %cst_41 {dimension_numbers = #tpu.dot_dimension_numbers<[1], [0], [0], [1], [0, 0, 1, 1], [], []>} : vector<288x8xf32>, vector<8x8xf32>, vector<288x8xf32> -> vector<288x8xf32>
    %46 = arith.addf %41, %45 : vector<288x8xf32>
    %c36 = arith.constant 36 : index
    %c0_42 = arith.constant 0 : index
    %47 = vector.load %arg10[%c36, %c0_42] : memref<342x8xf32, #tpu.memory_space<vmem>>, vector<288x8xf32>
    %c6 = arith.constant 6 : index
    %c0_43 = arith.constant 0 : index
    %c0_44 = arith.constant 0 : index
    %48 = vector.load %arg3[%c6, %c0_43, %c0_44] : memref<9x8x8xf32, #tpu.memory_space<vmem>>, vector<1x8x8xf32>
    %49 = vector.shape_cast %48 : vector<1x8x8xf32> to vector<8x8xf32>
    %cst_45 = arith.constant dense<0.000000e+00> : vector<288x8xf32>
    %50 = tpu.matmul %47, %49, %cst_45 {dimension_numbers = #tpu.dot_dimension_numbers<[1], [0], [0], [1], [0, 0, 1, 1], [], []>} : vector<288x8xf32>, vector<8x8xf32>, vector<288x8xf32> -> vector<288x8xf32>
    %51 = arith.addf %46, %50 : vector<288x8xf32>
    %c37 = arith.constant 37 : index
    %c0_46 = arith.constant 0 : index
    %52 = vector.load %arg10[%c37, %c0_46] : memref<342x8xf32, #tpu.memory_space<vmem>>, vector<288x8xf32>
    %c7 = arith.constant 7 : index
    %c0_47 = arith.constant 0 : index
    %c0_48 = arith.constant 0 : index
    %53 = vector.load %arg3[%c7, %c0_47, %c0_48] : memref<9x8x8xf32, #tpu.memory_space<vmem>>, vector<1x8x8xf32>
    %54 = vector.shape_cast %53 : vector<1x8x8xf32> to vector<8x8xf32>
    %cst_49 = arith.constant dense<0.000000e+00> : vector<288x8xf32>
    %55 = tpu.matmul %52, %54, %cst_49 {dimension_numbers = #tpu.dot_dimension_numbers<[1], [0], [0], [1], [0, 0, 1, 1], [], []>} : vector<288x8xf32>, vector<8x8xf32>, vector<288x8xf32> -> vector<288x8xf32>
    %56 = arith.addf %51, %55 : vector<288x8xf32>
    %c38 = arith.constant 38 : index
    %c0_50 = arith.constant 0 : index
    %57 = vector.load %arg10[%c38, %c0_50] : memref<342x8xf32, #tpu.memory_space<vmem>>, vector<288x8xf32>
    %c8 = arith.constant 8 : index
    %c0_51 = arith.constant 0 : index
    %c0_52 = arith.constant 0 : index
    %58 = vector.load %arg3[%c8, %c0_51, %c0_52] : memref<9x8x8xf32, #tpu.memory_space<vmem>>, vector<1x8x8xf32>
    %59 = vector.shape_cast %58 : vector<1x8x8xf32> to vector<8x8xf32>
    %cst_53 = arith.constant dense<0.000000e+00> : vector<288x8xf32>
    %60 = tpu.matmul %57, %59, %cst_53 {dimension_numbers = #tpu.dot_dimension_numbers<[1], [0], [0], [1], [0, 0, 1, 1], [], []>} : vector<288x8xf32>, vector<8x8xf32>, vector<288x8xf32> -> vector<288x8xf32>
    %61 = arith.addf %56, %60 : vector<288x8xf32>
    %c0_54 = arith.constant 0 : index
    %c0_55 = arith.constant 0 : index
    %62 = vector.load %arg7[%c0_54, %c0_55] : memref<1x8xf32, #tpu.memory_space<vmem>>, vector<1x8xf32>
    %63 = vector.broadcast %62 : vector<1x8xf32> to vector<288x8xf32>
    %64 = arith.addf %61, %63 : vector<288x8xf32>
    %cst_56 = arith.constant 0.000000e+00 : f32
    %65 = vector.broadcast %cst_56 : f32 to vector<288x8xf32>
    %66 = arith.maximumf %64, %65 : vector<288x8xf32>
    %67 = vector.shape_cast %66 : vector<288x8xf32> to vector<16x18x8xf32>
    %68 = vector.extract_strided_slice %67 {offsets = [0, 0, 0], sizes = [16, 16, 8], strides = [1, 1, 1]} : vector<16x18x8xf32> to vector<16x16x8xf32>
    %69 = vector.shape_cast %68 : vector<16x16x8xf32> to vector<16x16x1x8xf32>
    %70 = vector.shape_cast %69 : vector<16x16x1x8xf32> to vector<16x16x8xf32>
    %71 = vector.shape_cast %70 : vector<16x16x8xf32> to vector<256x8xf32>
    %c0_57 = arith.constant 0 : index
    %c0_58 = arith.constant 0 : index
    %72 = vector.load %arg4[%c0_57, %c0_58] : memref<8x64xf32, #tpu.memory_space<vmem>>, vector<8x64xf32>
    %cst_59 = arith.constant dense<0.000000e+00> : vector<256x64xf32>
    %73 = tpu.matmul %71, %72, %cst_59 {dimension_numbers = #tpu.dot_dimension_numbers<[1], [0], [0], [1], [0, 0, 1, 1], [], []>} : vector<256x8xf32>, vector<8x64xf32>, vector<256x64xf32> -> vector<256x64xf32>
    %c0_60 = arith.constant 0 : index
    %c0_61 = arith.constant 0 : index
    %74 = vector.load %arg8[%c0_60, %c0_61] : memref<1x64xf32, #tpu.memory_space<vmem>>, vector<1x64xf32>
    %75 = vector.broadcast %74 : vector<1x64xf32> to vector<256x64xf32>
    %76 = arith.addf %73, %75 : vector<256x64xf32>
    %c0_62 = arith.constant 0 : index
    %c0_63 = arith.constant 0 : index
    %77 = vector.load %arg5[%c0_62, %c0_63] : memref<32x64xf32, #tpu.memory_space<vmem>>, vector<32x64xf32>
    %cst_64 = arith.constant dense<0.000000e+00> : vector<256x64xf32>
    %78 = tpu.matmul %1, %77, %cst_64 {dimension_numbers = #tpu.dot_dimension_numbers<[1], [0], [0], [1], [0, 0, 1, 1], [], []>} : vector<256x32xf32>, vector<32x64xf32>, vector<256x64xf32> -> vector<256x64xf32>
    %79 = arith.addf %76, %78 : vector<256x64xf32>
    %cst_65 = arith.constant 0.000000e+00 : f32
    %80 = vector.broadcast %cst_65 : f32 to vector<256x64xf32>
    %81 = arith.maximumf %79, %80 : vector<256x64xf32>
    %c0_66 = arith.constant 0 : index
    %c0_67 = arith.constant 0 : index
    %c0_68 = arith.constant 0 : index
    %82 = vector.load %arg9[%c0_66, %c0_67, %c0_68] : memref<1x256x64xf32, #tpu.memory_space<vmem>>, vector<1x256x64xf32>
    %83 = vector.shape_cast %82 : vector<1x256x64xf32> to vector<256x64xf32>
    %84 = vector.shape_cast %81 : vector<256x64xf32> to vector<1x256x64xf32>
    tpu.vector_store %arg9[%c0_66, %c0_67, %c0_68], %84 {strides = array<i32>} : memref<1x256x64xf32, #tpu.memory_space<vmem>>, vector<1x256x64xf32>,
    return
  }
  func.func @transform_0(%arg0: i32) -> (i32, i32, i32) {
    %c0_i32 = arith.constant 0 : i32
    %c0_i32_0 = arith.constant 0 : i32
    %c0_i32_1 = arith.constant 0 : i32
    return %arg0, %c0_i32, %c0_i32_0 : i32, i32, i32
  }
  func.func @transform_1(%arg0: i32) -> (i32, i32) {
    %c0_i32 = arith.constant 0 : i32
    %c0_i32_0 = arith.constant 0 : i32
    %c0_i32_1 = arith.constant 0 : i32
    return %c0_i32, %c0_i32_0 : i32, i32
  }
  func.func @transform_2(%arg0: i32) -> (i32, i32, i32) {
    %c0_i32 = arith.constant 0 : i32
    %c0_i32_0 = arith.constant 0 : i32
    %c0_i32_1 = arith.constant 0 : i32
    %c0_i32_2 = arith.constant 0 : i32
    return %c0_i32, %c0_i32_0, %c0_i32_1 : i32, i32, i32
  }
  func.func @transform_3(%arg0: i32) -> (i32, i32) {
    %c0_i32 = arith.constant 0 : i32
    %c0_i32_0 = arith.constant 0 : i32
    %c0_i32_1 = arith.constant 0 : i32
    return %c0_i32, %c0_i32_0 : i32, i32
  }
  func.func @transform_4(%arg0: i32) -> (i32, i32) {
    %c0_i32 = arith.constant 0 : i32
    %c0_i32_0 = arith.constant 0 : i32
    %c0_i32_1 = arith.constant 0 : i32
    return %c0_i32, %c0_i32_0 : i32, i32
  }
  func.func @transform_5(%arg0: i32) -> (i32, i32) {
    %c0_i32 = arith.constant 0 : i32
    %c0_i32_0 = arith.constant 0 : i32
    %c0_i32_1 = arith.constant 0 : i32
    return %c0_i32, %c0_i32_0 : i32, i32
  }
  func.func @transform_6(%arg0: i32) -> (i32, i32) {
    %c0_i32 = arith.constant 0 : i32
    %c0_i32_0 = arith.constant 0 : i32
    %c0_i32_1 = arith.constant 0 : i32
    return %c0_i32, %c0_i32_0 : i32, i32
  }
  func.func @transform_7(%arg0: i32) -> (i32, i32) {
    %c0_i32 = arith.constant 0 : i32
    %c0_i32_0 = arith.constant 0 : i32
    %c0_i32_1 = arith.constant 0 : i32
    return %c0_i32, %c0_i32_0 : i32, i32
  }
  func.func @transform_8(%arg0: i32) -> (i32, i32, i32) {
    %c0_i32 = arith.constant 0 : i32
    %c0_i32_0 = arith.constant 0 : i32
    %c0_i32_1 = arith.constant 0 : i32
    return %arg0, %c0_i32, %c0_i32_0 : i32, i32, i32
  }
}

</mosaic_0001>

<bundles_post_ra>
// kernel: dual_path_block_pallas.1
= control target key start
LH: loop header
LB: loop body
LE: loop exit
PB: predicated region body
PF: predicated region fallthrough
CT: control target
= control target key end

     0   :  { %13 = vsyncpa [#allocation4], 0  ;;  %s11769_s0 = inlined_call_operand.vmem [shape: f32[2,256,32], index: 0, kind: input, shape index: {}]   ;;  %s11770_s1 = inlined_call_operand.vmem [shape: f32[32,8], index: 1, kind: input, shape index: {}]   ;;  %s11771_s2 = inlined_call_operand.vmem [shape: f32[9,8,8], index: 2, kind: input, shape index: {}]   ;;  %s11772_s3 = inlined_call_operand.vmem [shape: f32[8,64], index: 3, kind: input, shape index: {}]   ;;  %s11773_s4 = inlined_call_operand.vmem [shape: f32[32,64], index: 4, kind: input, shape index: {}]   ;;  %s11774_s5 = inlined_call_operand.vmem [shape: f32[1,8], index: 5, kind: input, shape index: {}]   ;;  %s11775_s6 = inlined_call_operand.vmem [shape: f32[1,8], index: 6, kind: input, shape index: {}]   ;;  %s11776_s7 = inlined_call_operand.vmem [shape: f32[1,64], index: 7, kind: input, shape index: {}]   ;;  %s11777_s8 = inlined_call_operand.hbm [shape: f32[2,256,64], index: 8, kind: output, shape index: {}]  }
   0x1   :  { %15 = vsyncpa [#allocation4 + $0x1], 0  ;;  %s9484_s27 = smov 0   ;;  %s9486_s28 = smov 0  }
   0x2   :  { %s9488_s29 = smov 0   ;;  %s9490_s30 = smov 0  }
   0x3 LB: > { %s9505_s9 = sadd.s32 4294967295, %s9432_s30   ;;  %s7746_s10 = sadd.s32 4294967294, %s9432_s30   ;;  %s9432_s30 = sphi %s9490_s30, %s11828_s30   ;;  %s9428_s29 = sphi %s9488_s29, %s11827_s29   ;;  %s9424_s28 = sphi %s9486_s28, %s11826_s28   ;;  %s9420_s27 = sphi %s9484_s27, %s11825_s27  }
   0x4   : > { %s9509_s11 = sadd.s32 1, %s9432_s30   ;;  %s201_s12 = sadd.s32 1, %s9428_s29 }
   0x5   : > { %s198_s13 = ssub.s32 %s9432_s30, %s9509_s11  ;;  %p211_p0 = scmp.ne.s32.totalorder %s9428_s29, %s9424_s28 }
   0x6   : > { %p199_p1 = scmp.eq.s32.totalorder %s198_s13, 0  ;;  %p212_p2 = scmp.eq.s32.totalorder %s9505_s9, 1 }
   0x7   : > { %p217_p3 = scmp.ne.s32.totalorder %s9424_s28, %s9420_s27  ;;  %p218_p4 = scmp.eq.s32.totalorder %s7746_s10, 1 }
   0x8   : > { %s9520_s14 = scalar_select %p199_p1, %s9428_s29, %s201_s12  }
   0x9   : > { %p9522_p5 = por %p212_p2, %p211_p0  ;;  %p9526_p6 = por %p218_p4, %p217_p3 }
   0xa   : > { %p7749_p7 = scmp.ge.s32.totalorder %s9432_s30, 1  ;;  %p265_p8 = scmp.lt.s32.totalorder %s9432_s30, 3 }
   0xc   : > { %p266_p9 = pnand %p7749_p7, %p265_p8 }
   0xe   : > { %269 = sbr.rel (%p266_p9) target bundleno = 1094 (0x446), region = 52 }
  0x13   : > { %v339_v0 = vld [vmem:[%s11770_s1 + $0x18] sm:$0xff]  ;;  %v338_v1 = vld [vmem:[%s11770_s1 + $0x10] sm:$0xff]  ;;  %p299_p10 = scmp.lt.s32.totalorder %s9505_s9, 1  ;;  %v337_v2 = vld [vmem:[%s11770_s1 + $0x8] sm:$0xff]  ;;  %vm347_vm0 = vcmask 261120   ;;  %vm701_vm1 = vcmask 64512   ;;  %v783_v48 = vlaneseq }
  0x14   : > { %8629 = vmatprep.subr.mxu0 %v339_v0  ;;  %v336_v3 = vld [vmem:[%s11770_s1] sm:$0xff]  ;;  %v9434_v36 = vmov 0.0   ;;  %v7786_v37 = vld [vmem:[%s11771_s2 + $0x8] sm:$0xff]  ;;  %v7859_v43 = vld [vmem:[%s11771_s2 + $0x10] sm:$0xff]  ;;  %v9435_v46 = vmov 1983009808  }
  0x15   : > { %8630 = vmatpush3.msra.mxu0 %v339_v0  ;;  %s300_s23 = scalar_select %p299_p10, %s9505_s9, 1  ;;  %705 = vst.msk [vmem:[#allocation2 + $0x18] sm:$0xff] %vm701_vm1, %v9434_v36  ;;  %706 = vst.msk [vmem:[#allocation2 + $0x20] sm:$0xff] %vm701_vm1, %v9434_v36  ;;  %v2050_v38 = vld [vmem:[%s11771_s2] sm:$0xff]  ;;  %8685 = vmatprep.subr.mxu1 %v7786_v37  ;;  %v7896_v44 = vld [vmem:[%s11771_s2 + $0x18] sm:$0xff]  ;;  %v781_v47 = vunpack.c.l.s4 %v9435_v46  ;;  %v784_v50 = vshrl.u32 %v783_v48, 7 }
  0x16   : > { %8631 = vmatprep.subr.mxu0 %v338_v1  ;;  %702 = vst.msk [vmem:[#allocation2] sm:$0xff] %vm701_vm1, %v9434_v36  ;;  %703 = vst.msk [vmem:[#allocation2 + $0x8] sm:$0xff] %vm701_vm1, %v9434_v36  ;;  %8686 = vmatpush3.msra.mxu1 %v7786_v37  ;;  %v7933_v45 = vld [vmem:[%s11771_s2 + $0x20] sm:$0xff]  ;;  %s296_s18 = sand.u32 1, %s9424_s28   ;;  %vm7637_vm2 = vcmask 523264   ;;  %s8190_s21 = sshll.u32 %s9505_s9, 12 }
  0x17   : > { %8632 = vmatpush3.msra.mxu0 %v338_v1  ;;  %s8189_s26 = sshll.u32 %s300_s23, 8  ;;  %704 = vst.msk [vmem:[#allocation2 + $0x10] sm:$0xff] %vm701_vm1, %v9434_v36  ;;  %707 = vst.msk [vmem:[#allocation2 + $0x28] sm:$0xff] %vm701_vm1, %v9434_v36  ;;  %8797 = vmatprep.subr.mxu1 %v7859_v43  ;;  %v782_v49 = vunpack.c.0.s8 %v781_v47  ;;  %v9719_v51 = vld [vmem:[%s11774_s5] ss:$0 sm:$0xff]  ;;  %s7750_s19 = sshll.u32 %s296_s18, 8 }
  0x18   : > { %8633 = vmatprep.subr.mxu0 %v337_v2  ;;  %s9549_s13 = scalar_lea.vmem %s11769_s0, %s8189_s26  ;;  %708 = vst.msk [vmem:[#allocation2 + $0x30] sm:$0xff] %vm701_vm1, %v9434_v36  ;;  %709 = vst.msk [vmem:[#allocation2 + $0x38] sm:$0xff] %vm701_vm1, %v9434_v36  ;;  %s11623_s20 = scalar_lea.vmem [#allocation3], %s7750_s19 }
  0x19   : > { %8634 = vmatpush3.msra.mxu0 %v337_v2  ;;  %v304_v4 = vld [vmem:[%s9549_s13] sm:$0xff]  ;;  %v305_v5 = vld [vmem:[%s9549_s13 + $0x8] sm:$0xff]  ;;  %v306_v6 = vld [vmem:[%s9549_s13 + $0x10] sm:$0xff]  ;;  %710 = vst.msk [vmem:[#allocation2 + $0x40] sm:$0xff] %vm701_vm1, %v9434_v36  ;;  %v9722_v54 = vsub.s32 %v782_v49, %v784_v50  ;;  %s7684_s22 = sshll.u32 %s11623_s20, 4  ;;  %s11719_s25 = scalar_lea.hbm %s11777_s8, %s8190_s21  ;;  %s11721_s22 = int_to_ptr.vmem [resolvable:$true] %s7684_s22 }
  0x1a   : > { %8635 = vmatprep.subr.mxu0 %v336_v3  ;;  %8637 = vmatprep.mubr.msk.f32.mxu0 %vm347_vm0, %v304_v4  ;;  %v307_v7 = vld [vmem:[%s9549_s13 + $0x18] sm:$0xff]  ;;  %v308_v8 = vld [vmem:[%s9549_s13 + $0x20] sm:$0xff]  ;;  %v309_v9 = vld [vmem:[%s9549_s13 + $0x28] sm:$0xff]  ;;  %711 = vst.msk [vmem:[#allocation2 + $0x48] sm:$0xff] %vm701_vm1, %v9434_v36  ;;  %s11729_s9 = scalar_lea.sflag [#allocation4], %s296_s18  ;;  %s9372_s26 = scalar_lea.vmem %s11721_s22, 4096 }
  0x1b   : > { %8636 = vmatpush3.msra.mxu0 %v336_v3  ;;  %v310_v10 = vld [vmem:[%s9549_s13 + $0x30] sm:$0xff]  ;;  %v311_v11 = vld [vmem:[%s9549_s13 + $0x38] sm:$0xff]  ;;  %v312_v12 = vld [vmem:[%s9549_s13 + $0x40] sm:$0xff]  ;;  %712 = vst.msk [vmem:[#allocation2 + $0x50] sm:$0xff] %vm701_vm1, %v9434_v36  ;;  %p9373_p11 = scmp.ne.s32.totalorder %s11721_s22, %s9372_s26 }
  0x1c   : > { %8638 = vmatmul.mubr.msk.f32.vlgmr.msra.gmra.mxu0 %vm347_vm0, %v305_v5  ;;  %v313_v13 = vld [vmem:[%s9549_s13 + $0x48] sm:$0xff]  ;;  %v314_v14 = vld [vmem:[%s9549_s13 + $0x50] sm:$0xff]  ;;  %v315_v15 = vld [vmem:[%s9549_s13 + $0x58] sm:$0xff]  ;;  %713 = vst.msk [vmem:[#allocation2 + $0x58] sm:$0xff] %vm701_vm1, %v9434_v36  ;;  %8741 = vmatprep.subr.mxu0 %v2050_v38  ;;  %v9731_v5 = vrot.slane %v9434_v36, %v9722_v54 }
  0x1d   : > { %8640 = vmatprep.mubr.msk.f32.mxu0 %vm347_vm0, %v306_v6  ;;  %v316_v16 = vld [vmem:[%s9549_s13 + $0x60] sm:$0xff]  ;;  %v317_v17 = vld [vmem:[%s9549_s13 + $0x68] sm:$0xff]  ;;  %v318_v18 = vld [vmem:[%s9549_s13 + $0x70] sm:$0xff]  ;;  %714 = vst.msk [vmem:[#allocation2 + $0x60] sm:$0xff] %vm701_vm1, %v9434_v36  ;;  %8742 = vmatpush3.msra.mxu0 %v2050_v38  ;;  %p9374_p12 = pnand %p9373_p11, %p9522_p5 }
  0x1e   : > { %v319_v19 = vld [vmem:[%s9549_s13 + $0x78] sm:$0xff]  ;;  %v320_v20 = vld [vmem:[%s9549_s13 + $0x80] sm:$0xff]  ;;  %v321_v21 = vld [vmem:[%s9549_s13 + $0x88] sm:$0xff]  ;;  %715 = vst.msk [vmem:[#allocation2 + $0x68] sm:$0xff] %vm701_vm1, %v9434_v36  ;;  %8853 = vmatprep.subr.mxu0 %v7896_v44 }
  0x1f   : > { %v322_v22 = vld [vmem:[%s9549_s13 + $0x90] sm:$0xff]  ;;  %v323_v23 = vld [vmem:[%s9549_s13 + $0x98] sm:$0xff]  ;;  %v324_v24 = vld [vmem:[%s9549_s13 + $0xa0] sm:$0xff]  ;;  %716 = vst.msk [vmem:[#allocation2 + $0x70] sm:$0xff] %vm701_vm1, %v9434_v36  ;;  %p9375_p13 = pneg %p9374_p12 }
  0x20   : > { %8641 = vmatmul.mubr.msk.f32.gmra.mxu0 %vm347_vm0, %v307_v7  ;;  %v325_v25 = vld [vmem:[%s9549_s13 + $0xa8] sm:$0xff]  ;;  %v326_v26 = vld [vmem:[%s9549_s13 + $0xb0] sm:$0xff]  ;;  %v327_v27 = vld [vmem:[%s9549_s13 + $0xb8] sm:$0xff]  ;;  %717 = vst.msk [vmem:[#allocation2 + $0x78] sm:$0xff] %vm701_vm1, %v9434_v36 }
  0x21   : > { %8643 = vmatprep.mubr.msk.f32.mxu0 %vm347_vm0, %v308_v8  ;;  %v328_v28 = vld [vmem:[%s9549_s13 + $0xc0] sm:$0xff]  ;;  %v329_v29 = vld [vmem:[%s9549_s13 + $0xc8] sm:$0xff]  ;;  %v330_v30 = vld [vmem:[%s9549_s13 + $0xd0] sm:$0xff]  ;;  %718 = vst.msk [vmem:[#allocation2 + $0x80] sm:$0xff] %vm701_vm1, %v9434_v36 }
  0x22   : > { %v331_v31 = vld [vmem:[%s9549_s13 + $0xd8] sm:$0xff]  ;;  %v332_v32 = vld [vmem:[%s9549_s13 + $0xe0] sm:$0xff]  ;;  %v333_v33 = vld [vmem:[%s9549_s13 + $0xe8] sm:$0xff]  ;;  %719 = vst.msk [vmem:[#allocation2 + $0x88] sm:$0xff] %vm701_vm1, %v9434_v36 }
  0x23   : > { %v334_v34 = vld [vmem:[%s9549_s13 + $0xf0] sm:$0xff]  ;;  %v335_v35 = vld [vmem:[%s9549_s13 + $0xf8] sm:$0xff]  ;;  %720 = vst.msk [vmem:[#allocation2 + $0x90] sm:$0xff] %vm701_vm1, %v9434_v36  ;;  %721 = vst.msk [vmem:[#allocation2 + $0x98] sm:$0xff] %vm701_vm1, %v9434_v36 }
  0x24   : > { %8644 = vmatmul.mubr.msk.f32.gmra.mxu0 %vm347_vm0, %v309_v9  ;;  %722 = vst.msk [vmem:[#allocation2 + $0xa0] sm:$0xff] %vm701_vm1, %v9434_v36  ;;  %723 = vst.msk [vmem:[#allocation2 + $0xa8] sm:$0xff] %vm701_vm1, %v9434_v36  ;;  %v2051_v39 = vld [vmem:[#allocation2 + $0x1] sm:$0xff]  ;;  %v2052_v41 = vld [vmem:[#allocation2 + $0x9] sm:$0xff] }
  0x25   : > { %8646 = vmatprep.mubr.msk.f32.mxu0 %vm347_vm0, %v310_v10  ;;  %724 = vst.msk [vmem:[#allocation2 + $0xb0] sm:$0xff] %vm701_vm1, %v9434_v36  ;;  %725 = vst.msk [vmem:[#allocation2 + $0xb8] sm:$0xff] %vm701_vm1, %v9434_v36  ;;  %v2014_v40 = vld [vmem:[#allocation2] sm:$0xff]  ;;  %8687 = vmatprep.mubr.msk.f32.mxu1 %vm701_vm1, %v2051_v39  ;;  %v2015_v42 = vld [vmem:[#allocation2 + $0x8] sm:$0xff] }
  0x26   : > { %726 = vst.msk [vmem:[#allocation2 + $0xc0] sm:$0xff] %vm701_vm1, %v9434_v36  ;;  %727 = vst.msk [vmem:[#allocation2 + $0xc8] sm:$0xff] %vm701_vm1, %v9434_v36  ;;  %8688 = vmatmul.mubr.msk.f32.vlgmr.msra.gmra.mxu1 %vm701_vm1, %v2052_v41 }
  0x27   : > { %728 = vst.msk [vmem:[#allocation2 + $0xd0] sm:$0xff] %vm701_vm1, %v9434_v36  ;;  %729 = vst.msk [vmem:[#allocation2 + $0xd8] sm:$0xff] %vm701_vm1, %v9434_v36  ;;  %8798 = vmatpush3.msra.mxu1 %v7859_v43 }
  0x28   : > { %8647 = vmatmul.mubr.msk.f32.gmra.mxu0 %vm347_vm0, %v311_v11  ;;  %730 = vst.msk [vmem:[#allocation2 + $0xe0] sm:$0xff] %vm701_vm1, %v9434_v36  ;;  %731 = vst.msk [vmem:[#allocation2 + $0xe8] sm:$0xff] %vm701_vm1, %v9434_v36  ;;  %8909 = vmatprep.subr.mxu1 %v7933_v45 }
  0x29   : > { %8649 = vmatprep.mubr.msk.f32.mxu0 %vm347_vm0, %v312_v12  ;;  %732 = vst.msk [vmem:[#allocation2 + $0xf0] sm:$0xff] %vm701_vm1, %v9434_v36  ;;  %733 = vst.msk [vmem:[#allocation2 + $0xf8] sm:$0xff] %vm701_vm1, %v9434_v36 }
  0x2a   : > { %734 = vst.msk [vmem:[#allocation2 + $0x100] sm:$0xff] %vm701_vm1, %v9434_v36  ;;  %735 = vst.msk [vmem:[#allocation2 + $0x108] sm:$0xff] %vm701_vm1, %v9434_v36 }
  0x2b   : > { %736 = vst.msk [vmem:[#allocation2 + $0x110] sm:$0xff] %vm701_vm1, %v9434_v36  ;;  %737 = vst.msk [vmem:[#allocation2 + $0x118] sm:$0xff] %vm701_vm1, %v9434_v36 }
  0x2c   : > { %8650 = vmatmul.mubr.msk.f32.gmra.mxu0 %vm347_vm0, %v313_v13  ;;  %738 = vst.msk [vmem:[#allocation2 + $0x120] sm:$0xff] %vm701_vm1, %v9434_v36  ;;  %739 = vst.msk [vmem:[#allocation2 + $0x128] sm:$0xff] %vm701_vm1, %v9434_v36 }
  0x2d   : > { %8652 = vmatprep.mubr.msk.f32.mxu0 %vm347_vm0, %v314_v14  ;;  %740 = vst.msk [vmem:[#allocation2 + $0x130] sm:$0xff] %vm701_vm1, %v9434_v36  ;;  %741 = vst.msk [vmem:[#allocation2 + $0x138] sm:$0xff] %vm701_vm1, %v9434_v36 }
  0x2e   : > { %742 = vst.msk [vmem:[#allocation2 + $0x140] sm:$0xff] %vm701_vm1, %v9434_v36  ;;  %11782 = vst [vmem:[#allocation6_spill] sm:$0xff] %v9722_v54 }
  0x30   : > { %8653 = vmatmul.mubr.msk.f32.gmra.mxu0 %vm347_vm0, %v315_v15 }
  0x31   : > { %8655 = vmatprep.mubr.msk.f32.mxu0 %vm347_vm0, %v316_v16 }
  0x34   : > { %8656 = vmatmul.mubr.msk.f32.gmra.mxu0 %vm347_vm0, %v317_v17 }
  0x35   : > { %8658 = vmatprep.mubr.msk.f32.mxu0 %vm347_vm0, %v318_v18 }
  0x38   : > { %8659 = vmatmul.mubr.msk.f32.gmra.mxu0 %vm347_vm0, %v319_v19 }
  0x39   : > { %8661 = vmatprep.mubr.msk.f32.mxu0 %vm347_vm0, %v320_v20 }
  0x3c   : > { %8662 = vmatmul.mubr.msk.f32.gmra.mxu0 %vm347_vm0, %v321_v21 }
  0x3d   : > { %8664 = vmatprep.mubr.msk.f32.mxu0 %vm347_vm0, %v322_v22 }
  0x40   : > { %8665 = vmatmul.mubr.msk.f32.gmra.mxu0 %vm347_vm0, %v323_v23 }
  0x41   : > { %8667 = vmatprep.mubr.msk.f32.mxu0 %vm347_vm0, %v324_v24 }
  0x44   : > { %8668 = vmatmul.mubr.msk.f32.gmra.mxu0 %vm347_vm0, %v325_v25 }
  0x45   : > { %8670 = vmatprep.mubr.msk.f32.mxu0 %vm347_vm0, %v326_v26 }
  0x48   : > { %8671 = vmatmul.mubr.msk.f32.gmra.mxu0 %vm347_vm0, %v327_v27 }
  0x49   : > { %8673 = vmatprep.mubr.msk.f32.mxu0 %vm347_vm0, %v328_v28 }
  0x4c   : > { %8674 = vmatmul.mubr.msk.f32.gmra.mxu0 %vm347_vm0, %v329_v29 }
  0x4d   : > { %8676 = vmatprep.mubr.msk.f32.mxu0 %vm347_vm0, %v330_v30 }
  0x50   : > { %8677 = vmatmul.mubr.msk.f32.gmra.mxu0 %vm347_vm0, %v331_v31 }
  0x51   : > { %8679 = vmatprep.mubr.msk.f32.mxu0 %vm347_vm0, %v332_v32 }
  0x54   : > { %8680 = vmatmul.mubr.msk.f32.gmra.mxu0 %vm347_vm0, %v333_v33 }
  0x55   : > { %8682 = vmatprep.mubr.msk.f32.mxu0 %vm347_vm0, %v334_v34 }
  0x58   : > { %8683 = vmatmul.mubr.msk.f32.gmra.mxu0 %vm347_vm0, %v335_v35 }
  0x59   : > { %8743 = vmatprep.mubr.msk.f32.mxu0 %vm701_vm1, %v2014_v40 }
  0x5c   : > { %8744 = vmatmul.mubr.msk.f32.vlgmr.msra.gmra.mxu0 %vm701_vm1, %v2015_v42 }
  0x5d   : > { %8854 = vmatpush3.msra.mxu0 %v7896_v44 }
  0xdc   : > { %v8639_v52 = vpop.f32.mrf.mxu0 }
  0xdd   : > { %v516_v53 = vadd.f32 %v8639_v52, %v9719_v51 }
  0xde   : > { %v510_v55 = vpop.f32.mrf.mxu0 }
  0xdf   : > { %v670_v56 = vmax.f32 %v516_v53, 0.0  ;;  %v511_v57 = vadd.f32 %v9719_v51, %v510_v55 }
  0xe0   : > { %v8642_v58 = vpop.f32.mrf.mxu0 }
  0xe1   : > { %v796_v59 = vcombine.high %v670_v56, %v670_v56  ;;  %v803_v60 = vrot.slane %v670_v56, %v9722_v54  ;;  %v669_v61 = vmax.f32 %v511_v57, 0.0  ;;  %v526_v62 = vadd.f32 %v8642_v58, %v9719_v51 }
  0xe2   : > { %v520_v63 = vpop.f32.mrf.mxu0 }
  0xe3   : > { %v810_v0 = vrot.slane %v796_v59, %v9722_v54  ;;  %v811_v1 = vcombine.high %v803_v60, %v803_v60  ;;  %v779_v2 = vcombine.high %v669_v61, %v669_v61  ;;  %v786_v3 = vrot.slane %v669_v61, %v9722_v54 }
  0xe4   : > { %v672_v4 = vmax.f32 %v526_v62, 0.0  ;;  %v521_v6 = vadd.f32 %v9719_v51, %v520_v63  ;;  %v8645_v7 = vpop.f32.mrf.mxu0 }
  0xe5   : > { %v812_v8 = vcombine.high %v810_v0, %v810_v0  ;;  %v1347_v9 = vcombine.low %v803_v60, %v811_v1  ;;  %v793_v10 = vrot.slane %v779_v2, %v9722_v54  ;;  %v794_v11 = vcombine.high %v786_v3, %v786_v3 }
  0xe6   : > { %v837_v12 = vcombine.high %v672_v4, %v672_v4  ;;  %v844_v13 = vrot.slane %v672_v4, %v9722_v54  ;;  %v671_v14 = vmax.f32 %v521_v6, 0.0  ;;  %v536_v15 = vadd.f32 %v8645_v7, %v9719_v51  ;;  %v530_v16 = vpop.f32.mrf.mxu0 }
  0xe7   : > { %v1348_v17 = vcombine.low %v810_v0, %v812_v8  ;;  %v1355_v18 = vrot.slane %v1347_v9, %v9722_v54  ;;  %v795_v19 = vcombine.high %v793_v10, %v793_v10  ;;  %v1330_v20 = vcombine.low %v786_v3, %v794_v11 }
  0xe8   : > { %v851_v21 = vrot.slane %v837_v12, %v9722_v54  ;;  %v852_v22 = vcombine.high %v844_v13, %v844_v13  ;;  %v820_v23 = vcombine.high %v671_v14, %v671_v14  ;;  %v827_v24 = vrot.slane %v671_v14, %v9722_v54  ;;  %v8648_v25 = vpop.f32.mrf.mxu0 }
  0xe9   : > { %v1362_v26 = vrot.slane %v1348_v17, %v9722_v54  ;;  %v1331_v27 = vcombine.low %v793_v10, %v795_v19  ;;  %v1338_v28 = vrot.slane %v1330_v20, %v9722_v54  ;;  %v674_v29 = vmax.f32 %v536_v15, 0.0 }
  0xea   : > { %v853_v30 = vcombine.high %v851_v21, %v851_v21  ;;  %v1382_v31 = vcombine.low %v852_v22, %v851_v21  ;;  %v834_v32 = vrot.slane %v820_v23, %v9722_v54  ;;  %v835_v33 = vcombine.high %v827_v24, %v827_v24  ;;  %v540_v34 = vpop.f32.mrf.mxu0 }
  0xeb   : > { %v1363_v35 = vcombine.low %v1355_v18, %v1362_v26  ;;  %v1345_v36 = vrot.slane %v1331_v27, %v9722_v54  ;;  %v1364_v37 = vcombine.low %v9731_v5, %v827_v24  ;;  %v871_v38 = vcombine.high %v674_v29, %v674_v29 }
  0xec   : > { %v1396_v39 = vrot.slane %v1382_v31, %v9722_v54  ;;  %v9747_v40 = vcombine.low %v853_v30, %v9731_v5  ;;  %v836_v41 = vcombine.high %v834_v32, %v834_v32  ;;  %v1365_v42 = vcombine.low %v835_v33, %v834_v32  ;;  %v8651_v43 = vpop.f32.mrf.mxu0 }
  0xed   : > { %1979 = vst.msk [vmem:[#allocation2 + $0x1b] sm:$0xff] %vm701_vm1, %v1363_v35  ;;  %v1346_v44 = vcombine.low %v1338_v28, %v1345_v36  ;;  %v1372_v45 = vrot.slane %v1364_v37, %v9722_v54  ;;  %v878_v46 = vrot.slane %v674_v29, %v9722_v54  ;;  %v885_v47 = vrot.slane %v871_v38, %v9722_v54 }
  0xee   : > { %v1406_v48 = vrot.slane %v9747_v40, %v9722_v54  ;;  %v1379_v49 = vrot.slane %v1365_v42, %v9722_v54  ;;  %v1381_v50 = vcombine.low %v836_v41, %v844_v13  ;;  %v531_v52 = vadd.f32 %v9719_v51, %v530_v16  ;;  %v9757_v53 = vpop.f32.mrf.mxu0 }
  0xef   : > { %1978 = vst.msk [vmem:[#allocation2 + $0x13] sm:$0xff] %vm701_vm1, %v1346_v44  ;;  %v886_v55 = vcombine.high %v878_v46, %v878_v46  ;;  %v887_v56 = vcombine.high %v885_v47, %v885_v47  ;;  %v546_v57 = vadd.f32 %v8648_v25, %v9719_v51  ;;  %v541_v58 = vadd.f32 %v9719_v51, %v540_v34 }
  0xf0   : > { %v1380_v59 = vcombine.low %v1372_v45, %v1379_v49  ;;  %v1389_v60 = vrot.slane %v1381_v50, %v9722_v54  ;;  %v673_v61 = vmax.f32 %v531_v52, 0.0  ;;  %v556_v62 = vadd.f32 %v8651_v43, %v9719_v51  ;;  %v9764_v63 = vpop.f32.mrf.mxu0 }
  0xf1   : > { %v9766_v0 = vcombine.low %v878_v46, %v886_v55  ;;  %v1432_v1 = vcombine.low %v885_v47, %v887_v56  ;;  %v676_v2 = vmax.f32 %v546_v57, 0.0  ;;  %v675_v3 = vmax.f32 %v541_v58, 0.0 }
  0xf2   : > { %v1397_v4 = vcombine.low %v1389_v60, %v1396_v39  ;;  %1980 = vst.msk [vmem:[#allocation2 + $0x23] sm:$0xff] %vm701_vm1, %v1380_v59  ;;  %v854_v6 = vcombine.high %v673_v61, %v673_v61  ;;  %v861_v7 = vrot.slane %v673_v61, %v9722_v54  ;;  %v678_v8 = vmax.f32 %v556_v62, 0.0  ;;  %v9770_v9 = vpop.f32.mrf.mxu0 }
  0xf3   : > { %v1430_v10 = vrot.slane %v9766_v0, %v9722_v54  ;;  %v1440_v11 = vrot.slane %v1432_v1, %v9722_v54  ;;  %v905_v12 = vcombine.high %v676_v2, %v676_v2  ;;  %v912_v13 = vrot.slane %v676_v2, %v9722_v54 }
  0xf4   : > { %1981 = vst.msk [vmem:[#allocation2 + $0x2b] sm:$0xff] %vm701_vm1, %v1397_v4  ;;  %v868_v14 = vrot.slane %v854_v6, %v9722_v54  ;;  %v869_v15 = vcombine.high %v861_v7, %v861_v7  ;;  %v888_v16 = vcombine.high %v675_v3, %v675_v3  ;;  %v895_v17 = vrot.slane %v675_v3, %v9722_v54  ;;  %v8657_v18 = vpop.f32.mrf.mxu0 }
  0xf5   : > { %v919_v19 = vrot.slane %v905_v12, %v9722_v54  ;;  %v920_v20 = vcombine.high %v912_v13, %v912_v13  ;;  %v939_v21 = vcombine.high %v678_v8, %v678_v8  ;;  %v946_v22 = vrot.slane %v678_v8, %v9722_v54 }
  0xf6   : > { %v870_v23 = vcombine.high %v868_v14, %v868_v14  ;;  %v1399_v24 = vcombine.low %v861_v7, %v869_v15  ;;  %v902_v25 = vrot.slane %v888_v16, %v9722_v54  ;;  %v903_v26 = vcombine.high %v895_v17, %v895_v17  ;;  %v570_v27 = vpop.f32.mrf.mxu0  ;;  %v2053_v28 = vld [vmem:[#allocation2 + $0x11] sm:$0xff]  ;;  %v2054_v30 = vld [vmem:[#allocation2 + $0x19] sm:$0xff] }
  0xf7   : > { %v2016_v29 = vld [vmem:[#allocation2 + $0x10] sm:$0xff]  ;;  %v921_v31 = vcombine.high %v919_v19, %v919_v19  ;;  %v1466_v32 = vcombine.low %v920_v20, %v919_v19  ;;  %v1433_v33 = vcombine.low %v9731_v5, %v895_v17  ;;  %v953_v34 = vrot.slane %v939_v21, %v9722_v54  ;;  %8690 = vmatprep.mubr.msk.f32.mxu1 %vm701_vm1, %v2053_v28  ;;  %v2017_v35 = vld [vmem:[#allocation2 + $0x18] sm:$0xff] }
  0xf8   : > { %v1413_v36 = vrot.slane %v1399_v24, %v9722_v54  ;;  %v1415_v37 = vcombine.low %v868_v14, %v870_v23  ;;  %v904_v38 = vcombine.high %v902_v25, %v902_v25  ;;  %v1449_v39 = vcombine.low %v903_v26, %v902_v25  ;;  %8746 = vmatprep.mubr.msk.f32.mxu0 %vm701_vm1, %v2016_v29  ;;  %v8660_v41 = vpop.f32.mrf.mxu0 }
  0xf9   : > { %v1467_v42 = vcombine.low %v921_v31, %v9731_v5  ;;  %v1474_v43 = vrot.slane %v1466_v32, %v9722_v54  ;;  %v1447_v44 = vrot.slane %v1433_v33, %v9722_v54  ;;  %v954_v45 = vcombine.high %v946_v22, %v946_v22  ;;  %8691 = vmatmul.mubr.msk.f32.gmra.mxu1 %vm701_vm1, %v2054_v30  ;;  %v2055_v46 = vld [vmem:[#allocation2 + $0x21] sm:$0xff] }
  0xfa   : > { %v2018_v47 = vld [vmem:[#allocation2 + $0x20] sm:$0xff]  ;;  %v1414_v49 = vcombine.low %v1406_v48, %v1413_v36  ;;  %v1423_v50 = vrot.slane %v1415_v37, %v9722_v54  ;;  %v1450_v52 = vcombine.low %v904_v38, %v912_v13  ;;  %v1457_v55 = vrot.slane %v1449_v39, %v9722_v54  ;;  %8747 = vmatmul.mubr.msk.f32.gmra.mxu0 %vm701_vm1, %v2017_v35  ;;  %v9797_v56 = vpop.f32.mrf.mxu0 }
  0xfb   : > { %v1481_v57 = vrot.slane %v1467_v42, %v9722_v54  ;;  %v1448_v58 = vcombine.low %v1440_v11, %v1447_v44  ;;  %v955_v59 = vcombine.high %v953_v34, %v953_v34  ;;  %v1500_v60 = vcombine.low %v946_v22, %v954_v45  ;;  %8693 = vmatprep.mubr.msk.f32.mxu1 %vm701_vm1, %v2055_v46  ;;  %v2056_v61 = vld [vmem:[#allocation2 + $0x29] sm:$0xff] }
  0xfc   : > { %v2019_v62 = vld [vmem:[#allocation2 + $0x28] sm:$0xff]  ;;  %v1431_v40 = vcombine.low %v1423_v50, %v1430_v10  ;;  %1982 = vst.msk [vmem:[#allocation2 + $0x33] sm:$0xff] %vm701_vm1, %v1414_v49  ;;  %v1464_v48 = vrot.slane %v1450_v52, %v9722_v54  ;;  %v551_v0 = vadd.f32 %v9719_v51, %v9757_v53  ;;  %v566_v1 = vadd.f32 %v9764_v63, %v9719_v51  ;;  %v9808_v2 = vpop.f32.mrf.mxu0 }
  0xfd   : > { %8749 = vmatprep.mubr.msk.f32.mxu0 %vm701_vm1, %v2018_v47  ;;  %v1482_v3 = vcombine.low %v1474_v43, %v1481_v57  ;;  %1984 = vst.msk [vmem:[#allocation2 + $0x43] sm:$0xff] %vm701_vm1, %v1448_v58  ;;  %v1501_v4 = vcombine.low %v953_v34, %v955_v59  ;;  %v1508_v6 = vrot.slane %v1500_v60, %v9722_v54 }
  0xfe   : > { %v561_v7 = vadd.f32 %v9719_v51, %v9770_v9  ;;  %8694 = vmatmul.mubr.msk.f32.gmra.mxu1 %vm701_vm1, %v2056_v61  ;;  %1983 = vst.msk [vmem:[#allocation2 + $0x3b] sm:$0xff] %vm701_vm1, %v1431_v40  ;;  %v1465_v53 = vcombine.low %v1457_v55, %v1464_v48  ;;  %v677_v8 = vmax.f32 %v551_v0, 0.0  ;;  %v680_v63 = vmax.f32 %v566_v1, 0.0  ;;  %8750 = vmatmul.mubr.msk.f32.gmra.mxu0 %vm701_vm1, %v2019_v62 }
  0xff   : > { %v576_v10 = vadd.f32 %v8657_v18, %v9719_v51  ;;  %1986 = vst.msk [vmem:[#allocation2 + $0x53] sm:$0xff] %vm701_vm1, %v1482_v3  ;;  %v1515_v11 = vrot.slane %v1501_v4, %v9722_v54  ;;  %v571_v13 = vadd.f32 %v9719_v51, %v570_v27  ;;  %v586_v9 = vadd.f32 %v8660_v41, %v9719_v51  ;;  %v9825_v18 = vpop.f32.mrf.mxu0 }
 0x100   : > { %v679_v12 = vmax.f32 %v561_v7, 0.0  ;;  %1985 = vst.msk [vmem:[#allocation2 + $0x4b] sm:$0xff] %vm701_vm1, %v1465_v53  ;;  %v922_v14 = vcombine.high %v677_v8, %v677_v8  ;;  %v929_v15 = vrot.slane %v677_v8, %v9722_v54  ;;  %v973_v16 = vcombine.high %v680_v63, %v680_v63 }
 0x101   : > { %v980_v17 = vrot.slane %v680_v63, %v9722_v54  ;;  %v1516_v19 = vcombine.low %v1508_v6, %v1515_v11  ;;  %v682_v22 = vmax.f32 %v576_v10, 0.0  ;;  %v9834_v37 = vpop.f32.mrf.mxu0  ;;  %v681_v40 = vmax.f32 %v571_v13, 0.0 }
 0x102   : > { %v956_v20 = vcombine.high %v679_v12, %v679_v12  ;;  %v963_v21 = vrot.slane %v679_v12, %v9722_v54  ;;  %v936_v23 = vrot.slane %v922_v14, %v9722_v54  ;;  %v937_v24 = vcombine.high %v929_v15, %v929_v15 }
 0x103   : > { %v987_v25 = vrot.slane %v973_v16, %v9722_v54  ;;  %v988_v26 = vcombine.high %v980_v17, %v980_v17  ;;  %1988 = vst.msk [vmem:[#allocation2 + $0x63] sm:$0xff] %vm701_vm1, %v1516_v19  ;;  %v1007_v30 = vcombine.high %v682_v22, %v682_v22  ;;  %v2057_v31 = vld [vmem:[#allocation2 + $0x31] sm:$0xff]  ;;  %v1014_v42 = vrot.slane %v682_v22, %v9722_v54  ;;  %v9853_v0 = vpop.f32.mrf.mxu0 }
 0x104   : > { %v970_v27 = vrot.slane %v956_v20, %v9722_v54  ;;  %v971_v28 = vcombine.high %v963_v21, %v963_v21  ;;  %v1517_v29 = vcombine.low %v9731_v5, %v963_v21  ;;  %v2020_v32 = vld [vmem:[#allocation2 + $0x30] sm:$0xff]  ;;  %v938_v33 = vcombine.high %v936_v23, %v936_v23  ;;  %8696 = vmatprep.mubr.msk.f32.mxu1 %vm701_vm1, %v2057_v31 }
 0x105   : > { %v1483_v34 = vcombine.low %v929_v15, %v937_v24  ;;  %v989_v35 = vcombine.high %v987_v25, %v987_v25  ;;  %v1535_v36 = vcombine.low %v988_v26, %v987_v25  ;;  %8752 = vmatprep.mubr.msk.f32.mxu0 %vm701_vm1, %v2020_v32  ;;  %v2058_v43 = vld [vmem:[#allocation2 + $0x39] sm:$0xff]  ;;  %v1021_v55 = vrot.slane %v1007_v30, %v9722_v54  ;;  %v2059_v58 = vld [vmem:[#allocation2 + $0x41] sm:$0xff]  ;;  %v9869_v20 = vpop.f32.mrf.mxu0 }
 0x106   : > { %v972_v38 = vcombine.high %v970_v27, %v970_v27  ;;  %v1518_v39 = vcombine.low %v971_v28, %v970_v27  ;;  %v1525_v41 = vrot.slane %v1517_v29, %v9722_v54  ;;  %v2021_v44 = vld [vmem:[#allocation2 + $0x38] sm:$0xff]  ;;  %v1484_v45 = vcombine.low %v936_v23, %v938_v33  ;;  %8697 = vmatmul.mubr.msk.f32.gmra.mxu1 %vm701_vm1, %v2058_v43  ;;  %v2022_v59 = vld [vmem:[#allocation2 + $0x40] sm:$0xff] }
 0x107   : > { %v1491_v46 = vrot.slane %v1483_v34, %v9722_v54  ;;  %v1549_v47 = vrot.slane %v1535_v36, %v9722_v54  ;;  %v9842_v49 = vcombine.low %v989_v35, %v9731_v5  ;;  %v1022_v57 = vcombine.high %v1014_v42, %v1014_v42  ;;  %8753 = vmatmul.mubr.msk.f32.gmra.mxu0 %vm701_vm1, %v2021_v44  ;;  %v2060_v60 = vld [vmem:[#allocation2 + $0x49] sm:$0xff]  ;;  %v2061_v14 = vld [vmem:[#allocation2 + $0x51] sm:$0xff]  ;;  %v9884_v36 = vpop.f32.mrf.mxu0 }
 0x108   : > { %v1532_v50 = vrot.slane %v1518_v39, %v9722_v54  ;;  %v1534_v52 = vcombine.low %v972_v38, %v980_v17  ;;  %v1498_v61 = vrot.slane %v1484_v45, %v9722_v54  ;;  %v684_v48 = vmax.f32 %v586_v9, 0.0  ;;  %8699 = vmatprep.mubr.msk.f32.mxu1 %vm701_vm1, %v2059_v58  ;;  %8755 = vmatprep.mubr.msk.f32.mxu0 %vm701_vm1, %v2022_v59  ;;  %v2023_v1 = vld [vmem:[#allocation2 + $0x48] sm:$0xff]  ;;  %v2024_v21 = vld [vmem:[#allocation2 + $0x50] sm:$0xff] }
 0x109   : > { %v1559_v62 = vrot.slane %v9842_v49, %v9722_v54  ;;  %v1023_v6 = vcombine.high %v1021_v55, %v1021_v55  ;;  %v1569_v7 = vcombine.low %v1014_v42, %v1022_v57  ;;  %v990_v8 = vcombine.high %v681_v40, %v681_v40 }
 0x10a   : > { %v1533_v3 = vcombine.low %v1525_v41, %v1532_v50  ;;  %v1542_v4 = vrot.slane %v1534_v52, %v9722_v54  ;;  %v1499_v53 = vcombine.low %v1491_v46, %v1498_v61  ;;  %v997_v63 = vrot.slane %v681_v40, %v9722_v54  ;;  %8700 = vmatmul.mubr.msk.f32.gmra.mxu1 %vm701_vm1, %v2060_v60  ;;  %v9895_v60 = vpop.f32.mrf.mxu0 }
 0x10b   : > { %v1041_v10 = vcombine.high %v684_v48, %v684_v48  ;;  %v1583_v12 = vrot.slane %v1569_v7, %v9722_v54  ;;  %v9860_v13 = vcombine.low %v1021_v55, %v1023_v6  ;;  %v1048_v9 = vrot.slane %v684_v48, %v9722_v54  ;;  %8756 = vmatmul.mubr.msk.f32.gmra.mxu0 %vm701_vm1, %v2023_v1 }
 0x10c   : > { %v1550_v11 = vcombine.low %v1542_v4, %v1549_v47  ;;  %1989 = vst.msk [vmem:[#allocation2 + $0x6b] sm:$0xff] %vm701_vm1, %v1533_v3  ;;  %1987 = vst.msk [vmem:[#allocation2 + $0x5b] sm:$0xff] %vm701_vm1, %v1499_v53  ;;  %v1004_v15 = vrot.slane %v990_v8, %v9722_v54  ;;  %v1005_v16 = vcombine.high %v997_v63, %v997_v63  ;;  %8702 = vmatprep.mubr.msk.f32.mxu1 %vm701_vm1, %v2061_v14 }
 0x10d   : > { %v1055_v17 = vrot.slane %v1041_v10, %v9722_v54  ;;  %v581_v19 = vadd.f32 %v9719_v51, %v9797_v56  ;;  %v1593_v22 = vrot.slane %v9860_v13, %v9722_v54  ;;  %v1056_v23 = vcombine.high %v1048_v9, %v1048_v9  ;;  %8758 = vmatprep.mubr.msk.f32.mxu0 %vm701_vm1, %v2024_v21 }
 0x10e   : > { %1990 = vst.msk [vmem:[#allocation2 + $0x73] sm:$0xff] %vm701_vm1, %v1550_v11  ;;  %v596_v24 = vadd.f32 %v9808_v2, %v9719_v51  ;;  %v591_v25 = vadd.f32 %v9719_v51, %v9825_v18  ;;  %v1006_v56 = vcombine.high %v1004_v15, %v1004_v15  ;;  %v1552_v26 = vcombine.low %v997_v63, %v1005_v16  ;;  %v9909_v16 = vpop.f32.mrf.mxu0 }
 0x10f   : > { %v1057_v27 = vcombine.high %v1055_v17, %v1055_v17  ;;  %v683_v28 = vmax.f32 %v581_v19, 0.0  ;;  %v1619_v29 = vcombine.low %v1056_v23, %v1055_v17  ;;  %v606_v32 = vadd.f32 %v9834_v37, %v9719_v51 }
 0x110   : > { %v686_v30 = vmax.f32 %v596_v24, 0.0  ;;  %v685_v31 = vmax.f32 %v591_v25, 0.0  ;;  %v1566_v33 = vrot.slane %v1552_v26, %v9722_v54  ;;  %v1568_v34 = vcombine.low %v1004_v15, %v1006_v56 }
 0x111   : > { %v1620_v2 = vcombine.low %v1057_v27, %v9731_v5  ;;  %v1024_v35 = vcombine.high %v683_v28, %v683_v28  ;;  %v1627_v18 = vrot.slane %v1619_v29, %v9722_v54  ;;  %v1031_v38 = vrot.slane %v683_v28, %v9722_v54 }
 0x112   : > { %v1075_v39 = vcombine.high %v686_v30, %v686_v30  ;;  %v1082_v41 = vrot.slane %v686_v30, %v9722_v54  ;;  %v1567_v42 = vcombine.low %v1559_v62, %v1566_v33  ;;  %v1576_v43 = vrot.slane %v1568_v34, %v9722_v54 }
 0x113   : > { %v1634_v37 = vrot.slane %v1620_v2, %v9722_v54  ;;  %v1038_v44 = vrot.slane %v1024_v35, %v9722_v54  ;;  %v1039_v45 = vcombine.high %v1031_v38, %v1031_v38  ;;  %v1586_v46 = vcombine.low %v9731_v5, %v1031_v38  ;;  %v2062_v50 = vld [vmem:[#allocation2 + $0x59] sm:$0xff]  ;;  %v2063_v1 = vld [vmem:[#allocation2 + $0x61] sm:$0xff]  ;;  %v9932_v35 = vpop.f32.mrf.mxu0 }
 0x114   : > { %v1089_v47 = vrot.slane %v1075_v39, %v9722_v54  ;;  %v1090_v49 = vcombine.high %v1082_v41, %v1082_v41  ;;  %v2025_v52 = vld [vmem:[#allocation2 + $0x58] sm:$0xff]  ;;  %v1584_v55 = vcombine.low %v1576_v43, %v1583_v12  ;;  %1991 = vst.msk [vmem:[#allocation2 + $0x7b] sm:$0xff] %vm701_vm1, %v1567_v42  ;;  %v1058_v59 = vcombine.high %v685_v31, %v685_v31  ;;  %v2026_v3 = vld [vmem:[#allocation2 + $0x60] sm:$0xff]  ;;  %v2064_v12 = vld [vmem:[#allocation2 + $0x69] sm:$0xff] }
 0x115   : > { %v1635_v57 = vcombine.low %v1627_v18, %v1634_v37  ;;  %v1040_v58 = vcombine.high %v1038_v44, %v1038_v44  ;;  %8703 = vmatmul.mubr.msk.f32.gmra.mxu1 %vm701_vm1, %v2062_v50  ;;  %v1600_v61 = vrot.slane %v1586_v46, %v9722_v54  ;;  %v1602_v62 = vcombine.low %v1039_v45, %v1038_v44  ;;  %v2027_v17 = vld [vmem:[#allocation2 + $0x68] sm:$0xff]  ;;  %v2065_v24 = vld [vmem:[#allocation2 + $0x71] sm:$0xff] }
 0x116   : > { %v1091_v40 = vcombine.high %v1089_v47, %v1089_v47  ;;  %v1653_v48 = vcombine.low %v1082_v41, %v1090_v49  ;;  %8759 = vmatmul.mubr.msk.f32.gmra.mxu0 %vm701_vm1, %v2025_v52  ;;  %1992 = vst.msk [vmem:[#allocation2 + $0x83] sm:$0xff] %vm701_vm1, %v1584_v55  ;;  %v1065_v6 = vrot.slane %v685_v31, %v9722_v54  ;;  %v688_v53 = vmax.f32 %v606_v32, 0.0  ;;  %v2028_v28 = vld [vmem:[#allocation2 + $0x70] sm:$0xff]  ;;  %v9938_v38 = vld [vmem:[%s11771_s2 + $0x28] sm:$0xff] }
 0x117   : > { %1995 = vst.msk [vmem:[#allocation2 + $0x9b] sm:$0xff] %vm701_vm1, %v1635_v57  ;;  %v1603_v4 = vcombine.low %v1040_v58, %v1048_v9  ;;  %v1072_v7 = vrot.slane %v1058_v59, %v9722_v54  ;;  %8705 = vmatprep.mubr.msk.f32.mxu1 %vm701_vm1, %v2063_v1  ;;  %8761 = vmatprep.mubr.msk.f32.mxu0 %vm701_vm1, %v2026_v3 }
 0x118   : > { %v1601_v8 = vcombine.low %v1593_v22, %v1600_v61  ;;  %v1610_v63 = vrot.slane %v1602_v62, %v9722_v54  ;;  %v1654_v10 = vcombine.low %v1089_v47, %v1091_v40  ;;  %v1661_v11 = vrot.slane %v1653_v48, %v9722_v54  ;;  %8965 = vmatprep.subr.mxu0 %v9938_v38  ;;  %v9957_v62 = vpop.f32.mrf.mxu0 }
 0x119   : > { %v1617_v13 = vrot.slane %v1603_v4, %v9722_v54  ;;  %v1073_v14 = vcombine.high %v1065_v6, %v1065_v6  ;;  %v1074_v9 = vcombine.high %v1072_v7, %v1072_v7  ;;  %v1109_v15 = vcombine.high %v688_v53, %v688_v53  ;;  %8706 = vmatmul.mubr.msk.f32.gmra.mxu1 %vm701_vm1, %v2064_v12 }
 0x11a   : > { %1993 = vst.msk [vmem:[#allocation2 + $0x8b] sm:$0xff] %vm701_vm1, %v1601_v8  ;;  %v1668_v19 = vrot.slane %v1654_v10, %v9722_v54  ;;  %v9915_v21 = vrot.slane %v688_v53, %v9722_v54  ;;  %v601_v22 = vadd.f32 %v9719_v51, %v9853_v0  ;;  %v616_v23 = vadd.f32 %v9869_v20, %v9719_v51 }
 0x11b   : > { %8762 = vmatmul.mubr.msk.f32.gmra.mxu0 %vm701_vm1, %v2027_v17  ;;  %v1618_v25 = vcombine.low %v1610_v63, %v1617_v13  ;;  %v1636_v56 = vcombine.low %v1065_v6, %v1073_v14  ;;  %v1637_v26 = vcombine.low %v1072_v7, %v1074_v9  ;;  %v1123_v27 = vrot.slane %v1109_v15, %v9722_v54  ;;  %v2066_v20 = vld [vmem:[#allocation2 + $0x79] sm:$0xff] }
 0x11c   : > { %8708 = vmatprep.mubr.msk.f32.mxu1 %vm701_vm1, %v2065_v24  ;;  %v1669_v29 = vcombine.low %v1661_v11, %v1668_v19  ;;  %v1124_v30 = vcombine.high %v9915_v21, %v9915_v21  ;;  %v687_v31 = vmax.f32 %v601_v22, 0.0  ;;  %v690_v0 = vmax.f32 %v616_v23, 0.0  ;;  %8764 = vmatprep.mubr.msk.f32.mxu0 %vm701_vm1, %v2028_v28  ;;  %v2029_v18 = vld [vmem:[#allocation2 + $0x78] sm:$0xff]  ;;  %v8678_v23 = vpop.f32.mrf.mxu0 }
 0x11d   : > { %1994 = vst.msk [vmem:[#allocation2 + $0x93] sm:$0xff] %vm701_vm1, %v1618_v25  ;;  %v1644_v32 = vrot.slane %v1636_v56, %v9722_v54  ;;  %v1651_v33 = vrot.slane %v1637_v26, %v9722_v54  ;;  %v1125_v34 = vcombine.high %v1123_v27, %v1123_v27  ;;  %v611_v2 = vadd.f32 %v9719_v51, %v9884_v36  ;;  %v2067_v36 = vld [vmem:[#allocation2 + $0x81] sm:$0xff] }
 0x11e   : > { %8709 = vmatmul.mubr.msk.f32.gmra.mxu1 %vm701_vm1, %v2066_v20  ;;  %1997 = vst.msk [vmem:[#allocation2 + $0xab] sm:$0xff] %vm701_vm1, %v1669_v29  ;;  %v1688_v39 = vcombine.low %v1124_v30, %v1123_v27  ;;  %v1092_v41 = vcombine.high %v687_v31, %v687_v31  ;;  %v1099_v42 = vrot.slane %v687_v31, %v9722_v54  ;;  %v2030_v37 = vld [vmem:[#allocation2 + $0x80] sm:$0xff] }
 0x11f   : > { %v1143_v43 = vcombine.high %v690_v0, %v690_v0  ;;  %8765 = vmatmul.mubr.msk.f32.gmra.mxu0 %vm701_vm1, %v2029_v18  ;;  %v1652_v44 = vcombine.low %v1644_v32, %v1651_v33  ;;  %v9944_v45 = vcombine.low %v1125_v34, %v9731_v5  ;;  %v1150_v46 = vrot.slane %v690_v0, %v9722_v54 }
 0x120   : > { %v689_v47 = vmax.f32 %v611_v2, 0.0  ;;  %8711 = vmatprep.mubr.msk.f32.mxu1 %vm701_vm1, %v2067_v36  ;;  %8767 = vmatprep.mubr.msk.f32.mxu0 %vm701_vm1, %v2030_v37  ;;  %v1702_v49 = vrot.slane %v1688_v39, %v9722_v54  ;;  %v1106_v50 = vrot.slane %v1092_v41, %v9722_v54  ;;  %v1107_v52 = vcombine.high %v1099_v42, %v1099_v42  ;;  %v640_v39 = vpop.f32.mrf.mxu0 }
 0x121   : > { %v1670_v55 = vcombine.low %v9731_v5, %v1099_v42  ;;  %1996 = vst.msk [vmem:[#allocation2 + $0xa3] sm:$0xff] %vm701_vm1, %v1652_v44  ;;  %v1712_v57 = vrot.slane %v9944_v45, %v9722_v54  ;;  %v1157_v58 = vrot.slane %v1143_v43, %v9722_v54  ;;  %v1158_v59 = vcombine.high %v1150_v46, %v1150_v46  ;;  %v2068_v40 = vld [vmem:[#allocation2 + $0x89] sm:$0xff] }
 0x122   : > { %v1126_v61 = vcombine.high %v689_v47, %v689_v47  ;;  %v1108_v48 = vcombine.high %v1106_v50, %v1106_v50  ;;  %v1671_v1 = vcombine.low %v1107_v52, %v1106_v50  ;;  %v1133_v4 = vrot.slane %v689_v47, %v9722_v54  ;;  %8712 = vmatmul.mubr.msk.f32.gmra.mxu1 %vm701_vm1, %v2068_v40  ;;  %v2031_v6 = vld [vmem:[#allocation2 + $0x88] sm:$0xff] }
 0x123   : > { %v1678_v3 = vrot.slane %v1670_v55, %v9722_v54  ;;  %v1159_v7 = vcombine.high %v1157_v58, %v1157_v58  ;;  %v1722_v53 = vcombine.low %v1150_v46, %v1158_v59  ;;  %v626_v63 = vadd.f32 %v9895_v60, %v9719_v51  ;;  %8768 = vmatmul.mubr.msk.f32.gmra.mxu0 %vm701_vm1, %v2031_v6 }
 0x124   : > { %v1140_v8 = vrot.slane %v1126_v61, %v9722_v54  ;;  %v1685_v10 = vrot.slane %v1671_v1, %v9722_v54  ;;  %v1687_v11 = vcombine.low %v1108_v48, %v9915_v21  ;;  %v1141_v12 = vcombine.high %v1133_v4, %v1133_v4  ;;  %v2069_v14 = vld [vmem:[#allocation2 + $0x91] sm:$0xff]  ;;  %v2070_v60 = vld [vmem:[#allocation2 + $0x99] sm:$0xff]  ;;  %v8681_v48 = vpop.f32.mrf.mxu0 }
 0x125   : > { %v621_v13 = vadd.f32 %v9719_v51, %v9909_v16  ;;  %v2032_v9 = vld [vmem:[#allocation2 + $0x90] sm:$0xff]  ;;  %v1736_v15 = vrot.slane %v1722_v53, %v9722_v54  ;;  %v1738_v17 = vcombine.low %v1157_v58, %v1159_v7  ;;  %v692_v22 = vmax.f32 %v626_v63, 0.0  ;;  %8714 = vmatprep.mubr.msk.f32.mxu1 %vm701_vm1, %v2069_v14  ;;  %v2033_v16 = vld [vmem:[#allocation2 + $0x98] sm:$0xff] }
 0x126   : > { %v1142_v19 = vcombine.high %v1140_v8, %v1140_v8  ;;  %8770 = vmatprep.mubr.msk.f32.mxu0 %vm701_vm1, %v2032_v9  ;;  %v1686_v24 = vcombine.low %v1678_v3, %v1685_v10  ;;  %v1695_v21 = vrot.slane %v1687_v11, %v9722_v54  ;;  %v1705_v25 = vcombine.low %v1133_v4, %v1141_v12 }
 0x127   : > { %v691_v56 = vmax.f32 %v621_v13, 0.0  ;;  %8715 = vmatmul.mubr.msk.f32.gmra.mxu1 %vm701_vm1, %v2070_v60  ;;  %v1746_v26 = vrot.slane %v1738_v17, %v9722_v54  ;;  %v1177_v28 = vcombine.high %v692_v22, %v692_v22  ;;  %v1184_v29 = vrot.slane %v692_v22, %v9722_v54  ;;  %8771 = vmatmul.mubr.msk.f32.gmra.mxu0 %vm701_vm1, %v2033_v16  ;;  %v650_v22 = vpop.f32.mrf.mxu0 }
 0x128   : > { %v1721_v27 = vcombine.low %v1140_v8, %v1142_v19  ;;  %v1703_v30 = vcombine.low %v1695_v21, %v1702_v49  ;;  %1998 = vst.msk [vmem:[#allocation2 + $0xb3] sm:$0xff] %vm701_vm1, %v1686_v24  ;;  %v1719_v31 = vrot.slane %v1705_v25, %v9722_v54  ;;  %v2071_v32 = vld [vmem:[#allocation2 + $0xa1] sm:$0xff]  ;;  %v636_v18 = vadd.f32 %v9932_v35, %v9719_v51  ;;  %v2072_v44 = vld [vmem:[#allocation2 + $0xa9] sm:$0xff] }
 0x129   : > { %v1160_v0 = vcombine.high %v691_v56, %v691_v56  ;;  %v1167_v20 = vrot.slane %v691_v56, %v9722_v54  ;;  %v1191_v34 = vrot.slane %v1177_v28, %v9722_v54  ;;  %v1192_v2 = vcombine.high %v1184_v29, %v1184_v29  ;;  %8717 = vmatprep.mubr.msk.f32.mxu1 %vm701_vm1, %v2071_v32  ;;  %v2034_v41 = vld [vmem:[#allocation2 + $0xa0] sm:$0xff]  ;;  %v2035_v45 = vld [vmem:[#allocation2 + $0xa8] sm:$0xff] }
 0x12a   : > { %v1729_v33 = vrot.slane %v1721_v27, %v9722_v54  ;;  %1999 = vst.msk [vmem:[#allocation2 + $0xbb] sm:$0xff] %vm701_vm1, %v1703_v30  ;;  %v1720_v42 = vcombine.low %v1712_v57, %v1719_v31  ;;  %8773 = vmatprep.mubr.msk.f32.mxu0 %vm701_vm1, %v2034_v41  ;;  %v694_v35 = vmax.f32 %v636_v18, 0.0  ;;  %v631_v57 = vadd.f32 %v9719_v51, %v9957_v62 }
 0x12b   : > { %v1174_v43 = vrot.slane %v1160_v0, %v9722_v54  ;;  %v1175_v36 = vcombine.high %v1167_v20, %v1167_v20  ;;  %v1739_v37 = vcombine.low %v9731_v5, %v1167_v20  ;;  %v1193_v47 = vcombine.high %v1191_v34, %v1191_v34  ;;  %8718 = vmatmul.mubr.msk.f32.gmra.mxu1 %vm701_vm1, %v2072_v44 }
 0x12c   : > { %v1737_v46 = vcombine.low %v1729_v33, %v1736_v15  ;;  %v1772_v49 = vcombine.low %v1192_v2, %v1191_v34  ;;  %8774 = vmatmul.mubr.msk.f32.gmra.mxu0 %vm701_vm1, %v2035_v45  ;;  %2000 = vst.msk [vmem:[#allocation2 + $0xc3] sm:$0xff] %vm701_vm1, %v1720_v42  ;;  %v1211_v61 = vcombine.high %v694_v35, %v694_v35  ;;  %v693_v6 = vmax.f32 %v631_v57, 0.0 }
 0x12d   : > { %v1176_v50 = vcombine.high %v1174_v43, %v1174_v43  ;;  %v1753_v52 = vrot.slane %v1739_v37, %v9722_v54  ;;  %v1755_v55 = vcombine.low %v1175_v36, %v1174_v43  ;;  %v1773_v58 = vcombine.low %v1193_v47, %v9731_v5 }
 0x12e   : > { %2001 = vst.msk [vmem:[#allocation2 + $0xcb] sm:$0xff] %vm701_vm1, %v1737_v46  ;;  %v1780_v59 = vrot.slane %v1772_v49, %v9722_v54  ;;  %v1218_v40 = vrot.slane %v694_v35, %v9722_v54  ;;  %v1225_v53 = vrot.slane %v1211_v61, %v9722_v54  ;;  %v646_v8 = vadd.f32 %v8678_v23, %v9719_v51 }
 0x12f   : > { %v1754_v1 = vcombine.low %v1746_v26, %v1753_v52  ;;  %v1756_v3 = vcombine.low %v1176_v50, %v1184_v29  ;;  %v1763_v4 = vrot.slane %v1755_v55, %v9722_v54  ;;  %v1787_v7 = vrot.slane %v1773_v58, %v9722_v54  ;;  %v2073_v63 = vld [vmem:[#allocation2 + $0xb1] sm:$0xff] }
 0x130   : > { %v1226_v62 = vcombine.high %v1218_v40, %v1218_v40  ;;  %v1194_v11 = vcombine.high %v693_v6, %v693_v6  ;;  %v1201_v12 = vrot.slane %v693_v6, %v9722_v54  ;;  %v641_v13 = vadd.f32 %v9719_v51, %v640_v39  ;;  %8720 = vmatprep.mubr.msk.f32.mxu1 %vm701_vm1, %v2073_v63  ;;  %v2036_v14 = vld [vmem:[#allocation2 + $0xb0] sm:$0xff]  ;;  %v8684_v39 = vpop.f32.mrf.mxu0 }
 0x131   : > { %v1770_v10 = vrot.slane %v1756_v3, %v9722_v54  ;;  %2002 = vst.msk [vmem:[#allocation2 + $0xd3] sm:$0xff] %vm701_vm1, %v1754_v1  ;;  %v1788_v9 = vcombine.low %v1780_v59, %v1787_v7  ;;  %v1227_v15 = vcombine.high %v1225_v53, %v1225_v53  ;;  %v696_v19 = vmax.f32 %v646_v8, 0.0  ;;  %8776 = vmatprep.mubr.msk.f32.mxu0 %vm701_vm1, %v2036_v14  ;;  %v2074_v23 = vld [vmem:[#allocation2 + $0xb9] sm:$0xff] }
 0x132   : > { %v1806_v17 = vcombine.low %v1218_v40, %v1226_v62  ;;  %v2037_v60 = vld [vmem:[#allocation2 + $0xb8] sm:$0xff]  ;;  %v1208_v21 = vrot.slane %v1194_v11, %v9722_v54  ;;  %v1209_v25 = vcombine.high %v1201_v12, %v1201_v12  ;;  %v695_v56 = vmax.f32 %v641_v13, 0.0  ;;  %8721 = vmatmul.mubr.msk.f32.gmra.mxu1 %vm701_vm1, %v2074_v23  ;;  %v9338_v40 = vld [vmem:[%s11774_s5] ss:$0 sm:$0xff]  ;;  %v660_v1 = vpop.f32.mrf.mxu0 }
 0x133   : > { %v1771_v24 = vcombine.low %v1763_v4, %v1770_v10  ;;  %8777 = vmatmul.mubr.msk.f32.gmra.mxu0 %vm701_vm1, %v2037_v60  ;;  %2004 = vst.msk [vmem:[#allocation2 + $0xe3] sm:$0xff] %vm701_vm1, %v1788_v9  ;;  %v1807_v16 = vcombine.low %v1225_v53, %v1227_v15  ;;  %v1245_v27 = vcombine.high %v696_v19, %v696_v19  ;;  %v2075_v29 = vld [vmem:[#allocation2 + $0xc1] sm:$0xff] }
 0x134   : > { %v1814_v26 = vrot.slane %v1806_v17, %v9722_v54  ;;  %v1252_v28 = vrot.slane %v696_v19, %v9722_v54  ;;  %v1210_v30 = vcombine.high %v1208_v21, %v1208_v21  ;;  %v1789_v31 = vcombine.low %v1201_v12, %v1209_v25  ;;  %8723 = vmatprep.mubr.msk.f32.mxu1 %vm701_vm1, %v2075_v29  ;;  %v2038_v32 = vld [vmem:[#allocation2 + $0xc0] sm:$0xff] }
 0x135   : > { %2003 = vst.msk [vmem:[#allocation2 + $0xdb] sm:$0xff] %vm701_vm1, %v1771_v24  ;;  %v1228_v0 = vcombine.high %v695_v56, %v695_v56  ;;  %v1235_v20 = vrot.slane %v695_v56, %v9722_v54  ;;  %v1821_v33 = vrot.slane %v1807_v16, %v9722_v54  ;;  %v1259_v34 = vrot.slane %v1245_v27, %v9722_v54  ;;  %v2076_v41 = vld [vmem:[#allocation2 + $0xc9] sm:$0xff] }
 0x136   : > { %v1260_v2 = vcombine.high %v1252_v28, %v1252_v28  ;;  %v656_v18 = vadd.f32 %v8681_v48, %v9719_v51  ;;  %8779 = vmatprep.mubr.msk.f32.mxu0 %vm701_vm1, %v2038_v32  ;;  %v1790_v42 = vcombine.low %v1208_v21, %v1210_v30  ;;  %v1797_v43 = vrot.slane %v1789_v31, %v9722_v54  ;;  %v2039_v44 = vld [vmem:[#allocation2 + $0xc8] sm:$0xff] }
 0x137   : > { %v1242_v36 = vrot.slane %v1228_v0, %v9722_v54  ;;  %v1243_v37 = vcombine.high %v1235_v20, %v1235_v20  ;;  %8724 = vmatmul.mubr.msk.f32.gmra.mxu1 %vm701_vm1, %v2076_v41  ;;  %v1822_v45 = vcombine.low %v1814_v26, %v1821_v33  ;;  %v1261_v46 = vcombine.high %v1259_v34, %v1259_v34 }
 0x138   : > { %v1841_v47 = vcombine.low %v1260_v2, %v1259_v34  ;;  %v1823_v49 = vcombine.low %v9731_v5, %v1235_v20  ;;  %8780 = vmatmul.mubr.msk.f32.gmra.mxu0 %vm701_vm1, %v2039_v44  ;;  %v2077_v51 = vld [vmem:[#allocation2 + $0xd1] sm:$0xff]  ;;  %v1804_v50 = vrot.slane %v1790_v42, %v9722_v54  ;;  %v698_v57 = vmax.f32 %v656_v18, 0.0 }
 0x139   : > { %v2040_v35 = vld [vmem:[#allocation2 + $0xd0] sm:$0xff]  ;;  %v1244_v52 = vcombine.high %v1242_v36, %v1242_v36  ;;  %v1824_v55 = vcombine.low %v1243_v37, %v1242_v36  ;;  %8726 = vmatprep.mubr.msk.f32.mxu1 %vm701_vm1, %v2077_v51  ;;  %2006 = vst.msk [vmem:[#allocation2 + $0xf3] sm:$0xff] %vm701_vm1, %v1822_v45  ;;  %v10034_v59 = vcombine.low %v1261_v46, %v9731_v5 }
 0x13a   : > { %8782 = vmatprep.mubr.msk.f32.mxu0 %vm701_vm1, %v2040_v35  ;;  %v1855_v58 = vrot.slane %v1841_v47, %v9722_v54  ;;  %v1831_v61 = vrot.slane %v1823_v49, %v9722_v54  ;;  %v651_v48 = vadd.f32 %v9338_v40, %v650_v22  ;;  %v1805_v3 = vcombine.low %v1797_v43, %v1804_v50 }
 0x13b   : > { %v1838_v4 = vrot.slane %v1824_v55, %v9722_v54  ;;  %v1840_v6 = vcombine.low %v1244_v52, %v1252_v28  ;;  %v1279_v7 = vcombine.high %v698_v57, %v698_v57  ;;  %v1286_v53 = vrot.slane %v698_v57, %v9722_v54 }
 0x13c   : > { %v697_v62 = vmax.f32 %v651_v48, 0.0  ;;  %v666_v8 = vadd.f32 %v9338_v40, %v8684_v39  ;;  %v2078_v63 = vld [vmem:[#allocation2 + $0xd9] sm:$0xff]  ;;  %2005 = vst.msk [vmem:[#allocation2 + $0xeb] sm:$0xff] %vm701_vm1, %v1805_v3  ;;  %v661_v13 = vadd.f32 %v9338_v40, %v660_v1  ;;  %v2079_v9 = vld [vmem:[#allocation2 + $0xe1] sm:$0xff]  ;;  %v1865_v60 = vrot.slane %v10034_v59, %v9722_v54 }
 0x13d   : > { %v1839_v10 = vcombine.low %v1831_v61, %v1838_v4  ;;  %v1848_v11 = vrot.slane %v1840_v6, %v9722_v54  ;;  %v1293_v12 = vrot.slane %v1279_v7, %v9722_v54  ;;  %8727 = vmatmul.mubr.msk.f32.gmra.mxu1 %vm701_vm1, %v2078_v63  ;;  %v2041_v14 = vld [vmem:[#allocation2 + $0xd8] sm:$0xff]  ;;  %v1294_v15 = vcombine.high %v1286_v53, %v1286_v53  ;;  %v2042_v23 = vld [vmem:[#allocation2 + $0xe0] sm:$0xff] }
 0x13e   : > { %v1262_v17 = vcombine.high %v697_v62, %v697_v62  ;;  %v1269_v19 = vrot.slane %v697_v62, %v9722_v54  ;;  %v700_v22 = vmax.f32 %v666_v8, 0.0  ;;  %8783 = vmatmul.mubr.msk.f32.gmra.mxu0 %vm701_vm1, %v2041_v14  ;;  %8729 = vmatprep.mubr.msk.f32.mxu1 %vm701_vm1, %v2079_v9  ;;  %v699_v25 = vmax.f32 %v661_v13, 0.0  ;;  %v8689_v62 = vpop.f32.mrf.mxu1  ;;  %v8745_v8 = vpop.f32.mrf.mxu0  ;;  %v2795_v14 = vld [vmem:[#allocation2 + $0x2] sm:$0xff] }
 0x13f   : > { %v1856_v24 = vcombine.low %v1848_v11, %v1855_v58  ;;  %2007 = vst.msk [vmem:[#allocation2 + $0xfb] sm:$0xff] %vm701_vm1, %v1839_v10  ;;  %v1295_v21 = vcombine.high %v1293_v12, %v1293_v12  ;;  %8785 = vmatprep.mubr.msk.f32.mxu0 %vm701_vm1, %v2042_v23  ;;  %v1875_v56 = vcombine.low %v1286_v53, %v1294_v15  ;;  %v10098_v23 = vld [vmem:[%s11771_s2 + $0x30] sm:$0xff] }
 0x140   : > { %v1276_v16 = vrot.slane %v1262_v17, %v9722_v54  ;;  %v1277_v26 = vcombine.high %v1269_v19, %v1269_v19  ;;  %v1313_v27 = vcombine.high %v700_v22, %v700_v22  ;;  %v1320_v29 = vrot.slane %v700_v22, %v9722_v54  ;;  %v3222_v17 = vld [vmem:[#allocation2 + $0x12] sm:$0xff]  ;;  %v3223_v22 = vld [vmem:[#allocation2 + $0x1a] sm:$0xff] }
 0x141   : > { %2008 = vst.msk [vmem:[#allocation2 + $0x103] sm:$0xff] %vm701_vm1, %v1856_v24  ;;  %v1891_v28 = vcombine.low %v1293_v12, %v1295_v21  ;;  %v1296_v30 = vcombine.high %v699_v25, %v699_v25  ;;  %v1303_v31 = vrot.slane %v699_v25, %v9722_v54  ;;  %v1889_v0 = vrot.slane %v1875_v56, %v9722_v54  ;;  %v3224_v24 = vld [vmem:[#allocation2 + $0x22] sm:$0xff]  ;;  %v3225_v21 = vld [vmem:[#allocation2 + $0x2a] sm:$0xff]  ;;  %v3226_v25 = vld [vmem:[#allocation2 + $0x32] sm:$0xff] }
 0x142   : > { %v1278_v20 = vcombine.high %v1276_v16, %v1276_v16  ;;  %v1858_v32 = vcombine.low %v1269_v19, %v1277_v26  ;;  %v1327_v33 = vrot.slane %v1313_v27, %v9722_v54  ;;  %v1328_v2 = vcombine.high %v1320_v29, %v1320_v29  ;;  %v2796_v19 = vld [vmem:[#allocation2 + $0xa] sm:$0xff]  ;;  %v3227_v56 = vld [vmem:[#allocation2 + $0x3a] sm:$0xff]  ;;  %v3230_v26 = vld [vmem:[#allocation2 + $0x52] sm:$0xff] }
 0x143   : > { %v1899_v34 = vrot.slane %v1891_v28, %v9722_v54  ;;  %v1310_v18 = vrot.slane %v1296_v30, %v9722_v54  ;;  %v1311_v39 = vcombine.high %v1303_v31, %v1303_v31  ;;  %v1892_v36 = vcombine.low %v9731_v5, %v1303_v31  ;;  %v2080_v37 = vld [vmem:[#allocation2 + $0xe9] sm:$0xff]  ;;  %v2081_v49 = vld [vmem:[#allocation2 + $0xf1] sm:$0xff]  ;;  %v3231_v28 = vld [vmem:[#allocation2 + $0x5a] sm:$0xff] }
 0x144   : > { %v1872_v41 = vrot.slane %v1858_v32, %v9722_v54  ;;  %v1874_v42 = vcombine.low %v1276_v16, %v1278_v20  ;;  %v1329_v43 = vcombine.high %v1327_v33, %v1327_v33  ;;  %v2043_v44 = vld [vmem:[#allocation2 + $0xe8] sm:$0xff]  ;;  %v1925_v45 = vcombine.low %v1328_v2, %v1327_v33  ;;  %8730 = vmatmul.mubr.msk.f32.gmra.mxu1 %vm701_vm1, %v2080_v37  ;;  %v2044_v55 = vld [vmem:[#allocation2 + $0xf0] sm:$0xff]  ;;  %v10122_v27 = vld [vmem:[%s11771_s2 + $0x38] sm:$0xff] }
 0x145   : > { %v1312_v46 = vcombine.high %v1310_v18, %v1310_v18  ;;  %v1908_v47 = vcombine.low %v1311_v39, %v1310_v18  ;;  %8786 = vmatmul.mubr.msk.f32.gmra.mxu0 %vm701_vm1, %v2043_v44  ;;  %v1906_v52 = vrot.slane %v1892_v36, %v9722_v54  ;;  %8732 = vmatprep.mubr.msk.f32.mxu1 %vm701_vm1, %v2081_v49  ;;  %v3228_v16 = vld [vmem:[#allocation2 + $0x42] sm:$0xff]  ;;  %v3233_v30 = vld [vmem:[#allocation2 + $0x6a] sm:$0xff]  ;;  %v3234_v31 = vld [vmem:[#allocation2 + $0x72] sm:$0xff] }
 0x146   : > { %v1873_v51 = vcombine.low %v1865_v60, %v1872_v41  ;;  %v1882_v35 = vrot.slane %v1874_v42, %v9722_v54  ;;  %v1926_v50 = vcombine.low %v1329_v43, %v9731_v5  ;;  %v1933_v57 = vrot.slane %v1925_v45, %v9722_v54  ;;  %8788 = vmatprep.mubr.msk.f32.mxu0 %vm701_vm1, %v2044_v55  ;;  %v2082_v1 = vld [vmem:[#allocation2 + $0xf9] sm:$0xff]  ;;  %v3236_v20 = vld [vmem:[#allocation2 + $0x82] sm:$0xff]  ;;  %v3237_v32 = vld [vmem:[#allocation2 + $0x8a] sm:$0xff] }
 0x147   : > { %v1909_v58 = vcombine.low %v1312_v46, %v1320_v29  ;;  %v1916_v59 = vrot.slane %v1908_v47, %v9722_v54  ;;  %v1907_v48 = vcombine.low %v1899_v34, %v1906_v52  ;;  %v2045_v5 = vld [vmem:[#allocation2 + $0xf8] sm:$0xff]  ;;  %v10083_v63 = vadd.f32 %v8745_v8, %v8689_v62  ;;  %v9339_v60 = vld [vmem:[%s11771_s2 + $0x20] sm:$0xff]  ;;  %v3241_v18 = vld [vmem:[#allocation2 + $0xaa] sm:$0xff] }
 0x148   : > { %v1890_v61 = vcombine.low %v1882_v35, %v1889_v0  ;;  %2009 = vst.msk [vmem:[#allocation2 + $0x10b] sm:$0xff] %vm701_vm1, %v1873_v51  ;;  %v1940_v40 = vrot.slane %v1926_v50, %v9722_v54  ;;  %8733 = vmatmul.mubr.msk.f32.gmra.mxu1 %vm701_vm1, %v2082_v1  ;;  %v2083_v4 = vld [vmem:[#allocation2 + $0x101] sm:$0xff]  ;;  %v3238_v33 = vld [vmem:[#allocation2 + $0x92] sm:$0xff]  ;;  %v3245_v43 = vld [vmem:[#allocation2 + $0xca] sm:$0xff] }
 0x149   : > { %v1923_v3 = vrot.slane %v1909_v58, %v9722_v54  ;;  %8789 = vmatmul.mubr.msk.f32.gmra.mxu0 %vm701_vm1, %v2045_v5  ;;  %v2046_v6 = vld [vmem:[#allocation2 + $0x100] sm:$0xff]  ;;  %2011 = vst.msk [vmem:[#allocation2 + $0x11b] sm:$0xff] %vm701_vm1, %v1907_v48  ;;  %8735 = vmatprep.mubr.msk.f32.mxu1 %vm701_vm1, %v2083_v4  ;;  %v3242_v39 = vld [vmem:[#allocation2 + $0xb2] sm:$0xff]  ;;  %v3249_v45 = vld [vmem:[#allocation2 + $0xea] sm:$0xff] }
 0x14a   : > { %2010 = vst.msk [vmem:[#allocation2 + $0x113] sm:$0xff] %vm701_vm1, %v1890_v61  ;;  %v1941_v7 = vcombine.low %v1933_v57, %v1940_v40  ;;  %8791 = vmatprep.mubr.msk.f32.mxu0 %vm701_vm1, %v2046_v6  ;;  %v3232_v29 = vld [vmem:[#allocation2 + $0x62] sm:$0xff]  ;;  %v3235_v0 = vld [vmem:[#allocation2 + $0x7a] sm:$0xff]  ;;  %v3246_v36 = vld [vmem:[#allocation2 + $0xd2] sm:$0xff] }
 0x14b   : > { %v1924_v53 = vcombine.low %v1916_v59, %v1923_v3  ;;  %v3239_v34 = vld [vmem:[#allocation2 + $0x9a] sm:$0xff]  ;;  %v3240_v2 = vld [vmem:[#allocation2 + $0xa2] sm:$0xff]  ;;  %v3250_v46 = vld [vmem:[#allocation2 + $0xf2] sm:$0xff] }
 0x14c   : > { %2013 = vst.msk [vmem:[#allocation2 + $0x12b] sm:$0xff] %vm701_vm1, %v1941_v7  ;;  %v3243_v41 = vld [vmem:[#allocation2 + $0xba] sm:$0xff]  ;;  %v3244_v42 = vld [vmem:[#allocation2 + $0xc2] sm:$0xff]  ;;  %v3652_v5 = vld [vmem:[#allocation2 + $0x2b] sm:$0xff] }
 0x14d   : > { %2012 = vst.msk [vmem:[#allocation2 + $0x123] sm:$0xff] %vm701_vm1, %v1924_v53  ;;  %v3247_v37 = vld [vmem:[#allocation2 + $0xda] sm:$0xff]  ;;  %v3248_v44 = vld [vmem:[#allocation2 + $0xe2] sm:$0xff]  ;;  %v10195_v3 = vld [vmem:[#allocation2 + $0x2c] sm:$0xff] }
 0x14e   : > { %v3251_v47 = vld [vmem:[#allocation2 + $0xfa] sm:$0xff]  ;;  %v3252_v49 = vld [vmem:[#allocation2 + $0x102] sm:$0xff] }
 0x14f   : > { %v2084_v10 = vld [vmem:[#allocation2 + $0x109] sm:$0xff]  ;;  %v3649_v57 = vld [vmem:[#allocation2 + $0x13] sm:$0xff]  ;;  %v3650_v59 = vld [vmem:[#allocation2 + $0x1b] sm:$0xff] }
 0x150   : > { %v2047_v11 = vld [vmem:[#allocation2 + $0x108] sm:$0xff]  ;;  %8736 = vmatmul.mubr.msk.f32.gmra.mxu1 %vm701_vm1, %v2084_v10  ;;  %v4076_v58 = vld [vmem:[#allocation2 + $0x14] sm:$0xff]  ;;  %v4077_v61 = vld [vmem:[#allocation2 + $0x1c] sm:$0xff] }
 0x151   : > { %8792 = vmatmul.mubr.msk.f32.gmra.mxu0 %vm701_vm1, %v2047_v11  ;;  %v2085_v12 = vld [vmem:[#allocation2 + $0x111] sm:$0xff]  ;;  %v2086_v9 = vld [vmem:[#allocation2 + $0x119] sm:$0xff]  ;;  %v3651_v40 = vld [vmem:[#allocation2 + $0x23] sm:$0xff] }
 0x152   : > { %v2048_v13 = vld [vmem:[#allocation2 + $0x110] sm:$0xff]  ;;  %8738 = vmatprep.mubr.msk.f32.mxu1 %vm701_vm1, %v2085_v12  ;;  %v2049_v15 = vld [vmem:[#allocation2 + $0x118] sm:$0xff]  ;;  %v10186_v48 = vld [vmem:[%s11771_s2 + $0x40] sm:$0xff] }
 0x153   : > { %8794 = vmatprep.mubr.msk.f32.mxu0 %vm701_vm1, %v2048_v13  ;;  %v3253_v51 = vld [vmem:[#allocation2 + $0x10a] sm:$0xff]  ;;  %v3254_v35 = vld [vmem:[#allocation2 + $0x112] sm:$0xff]  ;;  %v3255_v50 = vld [vmem:[#allocation2 + $0x11a] sm:$0xff] }
 0x154   : > { %8739 = vmatmul.mubr.msk.f32.gmra.mxu1 %vm701_vm1, %v2086_v9  ;;  %v3256_v52 = vld [vmem:[#allocation2 + $0x122] sm:$0xff]  ;;  %v3257_v55 = vld [vmem:[#allocation2 + $0x12a] sm:$0xff]  ;;  %v3653_v4 = vld [vmem:[#allocation2 + $0x33] sm:$0xff] }
 0x155   : > { %8795 = vmatmul.mubr.msk.f32.gmra.mxu0 %vm701_vm1, %v2049_v15  ;;  %8799 = vmatprep.mubr.msk.f32.mxu1 %vm701_vm1, %v2795_v14  ;;  %v10190_v1 = vld [vmem:[#allocation2 + $0x24] sm:$0xff]  ;;  %v10201_v6 = vld [vmem:[#allocation2 + $0x34] sm:$0xff]  ;;  %v10206_v53 = vld [vmem:[#allocation2 + $0x3c] sm:$0xff] }
 0x156   : > { %8855 = vmatprep.mubr.msk.f32.mxu0 %vm701_vm1, %v3222_v17  ;;  %v3654_v7 = vld [vmem:[#allocation2 + $0x3b] sm:$0xff]  ;;  %v3655_v62 = vld [vmem:[#allocation2 + $0x43] sm:$0xff]  ;;  %v3656_v10 = vld [vmem:[#allocation2 + $0x4b] sm:$0xff] }
 0x157   : > { %v10211_v8 = vld [vmem:[#allocation2 + $0x44] sm:$0xff]  ;;  %v10216_v11 = vld [vmem:[#allocation2 + $0x4c] sm:$0xff]  ;;  %v10221_v13 = vld [vmem:[#allocation2 + $0x54] sm:$0xff] }
 0x158   : > { %8800 = vmatmul.mubr.msk.f32.vlgmr.msra.gmra.mxu1 %vm701_vm1, %v2796_v19  ;;  %v3657_v12 = vld [vmem:[#allocation2 + $0x53] sm:$0xff]  ;;  %v3658_v14 = vld [vmem:[#allocation2 + $0x5b] sm:$0xff]  ;;  %v3659_v15 = vld [vmem:[#allocation2 + $0x63] sm:$0xff] }
 0x159   : > { %8856 = vmatmul.mubr.msk.f32.vlgmr.msra.gmra.mxu0 %vm701_vm1, %v3223_v22  ;;  %8910 = vmatpush3.msra.mxu1 %v9339_v60  ;;  %v10226_v9 = vld [vmem:[#allocation2 + $0x5c] sm:$0xff]  ;;  %v3660_v19 = vld [vmem:[#allocation2 + $0x6b] sm:$0xff]  ;;  %v10241_v60 = vld [vmem:[#allocation2 + $0x74] sm:$0xff] }
 0x15a   : > { %8802 = vmatprep.mubr.msk.f32.mxu1 %vm701_vm1, %v3222_v17  ;;  %8858 = vmatprep.mubr.msk.f32.mxu0 %vm701_vm1, %v3224_v24  ;;  %v10231_v17 = vld [vmem:[#allocation2 + $0x64] sm:$0xff] }
 0x15b   : > { %8966 = vmatpush3.msra.mxu0 %v9938_v38  ;;  %9021 = vmatprep.subr.mxu1 %v10098_v23  ;;  %v3229_v38 = vld [vmem:[#allocation2 + $0x4a] sm:$0xff] }
 0x15c   : > { %8803 = vmatmul.mubr.msk.f32.gmra.mxu1 %vm701_vm1, %v3223_v22  ;;  %9077 = vmatprep.subr.mxu0 %v10122_v27  ;;  %v10236_v22 = vld [vmem:[#allocation2 + $0x6c] sm:$0xff] }
 0x15d   : > { %8859 = vmatmul.mubr.msk.f32.gmra.mxu0 %vm701_vm1, %v3225_v21  ;;  %8805 = vmatprep.mubr.msk.f32.mxu1 %vm701_vm1, %v3224_v24  ;;  %v3662_v24 = vld [vmem:[#allocation2 + $0x7b] sm:$0xff] }
 0x15e   : > { %8861 = vmatprep.mubr.msk.f32.mxu0 %vm701_vm1, %v3226_v25 }
 0x160   : > { %8806 = vmatmul.mubr.msk.f32.gmra.mxu1 %vm701_vm1, %v3225_v21  ;;  %v10246_v21 = vld [vmem:[#allocation2 + $0x7c] sm:$0xff] }
 0x161   : > { %8862 = vmatmul.mubr.msk.f32.gmra.mxu0 %vm701_vm1, %v3227_v56  ;;  %8808 = vmatprep.mubr.msk.f32.mxu1 %vm701_vm1, %v3226_v25  ;;  %v3663_v25 = vld [vmem:[#allocation2 + $0x83] sm:$0xff] }
 0x162   : > { %8864 = vmatprep.mubr.msk.f32.mxu0 %vm701_vm1, %v3228_v16 }
 0x164   : > { %8809 = vmatmul.mubr.msk.f32.gmra.mxu1 %vm701_vm1, %v3227_v56  ;;  %v10251_v56 = vld [vmem:[#allocation2 + $0x84] sm:$0xff] }
 0x165   : > { %8865 = vmatmul.mubr.msk.f32.gmra.mxu0 %vm701_vm1, %v3229_v38  ;;  %8811 = vmatprep.mubr.msk.f32.mxu1 %vm701_vm1, %v3228_v16  ;;  %v10256_v16 = vpop.f32.mrf.mxu1 }
 0x166   : > { %8867 = vmatprep.mubr.msk.f32.mxu0 %vm701_vm1, %v3230_v26 }
 0x168   : > { %8812 = vmatmul.mubr.msk.f32.gmra.mxu1 %vm701_vm1, %v3229_v38  ;;  %v10258_v38 = vpop.f32.mrf.mxu0 }
 0x169   : > { %8868 = vmatmul.mubr.msk.f32.gmra.mxu0 %vm701_vm1, %v3231_v28  ;;  %8814 = vmatprep.mubr.msk.f32.mxu1 %vm701_vm1, %v3230_v26  ;;  %v3664_v26 = vld [vmem:[#allocation2 + $0x8b] sm:$0xff] }
 0x16a   : > { %8870 = vmatprep.mubr.msk.f32.mxu0 %vm701_vm1, %v3232_v29 }
 0x16c   : > { %8815 = vmatmul.mubr.msk.f32.gmra.mxu1 %vm701_vm1, %v3231_v28 }
 0x16d   : > { %8871 = vmatmul.mubr.msk.f32.gmra.mxu0 %vm701_vm1, %v3233_v30  ;;  %8817 = vmatprep.mubr.msk.f32.mxu1 %vm701_vm1, %v3232_v29  ;;  %v3665_v29 = vld [vmem:[#allocation2 + $0x93] sm:$0xff] }
 0x16e   : > { %8873 = vmatprep.mubr.msk.f32.mxu0 %vm701_vm1, %v3234_v31 }
 0x170   : > { %8818 = vmatmul.mubr.msk.f32.gmra.mxu1 %vm701_vm1, %v3233_v30  ;;  %v10265_v30 = vld [vmem:[#allocation2 + $0x94] sm:$0xff] }
 0x171   : > { %8874 = vmatmul.mubr.msk.f32.gmra.mxu0 %vm701_vm1, %v3235_v0  ;;  %8820 = vmatprep.mubr.msk.f32.mxu1 %vm701_vm1, %v3234_v31 }
 0x172   : > { %8876 = vmatprep.mubr.msk.f32.mxu0 %vm701_vm1, %v3236_v20 }
 0x174   : > { %8821 = vmatmul.mubr.msk.f32.gmra.mxu1 %vm701_vm1, %v3235_v0 }
 0x175   : > { %8877 = vmatmul.mubr.msk.f32.gmra.mxu0 %vm701_vm1, %v3237_v32  ;;  %8823 = vmatprep.mubr.msk.f32.mxu1 %vm701_vm1, %v3236_v20 }
 0x176   : > { %8879 = vmatprep.mubr.msk.f32.mxu0 %vm701_vm1, %v3238_v33 }
 0x178   : > { %8824 = vmatmul.mubr.msk.f32.gmra.mxu1 %vm701_vm1, %v3237_v32 }
 0x179   : > { %8880 = vmatmul.mubr.msk.f32.gmra.mxu0 %vm701_vm1, %v3239_v34  ;;  %8826 = vmatprep.mubr.msk.f32.mxu1 %vm701_vm1, %v3238_v33  ;;  %v3666_v33 = vld [vmem:[#allocation2 + $0x9b] sm:$0xff] }
 0x17a   : > { %8882 = vmatprep.mubr.msk.f32.mxu0 %vm701_vm1, %v3240_v2 }
 0x17c   : > { %8827 = vmatmul.mubr.msk.f32.gmra.mxu1 %vm701_vm1, %v3239_v34  ;;  %v10272_v34 = vld [vmem:[#allocation2 + $0x9c] sm:$0xff] }
 0x17d   : > { %8883 = vmatmul.mubr.msk.f32.gmra.mxu0 %vm701_vm1, %v3241_v18  ;;  %8829 = vmatprep.mubr.msk.f32.mxu1 %vm701_vm1, %v3240_v2 }
 0x17e   : > { %8885 = vmatprep.mubr.msk.f32.mxu0 %vm701_vm1, %v3242_v39 }
 0x180   : > { %8830 = vmatmul.mubr.msk.f32.gmra.mxu1 %vm701_vm1, %v3241_v18 }
 0x181   : > { %8886 = vmatmul.mubr.msk.f32.gmra.mxu0 %vm701_vm1, %v3243_v41  ;;  %8832 = vmatprep.mubr.msk.f32.mxu1 %vm701_vm1, %v3242_v39  ;;  %v3667_v39 = vld [vmem:[#allocation2 + $0xa3] sm:$0xff] }
 0x182   : > { %8888 = vmatprep.mubr.msk.f32.mxu0 %vm701_vm1, %v3244_v42 }
 0x184   : > { %8833 = vmatmul.mubr.msk.f32.gmra.mxu1 %vm701_vm1, %v3243_v41  ;;  %v10279_v41 = vld [vmem:[#allocation2 + $0xa4] sm:$0xff] }
 0x185   : > { %8889 = vmatmul.mubr.msk.f32.gmra.mxu0 %vm701_vm1, %v3245_v43  ;;  %8835 = vmatprep.mubr.msk.f32.mxu1 %vm701_vm1, %v3244_v42 }
 0x186   : > { %8891 = vmatprep.mubr.msk.f32.mxu0 %vm701_vm1, %v3246_v36 }
 0x188   : > { %8836 = vmatmul.mubr.msk.f32.gmra.mxu1 %vm701_vm1, %v3245_v43 }
 0x189   : > { %8892 = vmatmul.mubr.msk.f32.gmra.mxu0 %vm701_vm1, %v3247_v37  ;;  %8838 = vmatprep.mubr.msk.f32.mxu1 %vm701_vm1, %v3246_v36 }
 0x18a   : > { %8894 = vmatprep.mubr.msk.f32.mxu0 %vm701_vm1, %v3248_v44 }
 0x18c   : > { %8839 = vmatmul.mubr.msk.f32.gmra.mxu1 %vm701_vm1, %v3247_v37 }
 0x18d   : > { %8895 = vmatmul.mubr.msk.f32.gmra.mxu0 %vm701_vm1, %v3249_v45  ;;  %8841 = vmatprep.mubr.msk.f32.mxu1 %vm701_vm1, %v3248_v44  ;;  %v3668_v44 = vld [vmem:[#allocation2 + $0xab] sm:$0xff] }
 0x18e   : > { %8897 = vmatprep.mubr.msk.f32.mxu0 %vm701_vm1, %v3250_v46 }
 0x190   : > { %8842 = vmatmul.mubr.msk.f32.gmra.mxu1 %vm701_vm1, %v3249_v45  ;;  %v10286_v45 = vld [vmem:[#allocation2 + $0xac] sm:$0xff] }
 0x191   : > { %8898 = vmatmul.mubr.msk.f32.gmra.mxu0 %vm701_vm1, %v3251_v47  ;;  %8844 = vmatprep.mubr.msk.f32.mxu1 %vm701_vm1, %v3250_v46 }
 0x192   : > { %8900 = vmatprep.mubr.msk.f32.mxu0 %vm701_vm1, %v3252_v49 }
 0x194   : > { %8845 = vmatmul.mubr.msk.f32.gmra.mxu1 %vm701_vm1, %v3251_v47  ;;  %v3669_v47 = vld [vmem:[#allocation2 + $0xb3] sm:$0xff] }
 0x195   : > { %8901 = vmatmul.mubr.msk.f32.gmra.mxu0 %vm701_vm1, %v3253_v51  ;;  %8847 = vmatprep.mubr.msk.f32.mxu1 %vm701_vm1, %v3252_v49  ;;  %v10293_v49 = vld [vmem:[#allocation2 + $0xb4] sm:$0xff] }
 0x196   : > { %8903 = vmatprep.mubr.msk.f32.mxu0 %vm701_vm1, %v3254_v35 }
 0x198   : > { %8848 = vmatmul.mubr.msk.f32.gmra.mxu1 %vm701_vm1, %v3253_v51  ;;  %v3670_v51 = vld [vmem:[#allocation2 + $0xbb] sm:$0xff] }
 0x199   : > { %8904 = vmatmul.mubr.msk.f32.gmra.mxu0 %vm701_vm1, %v3255_v50  ;;  %8850 = vmatprep.mubr.msk.f32.mxu1 %vm701_vm1, %v3254_v35  ;;  %v10298_v35 = vld [vmem:[#allocation2 + $0xbc] sm:$0xff] }
 0x19a   : > { %8906 = vmatprep.mubr.msk.f32.mxu0 %vm701_vm1, %v3256_v52  ;;  %v10303_v52 = vld [vmem:[#allocation2 + $0xc4] sm:$0xff] }
 0x19c   : > { %8851 = vmatmul.mubr.msk.f32.gmra.mxu1 %vm701_vm1, %v3255_v50  ;;  %v3671_v50 = vld [vmem:[#allocation2 + $0xc3] sm:$0xff] }
 0x19d   : > { %8907 = vmatmul.mubr.msk.f32.gmra.mxu0 %vm701_vm1, %v3257_v55  ;;  %8911 = vmatprep.mubr.msk.f32.mxu1 %vm701_vm1, %v3649_v57 }
 0x19e   : > { %8967 = vmatprep.mubr.msk.f32.mxu0 %vm701_vm1, %v4076_v58 }
 0x1a0   : > { %8912 = vmatmul.mubr.msk.f32.vlgmr.msra.gmra.mxu1 %vm701_vm1, %v3650_v59 }
 0x1a1   : > { %8968 = vmatmul.mubr.msk.f32.vlgmr.msra.gmra.mxu0 %vm701_vm1, %v4077_v61  ;;  %9022 = vmatpush3.msra.mxu1 %v10098_v23  ;;  %v3661_v23 = vld [vmem:[#allocation2 + $0x73] sm:$0xff]  ;;  %v3672_v61 = vld [vmem:[#allocation2 + $0xcb] sm:$0xff] }
 0x1a2   : > { %8914 = vmatprep.mubr.msk.f32.mxu1 %vm701_vm1, %v3651_v40  ;;  %8970 = vmatprep.mubr.msk.f32.mxu0 %vm701_vm1, %v10190_v1  ;;  %v10310_v40 = vld [vmem:[#allocation2 + $0xcc] sm:$0xff] }
 0x1a3   : > { %9078 = vmatpush3.msra.mxu0 %v10122_v27  ;;  %9133 = vmatprep.subr.mxu1 %v10186_v48  ;;  %v10260_v27 = vld [vmem:[#allocation2 + $0x8c] sm:$0xff] }
 0x1a4   : > { %8915 = vmatmul.mubr.msk.f32.gmra.mxu1 %vm701_vm1, %v3652_v5 }
 0x1a5   : > { %8971 = vmatmul.mubr.msk.f32.gmra.mxu0 %vm701_vm1, %v10195_v3  ;;  %8917 = vmatprep.mubr.msk.f32.mxu1 %vm701_vm1, %v3653_v4  ;;  %v3673_v4 = vld [vmem:[#allocation2 + $0xd3] sm:$0xff] }
 0x1a6   : > { %8973 = vmatprep.mubr.msk.f32.mxu0 %vm701_vm1, %v10201_v6 }
 0x1a8   : > { %8918 = vmatmul.mubr.msk.f32.gmra.mxu1 %vm701_vm1, %v3654_v7  ;;  %v10315_v7 = vld [vmem:[#allocation2 + $0xd4] sm:$0xff] }
 0x1a9   : > { %8974 = vmatmul.mubr.msk.f32.gmra.mxu0 %vm701_vm1, %v10206_v53  ;;  %8920 = vmatprep.mubr.msk.f32.mxu1 %vm701_vm1, %v3655_v62 }
 0x1aa   : > { %8976 = vmatprep.mubr.msk.f32.mxu0 %vm701_vm1, %v10211_v8 }
 0x1ac   : > { %8921 = vmatmul.mubr.msk.f32.gmra.mxu1 %vm701_vm1, %v3656_v10 }
 0x1ad   : > { %8977 = vmatmul.mubr.msk.f32.gmra.mxu0 %vm701_vm1, %v10216_v11  ;;  %8923 = vmatprep.mubr.msk.f32.mxu1 %vm701_vm1, %v3657_v12 }
 0x1ae   : > { %8979 = vmatprep.mubr.msk.f32.mxu0 %vm701_vm1, %v10221_v13 }
 0x1b0   : > { %8924 = vmatmul.mubr.msk.f32.gmra.mxu1 %vm701_vm1, %v3658_v14 }
 0x1b1   : > { %8980 = vmatmul.mubr.msk.f32.gmra.mxu0 %vm701_vm1, %v10226_v9  ;;  %8926 = vmatprep.mubr.msk.f32.mxu1 %vm701_vm1, %v3659_v15 }
 0x1b2   : > { %8982 = vmatprep.mubr.msk.f32.mxu0 %vm701_vm1, %v10231_v17 }
 0x1b4   : > { %8927 = vmatmul.mubr.msk.f32.gmra.mxu1 %vm701_vm1, %v3660_v19  ;;  %v3674_v19 = vld [vmem:[#allocation2 + $0xdb] sm:$0xff] }
 0x1b5   : > { %8983 = vmatmul.mubr.msk.f32.gmra.mxu0 %vm701_vm1, %v10236_v22  ;;  %8929 = vmatprep.mubr.msk.f32.mxu1 %vm701_vm1, %v3661_v23  ;;  %v10324_v23 = vld [vmem:[#allocation2 + $0xdc] sm:$0xff] }
 0x1b6   : > { %8985 = vmatprep.mubr.msk.f32.mxu0 %vm701_vm1, %v10241_v60 }
 0x1b8   : > { %8930 = vmatmul.mubr.msk.f32.gmra.mxu1 %vm701_vm1, %v3662_v24 }
 0x1b9   : > { %8986 = vmatmul.mubr.msk.f32.gmra.mxu0 %vm701_vm1, %v10246_v21  ;;  %8932 = vmatprep.mubr.msk.f32.mxu1 %vm701_vm1, %v3663_v25  ;;  %v8692_v28 = vpop.f32.mrf.mxu1  ;;  %v3675_v25 = vld [vmem:[#allocation2 + $0xe3] sm:$0xff] }
 0x1ba   : > { %8988 = vmatprep.mubr.msk.f32.mxu0 %vm701_vm1, %v10251_v56  ;;  %v8748_v31 = vpop.f32.mrf.mxu0 }
 0x1bb   : > { %v10270_v0 = vadd.f32 %v8748_v31, %v8692_v28  ;;  %v2273_v20 = vpop.f32.mrf.mxu1  ;;  %v10336_v31 = vld [vmem:[#allocation2 + $0xec] sm:$0xff] }
 0x1bc   : > { %8933 = vmatmul.mubr.msk.f32.gmra.mxu1 %vm701_vm1, %v3664_v26  ;;  %v2626_v32 = vpop.f32.mrf.mxu0  ;;  %v10329_v26 = vld [vmem:[#allocation2 + $0xe4] sm:$0xff] }
 0x1bd   : > { %8989 = vmatmul.mubr.msk.f32.gmra.mxu0 %vm701_vm1, %v10260_v27  ;;  %8935 = vmatprep.mubr.msk.f32.mxu1 %vm701_vm1, %v3665_v29  ;;  %v10274_v2 = vadd.f32 %v2626_v32, %v2273_v20  ;;  %v3676_v29 = vld [vmem:[#allocation2 + $0xeb] sm:$0xff]  ;;  %v3677_v20 = vld [vmem:[#allocation2 + $0xf3] sm:$0xff] }
 0x1be   : > { %8991 = vmatprep.mubr.msk.f32.mxu0 %vm701_vm1, %v10265_v30  ;;  %v8695_v18 = vpop.f32.mrf.mxu1  ;;  %v8751_v42 = vpop.f32.mrf.mxu0  ;;  %v10341_v32 = vld [vmem:[#allocation2 + $0xf4] sm:$0xff] }
 0x1bf   : > { %v10284_v43 = vadd.f32 %v8751_v42, %v8695_v18  ;;  %v3678_v18 = vld [vmem:[#allocation2 + $0xfb] sm:$0xff] }
 0x1c0   : > { %8936 = vmatmul.mubr.msk.f32.gmra.mxu1 %vm701_vm1, %v3666_v33  ;;  %v2283_v36 = vpop.f32.mrf.mxu1  ;;  %v2636_v37 = vpop.f32.mrf.mxu0 }
 0x1c1   : > { %8992 = vmatmul.mubr.msk.f32.gmra.mxu0 %vm701_vm1, %v10272_v34  ;;  %8938 = vmatprep.mubr.msk.f32.mxu1 %vm701_vm1, %v3667_v39  ;;  %v10288_v46 = vadd.f32 %v2636_v37, %v2283_v36  ;;  %v10346_v39 = vld [vmem:[#allocation2 + $0xfc] sm:$0xff]  ;;  %v10351_v37 = vld [vmem:[#allocation2 + $0x104] sm:$0xff] }
 0x1c2   : > { %8994 = vmatprep.mubr.msk.f32.mxu0 %vm701_vm1, %v10279_v41  ;;  %v3679_v36 = vld [vmem:[#allocation2 + $0x103] sm:$0xff] }
 0x1c4   : > { %8939 = vmatmul.mubr.msk.f32.gmra.mxu1 %vm701_vm1, %v3668_v44 }
 0x1c5   : > { %8995 = vmatmul.mubr.msk.f32.gmra.mxu0 %vm701_vm1, %v10286_v45  ;;  %8941 = vmatprep.mubr.msk.f32.mxu1 %vm701_vm1, %v3669_v47 }
 0x1c6   : > { %8997 = vmatprep.mubr.msk.f32.mxu0 %vm701_vm1, %v10293_v49  ;;  %v8698_v55 = vpop.f32.mrf.mxu1 }
 0x1c7   : > { %v8754_v57 = vpop.f32.mrf.mxu0 }
 0x1c8   : > { %8942 = vmatmul.mubr.msk.f32.gmra.mxu1 %vm701_vm1, %v3670_v51  ;;  %v10308_v58 = vadd.f32 %v8754_v57, %v8698_v55  ;;  %v2293_v59 = vpop.f32.mrf.mxu1  ;;  %v3680_v57 = vld [vmem:[#allocation2 + $0x10b] sm:$0xff] }
 0x1c9   : > { %8998 = vmatmul.mubr.msk.f32.gmra.mxu0 %vm701_vm1, %v10298_v35  ;;  %8944 = vmatprep.mubr.msk.f32.mxu1 %vm701_vm1, %v3671_v50  ;;  %v2646_v5 = vpop.f32.mrf.mxu0 }
 0x1ca   : > { %9000 = vmatprep.mubr.msk.f32.mxu0 %vm701_vm1, %v10303_v52  ;;  %v10317_v62 = vadd.f32 %v2646_v5, %v2293_v59  ;;  %v8701_v10 = vpop.f32.mrf.mxu1  ;;  %v10360_v59 = vld [vmem:[#allocation2 + $0x10c] sm:$0xff] }
 0x1cb   : > { %v8757_v12 = vpop.f32.mrf.mxu0  ;;  %v3681_v5 = vld [vmem:[#allocation2 + $0x113] sm:$0xff] }
 0x1cc   : > { %8945 = vmatmul.mubr.msk.f32.gmra.mxu1 %vm701_vm1, %v3672_v61  ;;  %v10322_v14 = vadd.f32 %v8757_v12, %v8701_v10  ;;  %v2303_v15 = vpop.f32.mrf.mxu1 }
 0x1cd   : > { %9001 = vmatmul.mubr.msk.f32.gmra.mxu0 %vm701_vm1, %v10310_v40  ;;  %8947 = vmatprep.mubr.msk.f32.mxu1 %vm701_vm1, %v3673_v4  ;;  %v2656_v24 = vpop.f32.mrf.mxu0  ;;  %v10365_v4 = vld [vmem:[#allocation2 + $0x114] sm:$0xff] }
 0x1ce   : > { %9003 = vmatprep.mubr.msk.f32.mxu0 %vm701_vm1, %v10315_v7  ;;  %v10331_v28 = vadd.f32 %v2656_v24, %v2303_v15 }
 0x1d0   : > { %8948 = vmatmul.mubr.msk.f32.gmra.mxu1 %vm701_vm1, %v3674_v19 }
 0x1d1   : > { %9004 = vmatmul.mubr.msk.f32.gmra.mxu0 %vm701_vm1, %v10324_v23  ;;  %8950 = vmatprep.mubr.msk.f32.mxu1 %vm701_vm1, %v3675_v25  ;;  %v3682_v25 = vld [vmem:[#allocation2 + $0x11b] sm:$0xff] }
 0x1d2   : > { %9006 = vmatprep.mubr.msk.f32.mxu0 %vm701_vm1, %v10329_v26 }
 0x1d4   : > { %8951 = vmatmul.mubr.msk.f32.gmra.mxu1 %vm701_vm1, %v3676_v29  ;;  %v10374_v29 = vld [vmem:[#allocation2 + $0x11c] sm:$0xff] }
 0x1d5   : > { %9007 = vmatmul.mubr.msk.f32.gmra.mxu0 %vm701_vm1, %v10336_v31  ;;  %8953 = vmatprep.mubr.msk.f32.mxu1 %vm701_vm1, %v3677_v20  ;;  %v8704_v33 = vpop.f32.mrf.mxu1 }
 0x1d6   : > { %9009 = vmatprep.mubr.msk.f32.mxu0 %vm701_vm1, %v10341_v32  ;;  %v8760_v42 = vpop.f32.mrf.mxu0 }
 0x1d7   : > { %v10353_v44 = vadd.f32 %v8760_v42, %v8704_v33  ;;  %v2313_v47 = vpop.f32.mrf.mxu1  ;;  %v3683_v33 = vld [vmem:[#allocation2 + $0x123] sm:$0xff] }
 0x1d8   : > { %8954 = vmatmul.mubr.msk.f32.gmra.mxu1 %vm701_vm1, %v3678_v18  ;;  %v2666_v51 = vpop.f32.mrf.mxu0  ;;  %v10379_v18 = vld [vmem:[#allocation2 + $0x124] sm:$0xff] }
 0x1d9   : > { %9010 = vmatmul.mubr.msk.f32.gmra.mxu0 %vm701_vm1, %v10346_v39  ;;  %8956 = vmatprep.mubr.msk.f32.mxu1 %vm701_vm1, %v3679_v36  ;;  %v10358_v50 = vadd.f32 %v2666_v51, %v2313_v47  ;;  %v8707_v55 = vpop.f32.mrf.mxu1 }
 0x1da   : > { %9012 = vmatprep.mubr.msk.f32.mxu0 %vm701_vm1, %v10351_v37 }
 0x1db   : > { %v8763_v61 = vpop.f32.mrf.mxu0  ;;  %v2323_v12 = vpop.f32.mrf.mxu1 }
 0x1dc   : > { %8957 = vmatmul.mubr.msk.f32.gmra.mxu1 %vm701_vm1, %v3680_v57  ;;  %v10367_v10 = vadd.f32 %v8763_v61, %v8707_v55  ;;  %v3684_v55 = vld [vmem:[#allocation2 + $0x12b] sm:$0xff] }
 0x1dd   : > { %9013 = vmatmul.mubr.msk.f32.gmra.mxu0 %vm701_vm1, %v10360_v59  ;;  %8959 = vmatprep.mubr.msk.f32.mxu1 %vm701_vm1, %v3681_v5  ;;  %v2676_v15 = vpop.f32.mrf.mxu0  ;;  %v10388_v57 = vld [vmem:[#allocation2 + $0x12c] sm:$0xff] }
 0x1de   : > { %9015 = vmatprep.mubr.msk.f32.mxu0 %vm701_vm1, %v10365_v4  ;;  %v10372_v19 = vadd.f32 %v2676_v15, %v2323_v12  ;;  %v8710_v24 = vpop.f32.mrf.mxu1  ;;  %v4930_v5 = vld [vmem:[#allocation2 + $0x25] sm:$0xff] }
 0x1df   : > { %v8766_v20 = vpop.f32.mrf.mxu0 }
 0x1e0   : > { %8960 = vmatmul.mubr.msk.f32.gmra.mxu1 %vm701_vm1, %v3682_v25  ;;  %v10381_v42 = vadd.f32 %v8766_v20, %v8710_v24  ;;  %v2333_v36 = vpop.f32.mrf.mxu1  ;;  %v4931_v20 = vld [vmem:[#allocation2 + $0x2d] sm:$0xff] }
 0x1e1   : > { %9016 = vmatmul.mubr.msk.f32.gmra.mxu0 %vm701_vm1, %v10374_v29  ;;  %8962 = vmatprep.mubr.msk.f32.mxu1 %vm701_vm1, %v3683_v33  ;;  %v2686_v47 = vpop.f32.mrf.mxu0 }
 0x1e2   : > { %9018 = vmatprep.mubr.msk.f32.mxu0 %vm701_vm1, %v10379_v18  ;;  %v10386_v51 = vadd.f32 %v2686_v47, %v2333_v36  ;;  %v8713_v61 = vpop.f32.mrf.mxu1 }
 0x1e3   : > { %v8769_v12 = vpop.f32.mrf.mxu0 }
 0x1e4   : > { %8963 = vmatmul.mubr.msk.f32.gmra.mxu1 %vm701_vm1, %v3684_v55  ;;  %v10396_v15 = vadd.f32 %v8769_v12, %v8713_v61  ;;  %v2343_v24 = vpop.f32.mrf.mxu1  ;;  %v4933_v12 = vld [vmem:[#allocation2 + $0x3d] sm:$0xff] }
 0x1e5   : > { %9019 = vmatmul.mubr.msk.f32.gmra.mxu0 %vm701_vm1, %v10388_v57  ;;  %9023 = vmatprep.mubr.msk.f32.mxu1 %vm701_vm1, %v10190_v1  ;;  %v2696_v25 = vpop.f32.mrf.mxu0  ;;  %v4932_v1 = vld [vmem:[#allocation2 + $0x35] sm:$0xff] }
 0x1e6   : > { %9079 = vmatprep.mubr.msk.f32.mxu0 %vm701_vm1, %v4930_v5  ;;  %v10398_v33 = vadd.f32 %v2696_v25, %v2343_v24 }
 0x1e7   : > { %v8716_v36 = vpop.f32.mrf.mxu1  ;;  %v8772_v47 = vpop.f32.mrf.mxu0 }
 0x1e8   : > { %9024 = vmatmul.mubr.msk.f32.vlgmr.msra.gmra.mxu1 %vm701_vm1, %v10195_v3  ;;  %v10406_v55 = vadd.f32 %v8772_v47, %v8716_v36  ;;  %v4934_v3 = vld [vmem:[#allocation2 + $0x45] sm:$0xff]  ;;  %v4935_v47 = vld [vmem:[#allocation2 + $0x4d] sm:$0xff] }
 0x1e9   : > { %9080 = vmatmul.mubr.msk.f32.vlgmr.msra.gmra.mxu0 %vm701_vm1, %v4931_v20  ;;  %9134 = vmatpush3.msra.mxu1 %v10186_v48  ;;  %v2353_v61 = vpop.f32.mrf.mxu1  ;;  %v2706_v5 = vpop.f32.mrf.mxu0 }
 0x1ea   : > { %9026 = vmatprep.mubr.msk.f32.mxu1 %vm701_vm1, %v10201_v6  ;;  %9082 = vmatprep.mubr.msk.f32.mxu0 %vm701_vm1, %v4932_v1  ;;  %v10409_v24 = vadd.f32 %v2706_v5, %v2353_v61 }
 0x1eb   : > { %v8719_v48 = vpop.f32.mrf.mxu1 }
 0x1ec   : > { %9027 = vmatmul.mubr.msk.f32.gmra.mxu1 %vm701_vm1, %v10206_v53  ;;  %v8775_v25 = vpop.f32.mrf.mxu0  ;;  %v4936_v53 = vld [vmem:[#allocation2 + $0x55] sm:$0xff] }
 0x1ed   : > { %9083 = vmatmul.mubr.msk.f32.gmra.mxu0 %vm701_vm1, %v4933_v12  ;;  %9029 = vmatprep.mubr.msk.f32.mxu1 %vm701_vm1, %v10211_v8  ;;  %v10417_v6 = vadd.f32 %v8775_v25, %v8719_v48  ;;  %v2363_v20 = vpop.f32.mrf.mxu1  ;;  %v4937_v8 = vld [vmem:[#allocation2 + $0x5d] sm:$0xff]  ;;  %v4938_v12 = vld [vmem:[#allocation2 + $0x65] sm:$0xff]  ;;  %v4939_v25 = vld [vmem:[#allocation2 + $0x6d] sm:$0xff] }
 0x1ee   : > { %9085 = vmatprep.mubr.msk.f32.mxu0 %vm701_vm1, %v4934_v3  ;;  %v2716_v36 = vpop.f32.mrf.mxu0 }
 0x1ef   : > { %v10419_v1 = vadd.f32 %v2716_v36, %v2363_v20 }
 0x1f0   : > { %9030 = vmatmul.mubr.msk.f32.gmra.mxu1 %vm701_vm1, %v10216_v11 }
 0x1f1   : > { %9086 = vmatmul.mubr.msk.f32.gmra.mxu0 %vm701_vm1, %v4935_v47  ;;  %9032 = vmatprep.mubr.msk.f32.mxu1 %vm701_vm1, %v10221_v13 }
 0x1f2   : > { %9088 = vmatprep.mubr.msk.f32.mxu0 %vm701_vm1, %v4936_v53  ;;  %v8722_v61 = vpop.f32.mrf.mxu1 }
 0x1f3   : > { %v8778_v5 = vpop.f32.mrf.mxu0 }
 0x1f4   : > { %9033 = vmatmul.mubr.msk.f32.gmra.mxu1 %vm701_vm1, %v10226_v9  ;;  %v10430_v3 = vadd.f32 %v8778_v5, %v8722_v61  ;;  %v2373_v11 = vpop.f32.mrf.mxu1  ;;  %v4940_v9 = vld [vmem:[#allocation2 + $0x75] sm:$0xff] }
 0x1f5   : > { %9089 = vmatmul.mubr.msk.f32.gmra.mxu0 %vm701_vm1, %v4937_v8  ;;  %9035 = vmatprep.mubr.msk.f32.mxu1 %vm701_vm1, %v10231_v17  ;;  %v2726_v13 = vpop.f32.mrf.mxu0  ;;  %v4941_v8 = vld [vmem:[#allocation2 + $0x7d] sm:$0xff] }
 0x1f6   : > { %9091 = vmatprep.mubr.msk.f32.mxu0 %vm701_vm1, %v4938_v12  ;;  %v10435_v48 = vadd.f32 %v2726_v13, %v2373_v11  ;;  %v4943_v12 = vld [vmem:[#allocation2 + $0x8d] sm:$0xff] }
 0x1f7   : > { %v8725_v20 = vpop.f32.mrf.mxu1 }
 0x1f8   : > { %9036 = vmatmul.mubr.msk.f32.gmra.mxu1 %vm701_vm1, %v10236_v22  ;;  %v8781_v36 = vpop.f32.mrf.mxu0  ;;  %v4942_v22 = vld [vmem:[#allocation2 + $0x85] sm:$0xff] }
 0x1f9   : > { %9092 = vmatmul.mubr.msk.f32.gmra.mxu0 %vm701_vm1, %v4939_v25  ;;  %9038 = vmatprep.mubr.msk.f32.mxu1 %vm701_vm1, %v10241_v60  ;;  %v10443_v17 = vadd.f32 %v8781_v36, %v8725_v20  ;;  %v2383_v47 = vpop.f32.mrf.mxu1  ;;  %v4945_v20 = vld [vmem:[#allocation2 + $0x9d] sm:$0xff] }
 0x1fa   : > { %9094 = vmatprep.mubr.msk.f32.mxu0 %vm701_vm1, %v4940_v9  ;;  %v2736_v53 = vpop.f32.mrf.mxu0  ;;  %v4946_v9 = vld [vmem:[#allocation2 + $0xa5] sm:$0xff] }
 0x1fb   : > { %v10445_v61 = vadd.f32 %v2736_v53, %v2383_v47 }
 0x1fc   : > { %9039 = vmatmul.mubr.msk.f32.gmra.mxu1 %vm701_vm1, %v10246_v21  ;;  %v4944_v21 = vld [vmem:[#allocation2 + $0x95] sm:$0xff] }
 0x1fd   : > { %9095 = vmatmul.mubr.msk.f32.gmra.mxu0 %vm701_vm1, %v4941_v8  ;;  %9041 = vmatprep.mubr.msk.f32.mxu1 %vm701_vm1, %v10251_v56  ;;  %v8728_v60 = vpop.f32.mrf.mxu1 }
 0x1fe   : > { %9097 = vmatprep.mubr.msk.f32.mxu0 %vm701_vm1, %v4942_v22  ;;  %v8784_v5 = vpop.f32.mrf.mxu0 }
 0x1ff   : > { %v10453_v11 = vadd.f32 %v8784_v5, %v8728_v60  ;;  %v2393_v13 = vpop.f32.mrf.mxu1 }
 0x200   : > { %9042 = vmatmul.mubr.msk.f32.gmra.mxu1 %vm701_vm1, %v10260_v27  ;;  %v2746_v25 = vpop.f32.mrf.mxu0 }
 0x201   : > { %9098 = vmatmul.mubr.msk.f32.gmra.mxu0 %vm701_vm1, %v4943_v12  ;;  %9044 = vmatprep.mubr.msk.f32.mxu1 %vm701_vm1, %v10265_v30  ;;  %v10461_v56 = vadd.f32 %v2746_v25, %v2393_v13  ;;  %v4947_v30 = vld [vmem:[#allocation2 + $0xad] sm:$0xff]  ;;  %v4949_v12 = vld [vmem:[#allocation2 + $0xbd] sm:$0xff] }
 0x202   : > { %9100 = vmatprep.mubr.msk.f32.mxu0 %vm701_vm1, %v4944_v21 }
 0x204   : > { %9045 = vmatmul.mubr.msk.f32.gmra.mxu1 %vm701_vm1, %v10272_v34  ;;  %v8731_v27 = vpop.f32.mrf.mxu1  ;;  %v4948_v34 = vld [vmem:[#allocation2 + $0xb5] sm:$0xff] }
 0x205   : > { %9101 = vmatmul.mubr.msk.f32.gmra.mxu0 %vm701_vm1, %v4945_v20  ;;  %9047 = vmatprep.mubr.msk.f32.mxu1 %vm701_vm1, %v10279_v41  ;;  %v8787_v36 = vpop.f32.mrf.mxu0 }
 0x206   : > { %9103 = vmatprep.mubr.msk.f32.mxu0 %vm701_vm1, %v4946_v9  ;;  %v10469_v47 = vadd.f32 %v8787_v36, %v8731_v27  ;;  %v2403_v53 = vpop.f32.mrf.mxu1  ;;  %v4952_v27 = vld [vmem:[#allocation2 + $0xd5] sm:$0xff] }
 0x207   : > { %v2756_v8 = vpop.f32.mrf.mxu0 }
 0x208   : > { %9048 = vmatmul.mubr.msk.f32.gmra.mxu1 %vm701_vm1, %v10286_v45  ;;  %v10474_v22 = vadd.f32 %v2756_v8, %v2403_v53  ;;  %v8734_v41 = vpop.f32.mrf.mxu1  ;;  %v4950_v45 = vld [vmem:[#allocation2 + $0xc5] sm:$0xff] }
 0x209   : > { %9104 = vmatmul.mubr.msk.f32.gmra.mxu0 %vm701_vm1, %v4947_v30  ;;  %9050 = vmatprep.mubr.msk.f32.mxu1 %vm701_vm1, %v10293_v49  ;;  %v8790_v60 = vpop.f32.mrf.mxu0  ;;  %v4951_v49 = vld [vmem:[#allocation2 + $0xcd] sm:$0xff]  ;;  %v4953_v30 = vld [vmem:[#allocation2 + $0xdd] sm:$0xff] }
 0x20a   : > { %9106 = vmatprep.mubr.msk.f32.mxu0 %vm701_vm1, %v4948_v34  ;;  %v10479_v5 = vadd.f32 %v8790_v60, %v8734_v41  ;;  %v2413_v13 = vpop.f32.mrf.mxu1  ;;  %v4955_v60 = vld [vmem:[#allocation2 + $0xed] sm:$0xff] }
 0x20b   : > { %v2766_v21 = vpop.f32.mrf.mxu0 }
 0x20c   : > { %9051 = vmatmul.mubr.msk.f32.gmra.mxu1 %vm701_vm1, %v10298_v35  ;;  %v10484_v25 = vadd.f32 %v2766_v21, %v2413_v13 }
 0x20d   : > { %9107 = vmatmul.mubr.msk.f32.gmra.mxu0 %vm701_vm1, %v4949_v12  ;;  %9053 = vmatprep.mubr.msk.f32.mxu1 %vm701_vm1, %v10303_v52 }
 0x20e   : > { %9109 = vmatprep.mubr.msk.f32.mxu0 %vm701_vm1, %v4950_v45 }
 0x210   : > { %v8737_v20 = vpop.f32.mrf.mxu1  ;;  %9054 = vmatmul.mubr.msk.f32.gmra.mxu1 %vm701_vm1, %v10310_v40  ;;  %v4954_v40 = vld [vmem:[#allocation2 + $0xe5] sm:$0xff] }
 0x211   : > { %v8793_v9 = vpop.f32.mrf.mxu0  ;;  %9110 = vmatmul.mubr.msk.f32.gmra.mxu0 %vm701_vm1, %v4951_v49  ;;  %9056 = vmatprep.mubr.msk.f32.mxu1 %vm701_vm1, %v10315_v7 }
 0x212   : > { %v10492_v35 = vadd.f32 %v8793_v9, %v8737_v20  ;;  %9112 = vmatprep.mubr.msk.f32.mxu0 %vm701_vm1, %v4952_v27  ;;  %v10497_v36 = vpop.f32.mrf.mxu1  ;;  %v4957_v20 = vld [vmem:[#allocation2 + $0xfd] sm:$0xff] }
 0x213   : > { %v10499_v52 = vpop.f32.mrf.mxu0 }
 0x214   : > { %v8740_v53 = vpop.f32.mrf.mxu1  ;;  %9057 = vmatmul.mubr.msk.f32.gmra.mxu1 %vm701_vm1, %v10324_v23  ;;  %v4956_v23 = vld [vmem:[#allocation2 + $0xf5] sm:$0xff] }
 0x215   : > { %v8796_v8 = vpop.f32.mrf.mxu0  ;;  %9113 = vmatmul.mubr.msk.f32.gmra.mxu0 %vm701_vm1, %v4953_v30  ;;  %9059 = vmatprep.mubr.msk.f32.mxu1 %vm701_vm1, %v10329_v26 }
 0x216   : > { %v10504_v34 = vadd.f32 %v8796_v8, %v8740_v53  ;;  %9115 = vmatprep.mubr.msk.f32.mxu0 %vm701_vm1, %v4954_v40  ;;  %v10509_v7 = vpop.f32.mrf.mxu1  ;;  %v4959_v40 = vld [vmem:[#allocation2 + $0x10d] sm:$0xff] }
 0x217   : > { %v10511_v41 = vpop.f32.mrf.mxu0 }
 0x218   : > { %v8801_v12 = vpop.f32.mrf.mxu1  ;;  %9060 = vmatmul.mubr.msk.f32.gmra.mxu1 %vm701_vm1, %v10336_v31 }
 0x219   : > { %v8857_v13 = vpop.f32.mrf.mxu0  ;;  %9116 = vmatmul.mubr.msk.f32.gmra.mxu0 %vm701_vm1, %v4955_v60  ;;  %v3187_v21 = vadd.f32 %v8801_v12, %v10083_v63  ;;  %9062 = vmatprep.mubr.msk.f32.mxu1 %vm701_vm1, %v10341_v32  ;;  %v4958_v63 = vld [vmem:[#allocation2 + $0x105] sm:$0xff] }
 0x21a   : > { %9118 = vmatprep.mubr.msk.f32.mxu0 %vm701_vm1, %v4956_v23  ;;  %v10520_v26 = vpop.f32.mrf.mxu1 }
 0x21b   : > { %v10522_v45 = vpop.f32.mrf.mxu0  ;;  %v10524_v49 = vadd.f32 %v8857_v13, %v3187_v21  ;;  %v4961_v21 = vld [vmem:[#allocation2 + $0x11d] sm:$0xff] }
 0x21c   : > { %v8804_v9 = vpop.f32.mrf.mxu1  ;;  %9063 = vmatmul.mubr.msk.f32.gmra.mxu1 %vm701_vm1, %v10346_v39 }
 0x21d   : > { %v8860_v27 = vpop.f32.mrf.mxu0  ;;  %9119 = vmatmul.mubr.msk.f32.gmra.mxu0 %vm701_vm1, %v4957_v20  ;;  %v3189_v31 = vadd.f32 %v8804_v9, %v10270_v0  ;;  %9065 = vmatprep.mubr.msk.f32.mxu1 %vm701_vm1, %v10351_v37  ;;  %v4960_v0 = vld [vmem:[#allocation2 + $0x115] sm:$0xff] }
 0x21e   : > { %9121 = vmatprep.mubr.msk.f32.mxu0 %vm701_vm1, %v4958_v63  ;;  %v3017_v32 = vpop.f32.mrf.mxu1  ;;  %v4964_v63 = vld [vmem:[#allocation2 + $0x135] sm:$0xff] }
 0x21f   : > { %v10533_v30 = vpop.f32.mrf.mxu0  ;;  %v10535_v53 = vadd.f32 %v8860_v27, %v3189_v31  ;;  %v10538_v8 = vadd.f32 %v3017_v32, %v10274_v2 }
 0x220   : > { %v8807_v39 = vpop.f32.mrf.mxu1  ;;  %9066 = vmatmul.mubr.msk.f32.gmra.mxu1 %vm701_vm1, %v10360_v59 }
 0x221   : > { %v8863_v60 = vpop.f32.mrf.mxu0  ;;  %9122 = vmatmul.mubr.msk.f32.gmra.mxu0 %vm701_vm1, %v4959_v40  ;;  %v3191_v37 = vadd.f32 %v8807_v39, %v10284_v43  ;;  %9068 = vmatprep.mubr.msk.f32.mxu1 %vm701_vm1, %v10365_v4  ;;  %v4962_v43 = vld [vmem:[#allocation2 + $0x125] sm:$0xff] }
 0x222   : > { %9124 = vmatprep.mubr.msk.f32.mxu0 %vm701_vm1, %v4960_v0  ;;  %v3027_v12 = vpop.f32.mrf.mxu1 }
 0x223   : > { %v10547_v13 = vpop.f32.mrf.mxu0  ;;  %v10549_v2 = vadd.f32 %v8863_v60, %v3191_v37  ;;  %v10552_v23 = vadd.f32 %v3027_v12, %v10288_v46  ;;  %v4537_v46 = vld [vmem:[#allocation2 + $0x134] sm:$0xff]  ;;  %v4965_v60 = vld [vmem:[#allocation2 + $0x13d] sm:$0xff] }
 0x224   : > { %v8810_v59 = vpop.f32.mrf.mxu1  ;;  %9069 = vmatmul.mubr.msk.f32.gmra.mxu1 %vm701_vm1, %v10374_v29  ;;  %v4963_v29 = vld [vmem:[#allocation2 + $0x12d] sm:$0xff] }
 0x225   : > { %v8866_v20 = vpop.f32.mrf.mxu0  ;;  %9125 = vmatmul.mubr.msk.f32.gmra.mxu0 %vm701_vm1, %v4961_v21  ;;  %v3193_v4 = vadd.f32 %v8810_v59, %v10308_v58  ;;  %9071 = vmatprep.mubr.msk.f32.mxu1 %vm701_vm1, %v10379_v18  ;;  %v4538_v18 = vld [vmem:[#allocation2 + $0x13c] sm:$0xff]  ;;  %v5357_v59 = vld [vmem:[#allocation2 + $0x26] sm:$0xff] }
 0x226   : > { %9127 = vmatprep.mubr.msk.f32.mxu0 %vm701_vm1, %v4962_v43  ;;  %v3037_v9 = vpop.f32.mrf.mxu1 }
 0x227   : > { %v10561_v27 = vpop.f32.mrf.mxu0  ;;  %v10563_v31 = vadd.f32 %v8866_v20, %v3193_v4  ;;  %v10566_v32 = vadd.f32 %v3037_v9, %v10317_v62 }
 0x228   : > { %v8813_v40 = vpop.f32.mrf.mxu1  ;;  %9072 = vmatmul.mubr.msk.f32.gmra.mxu1 %vm701_vm1, %v10388_v57 }
 0x229   : > { %v8869_v39 = vpop.f32.mrf.mxu0  ;;  %9128 = vmatmul.mubr.msk.f32.gmra.mxu0 %vm701_vm1, %v4963_v29  ;;  %v3195_v58 = vadd.f32 %v8813_v40, %v10322_v14  ;;  %9074 = vmatprep.mubr.msk.f32.mxu1 %vm701_vm1, %v4537_v46  ;;  %v5359_v29 = vld [vmem:[#allocation2 + $0x36] sm:$0xff] }
 0x22a   : > { %9130 = vmatprep.mubr.msk.f32.mxu0 %vm701_vm1, %v4964_v63  ;;  %v3047_v0 = vpop.f32.mrf.mxu1 }
 0x22b   : > { %v10574_v37 = vpop.f32.mrf.mxu0  ;;  %v10576_v62 = vadd.f32 %v8869_v39, %v3195_v58  ;;  %v10579_v12 = vadd.f32 %v3047_v0, %v10331_v28  ;;  %v5358_v28 = vld [vmem:[#allocation2 + $0x2e] sm:$0xff] }
 0x22c   : > { %v8816_v21 = vpop.f32.mrf.mxu1  ;;  %9075 = vmatmul.mubr.msk.f32.gmra.mxu1 %vm701_vm1, %v4538_v18 }
 0x22d   : > { %v8872_v57 = vpop.f32.mrf.mxu0  ;;  %9131 = vmatmul.mubr.msk.f32.gmra.mxu0 %vm701_vm1, %v4965_v60  ;;  %v3197_v14 = vadd.f32 %v8816_v21, %v10353_v44  ;;  %9135 = vmatprep.mubr.msk.f32.mxu1 %vm701_vm1, %v5357_v59  ;;  %v5361_v21 = vld [vmem:[#allocation2 + $0x46] sm:$0xff] }
 0x22e   : > { %v3057_v20 = vpop.f32.mrf.mxu1 }
 0x22f   : > { %v10585_v43 = vpop.f32.mrf.mxu0  ;;  %v10587_v4 = vadd.f32 %v8872_v57, %v3197_v14  ;;  %v10590_v9 = vadd.f32 %v3057_v20, %v10358_v50  ;;  %v5360_v50 = vld [vmem:[#allocation2 + $0x3e] sm:$0xff] }
 0x230   : > { %v8819_v46 = vpop.f32.mrf.mxu1  ;;  %9136 = vmatmul.mubr.msk.f32.vlgmr.msra.gmra.mxu1 %vm701_vm1, %v5358_v28 }
 0x231   : > { %v8875_v63 = vpop.f32.mrf.mxu0  ;;  %v3199_v40 = vadd.f32 %v8819_v46, %v10367_v10  ;;  %9138 = vmatprep.mubr.msk.f32.mxu1 %vm701_vm1, %v5359_v29 }
 0x232   : > { %v3067_v44 = vpop.f32.mrf.mxu1 }
 0x233   : > { %v10595_v39 = vpop.f32.mrf.mxu0  ;;  %v10597_v58 = vadd.f32 %v8875_v63, %v3199_v40  ;;  %v10600_v18 = vadd.f32 %v3067_v44, %v10372_v19  ;;  %v5362_v19 = vld [vmem:[#allocation2 + $0x4e] sm:$0xff]  ;;  %v5363_v63 = vld [vmem:[#allocation2 + $0x56] sm:$0xff] }
 0x234   : > { %v8822_v60 = vpop.f32.mrf.mxu1  ;;  %9139 = vmatmul.mubr.msk.f32.gmra.mxu1 %vm701_vm1, %v5360_v50 }
 0x235   : > { %v8878_v0 = vpop.f32.mrf.mxu0  ;;  %v3201_v57 = vadd.f32 %v8822_v60, %v10381_v42  ;;  %9141 = vmatprep.mubr.msk.f32.mxu1 %vm701_vm1, %v5361_v21  ;;  %v5365_v21 = vld [vmem:[#allocation2 + $0x66] sm:$0xff] }
 0x236   : > { %v3077_v10 = vpop.f32.mrf.mxu1 }
 0x237   : > { %v10605_v59 = vpop.f32.mrf.mxu0  ;;  %v10607_v14 = vadd.f32 %v8878_v0, %v3201_v57  ;;  %v10610_v20 = vadd.f32 %v3077_v10, %v10386_v51  ;;  %v5364_v51 = vld [vmem:[#allocation2 + $0x5e] sm:$0xff] }
 0x238   : > { %v8825_v28 = vpop.f32.mrf.mxu1  ;;  %9142 = vmatmul.mubr.msk.f32.gmra.mxu1 %vm701_vm1, %v5362_v19 }
 0x239   : > { %v8881_v46 = vpop.f32.mrf.mxu0  ;;  %v3203_v29 = vadd.f32 %v8825_v28, %v10396_v15  ;;  %9144 = vmatprep.mubr.msk.f32.mxu1 %vm701_vm1, %v5363_v63 }
 0x23a   : > { %v3087_v42 = vpop.f32.mrf.mxu1 }
 0x23b   : > { %v10615_v40 = vpop.f32.mrf.mxu0  ;;  %v10617_v44 = vadd.f32 %v8881_v46, %v3203_v29  ;;  %v10620_v50 = vadd.f32 %v3087_v42, %v10398_v33  ;;  %v5366_v33 = vld [vmem:[#allocation2 + $0x6e] sm:$0xff]  ;;  %v5367_v29 = vld [vmem:[#allocation2 + $0x76] sm:$0xff] }
 0x23c   : > { %v8828_v60 = vpop.f32.mrf.mxu1  ;;  %9145 = vmatmul.mubr.msk.f32.gmra.mxu1 %vm701_vm1, %v5364_v51 }
 0x23d   : > { %v8884_v0 = vpop.f32.mrf.mxu0  ;;  %v3205_v57 = vadd.f32 %v8828_v60, %v10406_v55  ;;  %9147 = vmatprep.mubr.msk.f32.mxu1 %vm701_vm1, %v5365_v21 }
 0x23e   : > { %v3097_v15 = vpop.f32.mrf.mxu1 }
 0x23f   : > { %v10625_v10 = vpop.f32.mrf.mxu0  ;;  %v10627_v19 = vadd.f32 %v8884_v0, %v3205_v57  ;;  %v10630_v28 = vadd.f32 %v3097_v15, %v10409_v24  ;;  %v5368_v24 = vld [vmem:[#allocation2 + $0x7e] sm:$0xff]  ;;  %v5369_v15 = vld [vmem:[#allocation2 + $0x86] sm:$0xff] }
 0x240   : > { %v8831_v46 = vpop.f32.mrf.mxu1  ;;  %9148 = vmatmul.mubr.msk.f32.gmra.mxu1 %vm701_vm1, %v5366_v33 }
 0x241   : > { %v8887_v63 = vpop.f32.mrf.mxu0  ;;  %v3207_v42 = vadd.f32 %v8831_v46, %v10417_v6  ;;  %9150 = vmatprep.mubr.msk.f32.mxu1 %vm701_vm1, %v5367_v29 }
 0x242   : > { %v3107_v55 = vpop.f32.mrf.mxu1 }
 0x243   : > { %v10635_v51 = vpop.f32.mrf.mxu0  ;;  %v10637_v60 = vadd.f32 %v8887_v63, %v3207_v42  ;;  %v10640_v0 = vadd.f32 %v3107_v55, %v10419_v1  ;;  %v5370_v1 = vld [vmem:[#allocation2 + $0x8e] sm:$0xff]  ;;  %v6503_v42 = vld [vmem:[%s11772_s3] sm:$0xff] }
 0x244   : > { %v8834_v21 = vpop.f32.mrf.mxu1  ;;  %9151 = vmatmul.mubr.msk.f32.gmra.mxu1 %vm701_vm1, %v5368_v24  ;;  %9189 = vmatprep.subr.mxu0 %v6503_v42 }
 0x245   : > { %v8890_v57 = vpop.f32.mrf.mxu0  ;;  %v3209_v33 = vadd.f32 %v8834_v21, %v10430_v3  ;;  %9153 = vmatprep.mubr.msk.f32.mxu1 %vm701_vm1, %v5369_v15  ;;  %v5371_v3 = vld [vmem:[#allocation2 + $0x96] sm:$0xff]  ;;  %9190 = vmatpush3.msra.mxu0 %v6503_v42  ;;  %v5373_v42 = vld [vmem:[#allocation2 + $0xa6] sm:$0xff] }
 0x246   : > { %v3117_v6 = vpop.f32.mrf.mxu1 }
 0x247   : > { %v10645_v46 = vpop.f32.mrf.mxu0  ;;  %v10647_v29 = vadd.f32 %v8890_v57, %v3209_v33  ;;  %v10650_v63 = vadd.f32 %v3117_v6, %v10435_v48  ;;  %v7347_v48 = vld [vmem:[%s11773_s4 + $0x18] sm:$0xff] }
 0x248   : > { %v8837_v55 = vpop.f32.mrf.mxu1  ;;  %9154 = vmatmul.mubr.msk.f32.gmra.mxu1 %vm701_vm1, %v5370_v1  ;;  %9239 = vmatprep.subr.mxu1 %v7347_v48  ;;  %v5372_v1 = vld [vmem:[#allocation2 + $0x9e] sm:$0xff] }
 0x249   : > { %11783 = vst [vmem:[#allocation7_spill] sm:$0xff] %v10647_v29  ;;  %v8893_v24 = vpop.f32.mrf.mxu0  ;;  %v3211_v21 = vadd.f32 %v8837_v55, %v10443_v17  ;;  %9156 = vmatprep.mubr.msk.f32.mxu1 %vm701_vm1, %v5371_v3  ;;  %9240 = vmatpush3.msra.mxu1 %v7347_v48 }
 0x24a   : > { %v3127_v57 = vpop.f32.mrf.mxu1 }
 0x24b   : > { %v10661_v15 = vpop.f32.mrf.mxu0  ;;  %v10663_v33 = vadd.f32 %v8893_v24, %v3211_v21  ;;  %v10666_v6 = vadd.f32 %v3127_v57, %v10445_v61  ;;  %v5374_v61 = vld [vmem:[#allocation2 + $0xae] sm:$0xff]  ;;  %v5375_v57 = vld [vmem:[#allocation2 + $0xb6] sm:$0xff] }
 0x24c   : > { %11784 = vst [vmem:[#allocation8_spill] sm:$0xff] %v10661_v15  ;;  %v8840_v54 = vpop.f32.mrf.mxu1  ;;  %9157 = vmatmul.mubr.msk.f32.gmra.mxu1 %vm701_vm1, %v5372_v1 }
 0x24d   : > { %v8896_v17 = vpop.f32.mrf.mxu0  ;;  %v3213_v55 = vadd.f32 %v8840_v54, %v10453_v11  ;;  %9159 = vmatprep.mubr.msk.f32.mxu1 %vm701_vm1, %v5373_v42 }
 0x24e   : > { %v3137_v3 = vpop.f32.mrf.mxu1 }
 0x24f   : > { %v10671_v29 = vpop.f32.mrf.mxu0  ;;  %v10673_v15 = vadd.f32 %v8896_v17, %v3213_v55  ;;  %v10676_v24 = vadd.f32 %v3137_v3, %v10461_v56  ;;  %v5376_v55 = vld [vmem:[#allocation2 + $0xbe] sm:$0xff]  ;;  %v5377_v3 = vld [vmem:[#allocation2 + $0xc6] sm:$0xff] }
 0x250   : > { %11785 = vst [vmem:[#allocation9_spill] sm:$0xff] %v10671_v29  ;;  %v8843_v21 = vpop.f32.mrf.mxu1  ;;  %9160 = vmatmul.mubr.msk.f32.gmra.mxu1 %vm701_vm1, %v5374_v61 }
 0x251   : > { %11786 = vst [vmem:[#allocation10_spill] sm:$0xff] %v10673_v15  ;;  %v8899_v48 = vpop.f32.mrf.mxu0  ;;  %v3215_v1 = vadd.f32 %v8843_v21, %v10469_v47  ;;  %9162 = vmatprep.mubr.msk.f32.mxu1 %vm701_vm1, %v5375_v57 }
 0x252   : > { %v3147_v54 = vpop.f32.mrf.mxu1 }
 0x253   : > { %v3574_v11 = vpop.f32.mrf.mxu0  ;;  %v10681_v42 = vadd.f32 %v8899_v48, %v3215_v1  ;;  %v3214_v17 = vadd.f32 %v3147_v54, %v10474_v22  ;;  %v5378_v1 = vld [vmem:[#allocation2 + $0xce] sm:$0xff] }
 0x254   : > { %v8846_v15 = vpop.f32.mrf.mxu1  ;;  %9163 = vmatmul.mubr.msk.f32.gmra.mxu1 %vm701_vm1, %v5376_v55 }
 0x255   : > { %11787 = vst [vmem:[#allocation11_spill] sm:$0xff] %v10681_v42  ;;  %v8902_v56 = vpop.f32.mrf.mxu0  ;;  %v10685_v29 = vadd.f32 %v3574_v11, %v3214_v17  ;;  %v3217_v61 = vadd.f32 %v8846_v15, %v10479_v5  ;;  %9165 = vmatprep.mubr.msk.f32.mxu1 %vm701_vm1, %v5377_v3  ;;  %v5379_v42 = vld [vmem:[#allocation2 + $0xd6] sm:$0xff]  ;;  %v2777_v11 = vadd.f32 %v10499_v52, %v10497_v36 }
 0x256   : > { %v3157_v47 = vpop.f32.mrf.mxu1  ;;  %v2787_v36 = vadd.f32 %v10511_v41, %v10509_v7  ;;  %v5382_v41 = vld [vmem:[#allocation2 + $0xee] sm:$0xff] }
 0x257   : > { %v3584_v21 = vpop.f32.mrf.mxu0  ;;  %v10689_v57 = vadd.f32 %v8902_v56, %v3217_v61  ;;  %v3216_v48 = vadd.f32 %v3157_v47, %v10484_v25  ;;  %v2617_v25 = vadd.f32 %v10258_v38, %v10256_v16  ;;  %v5380_v61 = vld [vmem:[#allocation2 + $0xde] sm:$0xff]  ;;  %v7346_v47 = vld [vmem:[%s11773_s4 + $0x10] sm:$0xff] }
 0x258   : > { %v8849_v22 = vpop.f32.mrf.mxu1  ;;  %9166 = vmatmul.mubr.msk.f32.gmra.mxu1 %vm701_vm1, %v5378_v1  ;;  %9241 = vmatprep.subr.mxu1 %v7346_v47 }
 0x259   : > { %v8905_v54 = vpop.f32.mrf.mxu0  ;;  %v10695_v17 = vadd.f32 %v3584_v21, %v3216_v48  ;;  %v3219_v5 = vadd.f32 %v8849_v22, %v10492_v35  ;;  %9168 = vmatprep.mubr.msk.f32.mxu1 %vm701_vm1, %v5379_v42  ;;  %v5381_v42 = vld [vmem:[#allocation2 + $0xe6] sm:$0xff]  ;;  %v3186_v21 = vadd.f32 %v10520_v26, %v2617_v25  ;;  %9242 = vmatpush3.msra.mxu1 %v7346_v47  ;;  %v5384_v47 = vld [vmem:[#allocation2 + $0xfe] sm:$0xff] }
 0x25a   : > { %v3167_v15 = vpop.f32.mrf.mxu1 }
 0x25b   : > { %v3594_v55 = vpop.f32.mrf.mxu0  ;;  %v10701_v56 = vadd.f32 %v8905_v54, %v3219_v5  ;;  %v3218_v3 = vadd.f32 %v3167_v15, %v2777_v11  ;;  %v5383_v5 = vld [vmem:[#allocation2 + $0xf6] sm:$0xff]  ;;  %v3613_v26 = vadd.f32 %v10522_v45, %v3186_v21  ;;  %v3615_v45 = vadd.f32 %v10533_v30, %v10538_v8 }
 0x25c   : > { %v8852_v52 = vpop.f32.mrf.mxu1  ;;  %9169 = vmatmul.mubr.msk.f32.gmra.mxu1 %vm701_vm1, %v5380_v61  ;;  %v3617_v30 = vadd.f32 %v10547_v13, %v10552_v23  ;;  %v3619_v13 = vadd.f32 %v10561_v27, %v10566_v32 }
 0x25d   : > { %v8908_v35 = vpop.f32.mrf.mxu0  ;;  %v10710_v16 = vadd.f32 %v3594_v55, %v3218_v3  ;;  %v3221_v38 = vadd.f32 %v8852_v52, %v10504_v34  ;;  %9171 = vmatprep.mubr.msk.f32.mxu1 %vm701_vm1, %v5381_v42 }
 0x25e   : > { %v3177_v48 = vpop.f32.mrf.mxu1 }
 0x25f   : > { %v3604_v1 = vpop.f32.mrf.mxu0  ;;  %v10714_v22 = vadd.f32 %v8908_v35, %v3221_v38  ;;  %v3220_v7 = vadd.f32 %v3177_v48, %v2787_v36  ;;  %v5385_v35 = vld [vmem:[#allocation2 + $0x106] sm:$0xff] }
 0x260   : > { %v8913_v54 = vpop.f32.mrf.mxu1  ;;  %9172 = vmatmul.mubr.msk.f32.gmra.mxu1 %vm701_vm1, %v5382_v41 }
 0x261   : > { %v8969_v11 = vpop.f32.mrf.mxu0  ;;  %v10718_v15 = vadd.f32 %v3604_v1, %v3220_v7  ;;  %v4041_v34 = vadd.f32 %v8913_v54, %v10524_v49  ;;  %9174 = vmatprep.mubr.msk.f32.mxu1 %vm701_vm1, %v5383_v5  ;;  %v5386_v7 = vld [vmem:[#allocation2 + $0x10e] sm:$0xff] }
 0x262   : > { %v3861_v55 = vpop.f32.mrf.mxu1 }
 0x263   : > { %v4288_v25 = vpop.f32.mrf.mxu0  ;;  %v10722_v3 = vadd.f32 %v8969_v11, %v4041_v34  ;;  %v4040_v61 = vadd.f32 %v3861_v55, %v3613_v26  ;;  %v5387_v11 = vld [vmem:[#allocation2 + $0x116] sm:$0xff] }
 0x264   : > { %v8916_v36 = vpop.f32.mrf.mxu1  ;;  %9175 = vmatmul.mubr.msk.f32.gmra.mxu1 %vm701_vm1, %v5384_v47 }
 0x265   : > { %v8972_v52 = vpop.f32.mrf.mxu0  ;;  %v10727_v42 = vadd.f32 %v4288_v25, %v4040_v61  ;;  %v4043_v49 = vadd.f32 %v8916_v36, %v10535_v53  ;;  %9177 = vmatprep.mubr.msk.f32.mxu1 %vm701_vm1, %v5385_v35  ;;  %v5388_v25 = vld [vmem:[#allocation2 + $0x11e] sm:$0xff]  ;;  %v5389_v36 = vld [vmem:[#allocation2 + $0x126] sm:$0xff] }
 0x266   : > { %v3871_v21 = vpop.f32.mrf.mxu1 }
 0x267   : > { %v4298_v38 = vpop.f32.mrf.mxu0  ;;  %v10731_v48 = vadd.f32 %v8972_v52, %v4043_v49  ;;  %v4042_v1 = vadd.f32 %v3871_v21, %v3615_v45  ;;  %v7345_v52 = vld [vmem:[%s11773_s4 + $0x8] sm:$0xff]  ;;  %v5391_v49 = vld [vmem:[#allocation2 + $0x136] sm:$0xff] }
 0x268   : > { %v8919_v41 = vpop.f32.mrf.mxu1  ;;  %9178 = vmatmul.mubr.msk.f32.gmra.mxu1 %vm701_vm1, %v5386_v7  ;;  %9243 = vmatprep.subr.mxu1 %v7345_v52 }
 0x269   : > { %v8975_v54 = vpop.f32.mrf.mxu0  ;;  %v10736_v8 = vadd.f32 %v4298_v38, %v4042_v1  ;;  %v4045_v53 = vadd.f32 %v8919_v41, %v10549_v2  ;;  %9180 = vmatprep.mubr.msk.f32.mxu1 %vm701_vm1, %v5387_v11  ;;  %v5390_v1 = vld [vmem:[#allocation2 + $0x12e] sm:$0xff]  ;;  %9244 = vmatpush3.msra.mxu1 %v7345_v52 }
 0x26a   : > { %v3881_v5 = vpop.f32.mrf.mxu1 }
 0x26b   : > { %v4308_v26 = vpop.f32.mrf.mxu0  ;;  %v10740_v34 = vadd.f32 %v8975_v54, %v4045_v53  ;;  %v4044_v55 = vadd.f32 %v3881_v5, %v3617_v30  ;;  %v5392_v54 = vld [vmem:[#allocation2 + $0x13e] sm:$0xff] }
 0x26c   : > { %v8922_v61 = vpop.f32.mrf.mxu1  ;;  %9181 = vmatmul.mubr.msk.f32.gmra.mxu1 %vm701_vm1, %v5388_v25  ;;  %v3623_v25 = vadd.f32 %v10585_v43, %v10590_v9 }
 0x26d   : > { %v8978_v47 = vpop.f32.mrf.mxu0  ;;  %v10745_v23 = vadd.f32 %v4308_v26, %v4044_v55  ;;  %v4047_v2 = vadd.f32 %v8922_v61, %v10563_v31  ;;  %9183 = vmatprep.mubr.msk.f32.mxu1 %vm701_vm1, %v5389_v36  ;;  %v3621_v31 = vadd.f32 %v10574_v37, %v10579_v12 }
 0x26e   : > { %v3891_v35 = vpop.f32.mrf.mxu1 }
 0x26f   : > { %v4318_v45 = vpop.f32.mrf.mxu0  ;;  %v10752_v21 = vadd.f32 %v8978_v47, %v4047_v2  ;;  %v4046_v38 = vadd.f32 %v3891_v35, %v3619_v13  ;;  %v3625_v35 = vadd.f32 %v10595_v39, %v10600_v18 }
 0x270   : > { %v8925_v27 = vpop.f32.mrf.mxu1  ;;  %9184 = vmatmul.mubr.msk.f32.gmra.mxu1 %vm701_vm1, %v5390_v1 }
 0x271   : > { %v8981_v32 = vpop.f32.mrf.mxu0  ;;  %v10757_v7 = vadd.f32 %v4318_v45, %v4046_v38  ;;  %v4049_v41 = vadd.f32 %v8925_v27, %v10576_v62  ;;  %9186 = vmatprep.mubr.msk.f32.mxu1 %vm701_vm1, %v5391_v49  ;;  %v9340_v62 = vld [vmem:[%s9549_s13] sm:$0xff] }
 0x272   : > { %v3901_v11 = vpop.f32.mrf.mxu1 }
 0x273   : > { %v4328_v30 = vpop.f32.mrf.mxu0  ;;  %v10761_v53 = vadd.f32 %v8981_v32, %v4049_v41  ;;  %v4048_v5 = vadd.f32 %v3901_v11, %v3621_v31  ;;  %v3627_v32 = vadd.f32 %v10605_v59, %v10610_v20 }
 0x274   : > { %v8928_v26 = vpop.f32.mrf.mxu1  ;;  %9187 = vmatmul.mubr.msk.f32.gmra.mxu1 %vm701_vm1, %v5392_v54 }
 0x275   : > { %v8984_v55 = vpop.f32.mrf.mxu0  ;;  %v10766_v37 = vadd.f32 %v4328_v30, %v4048_v5  ;;  %v4051_v12 = vadd.f32 %v8928_v26, %v10587_v4  ;;  %9247 = vmatprep.mubr.msk.f32.mxu1 %vm347_vm0, %v9340_v62  ;;  %v3629_v5 = vadd.f32 %v10615_v40, %v10620_v50 }
 0x276   : > { %v3911_v61 = vpop.f32.mrf.mxu1 }
 0x277   : > { %v4338_v47 = vpop.f32.mrf.mxu0  ;;  %v10771_v36 = vadd.f32 %v8984_v55, %v4051_v12  ;;  %v4050_v13 = vadd.f32 %v3911_v61, %v3623_v25  ;;  %v3631_v61 = vadd.f32 %v10625_v10, %v10630_v28 }
 0x278   : > { %v8931_v2 = vpop.f32.mrf.mxu1 }
 0x279   : > { %v8987_v52 = vpop.f32.mrf.mxu0  ;;  %v10775_v45 = vadd.f32 %v4338_v47, %v4050_v13  ;;  %v4053_v43 = vadd.f32 %v8931_v2, %v10597_v58 }
 0x27a   : > { %v3921_v9 = vpop.f32.mrf.mxu1 }
 0x27b   : > { %v4348_v49 = vpop.f32.mrf.mxu0  ;;  %v10778_v4 = vadd.f32 %v8987_v52, %v4053_v43  ;;  %v4052_v38 = vadd.f32 %v3921_v9, %v3625_v35  ;;  %v3633_v43 = vadd.f32 %v10635_v51, %v10640_v0 }
 0x27c   : > { %v8934_v1 = vpop.f32.mrf.mxu1 }
 0x27d   : > { %v8990_v27 = vpop.f32.mrf.mxu0  ;;  %v10782_v31 = vadd.f32 %v4348_v49, %v4052_v38  ;;  %v4055_v41 = vadd.f32 %v8934_v1, %v10607_v14 }
 0x27e   : > { %v3931_v54 = vpop.f32.mrf.mxu1 }
 0x27f   : > { %v4358_v39 = vpop.f32.mrf.mxu0  ;;  %v10785_v18 = vadd.f32 %v8990_v27, %v4055_v41  ;;  %v4054_v11 = vadd.f32 %v3931_v54, %v3627_v32  ;;  %v3635_v32 = vadd.f32 %v10645_v46, %v10650_v63  ;;  %v11788_v54 = vld [vmem:[#allocation7_spill] sm:$0xff]  ;;  %v9341_v46 = vld [vmem:[%s9549_s13 + $0x8] sm:$0xff] }
 0x280   : > { %v8937_v58 = vpop.f32.mrf.mxu1  ;;  %v11789_v63 = vld [vmem:[#allocation8_spill] sm:$0xff] }
 0x281   : > { %v8993_v30 = vpop.f32.mrf.mxu0  ;;  %v10789_v26 = vadd.f32 %v4358_v39, %v4054_v11  ;;  %v4057_v55 = vadd.f32 %v8937_v58, %v10617_v44 }
 0x282   : > { %v3941_v25 = vpop.f32.mrf.mxu1 }
 0x283   : > { %v4368_v59 = vpop.f32.mrf.mxu0  ;;  %v10792_v20 = vadd.f32 %v8993_v30, %v4057_v55  ;;  %v4056_v12 = vadd.f32 %v3941_v25, %v3629_v5  ;;  %v3637_v55 = vadd.f32 %v11789_v63, %v10666_v6  ;;  %v11790_v6 = vld [vmem:[#allocation9_spill] sm:$0xff] }
 0x284   : > { %v8940_v14 = vpop.f32.mrf.mxu1 }
 0x285   : > { %v8996_v62 = vpop.f32.mrf.mxu0  ;;  %v10796_v47 = vadd.f32 %v4368_v59, %v4056_v12  ;;  %v4059_v13 = vadd.f32 %v8940_v14, %v10627_v19  ;;  %v9342_v12 = vld [vmem:[%s9549_s13 + $0x10] sm:$0xff] }
 0x286   : > { %v3951_v2 = vpop.f32.mrf.mxu1 }
 0x287   : > { %v4378_v40 = vpop.f32.mrf.mxu0  ;;  %v10799_v50 = vadd.f32 %v8996_v62, %v4059_v13  ;;  %v4058_v52 = vadd.f32 %v3951_v2, %v3631_v61 }
 0x288   : > { %v8943_v44 = vpop.f32.mrf.mxu1 }
 0x289   : > { %v8999_v35 = vpop.f32.mrf.mxu0  ;;  %v10803_v9 = vadd.f32 %v4378_v40, %v4058_v52  ;;  %v4061_v49 = vadd.f32 %v8943_v44, %v10637_v60  ;;  %v7344_v60 = vld [vmem:[%s11773_s4] sm:$0xff]  ;;  %v9343_v52 = vld [vmem:[%s9549_s13 + $0x18] sm:$0xff]  ;;  %v3639_v44 = vadd.f32 %v11790_v6, %v10676_v24  ;;  %v9349_v6 = vld [vmem:[%s9549_s13 + $0x48] sm:$0xff] }
 0x28a   : > { %v3961_v38 = vpop.f32.mrf.mxu1  ;;  %9245 = vmatprep.subr.mxu1 %v7344_v60 }
 0x28b   : > { %v4388_v10 = vpop.f32.mrf.mxu0  ;;  %v10806_v28 = vadd.f32 %v8999_v35, %v4061_v49  ;;  %v4060_v19 = vadd.f32 %v3961_v38, %v3633_v43  ;;  %9246 = vmatpush3.msra.mxu1 %v7344_v60  ;;  %v9344_v49 = vld [vmem:[%s9549_s13 + $0x20] sm:$0xff] }
 0x28c   : > { %v8946_v1 = vpop.f32.mrf.mxu1  ;;  %9248 = vmatmul.mubr.msk.f32.vlgmr.msra.gmra.mxu1 %vm347_vm0, %v9341_v46 }
 0x28d   : > { %v9002_v27 = vpop.f32.mrf.mxu0  ;;  %v10810_v41 = vadd.f32 %v4388_v10, %v4060_v19  ;;  %v4063_v51 = vadd.f32 %v8946_v1, %v11788_v54  ;;  %9250 = vmatprep.mubr.msk.f32.mxu1 %vm347_vm0, %v9342_v12  ;;  %v9345_v54 = vld [vmem:[%s9549_s13 + $0x28] sm:$0xff] }
 0x28e   : > { %v3971_v0 = vpop.f32.mrf.mxu1 }
 0x28f   : > { %v4398_v39 = vpop.f32.mrf.mxu0  ;;  %v10816_v11 = vadd.f32 %v9002_v27, %v4063_v51  ;;  %v4062_v58 = vadd.f32 %v3971_v0, %v3635_v32  ;;  %v11792_v51 = vld [vmem:[#allocation11_spill] sm:$0xff]  ;;  %v9346_v0 = vld [vmem:[%s9549_s13 + $0x30] sm:$0xff] }
 0x290   : > { %v8949_v30 = vpop.f32.mrf.mxu1  ;;  %9251 = vmatmul.mubr.msk.f32.gmra.mxu1 %vm347_vm0, %v9343_v52 }
 0x291   : > { %v9005_v5 = vpop.f32.mrf.mxu0  ;;  %v10822_v25 = vadd.f32 %v4398_v39, %v4062_v58  ;;  %v4065_v59 = vadd.f32 %v8949_v30, %v10663_v33  ;;  %v11791_v33 = vld [vmem:[#allocation10_spill] sm:$0xff]  ;;  %9253 = vmatprep.mubr.msk.f32.mxu1 %vm347_vm0, %v9344_v49 }
 0x292   : > { %v3981_v14 = vpop.f32.mrf.mxu1 }
 0x293   : > { %v4408_v62 = vpop.f32.mrf.mxu0  ;;  %v10827_v61 = vadd.f32 %v9005_v5, %v4065_v59  ;;  %v4064_v13 = vadd.f32 %v3981_v14, %v3637_v55  ;;  %v9347_v55 = vld [vmem:[%s9549_s13 + $0x38] sm:$0xff]  ;;  %v9348_v14 = vld [vmem:[%s9549_s13 + $0x40] sm:$0xff] }
 0x294   : > { %v8952_v2 = vpop.f32.mrf.mxu1  ;;  %9254 = vmatmul.mubr.msk.f32.gmra.mxu1 %vm347_vm0, %v9345_v54  ;;  %v9352_v54 = vld [vmem:[%s9549_s13 + $0x60] sm:$0xff] }
 0x295   : > { %v9008_v40 = vpop.f32.mrf.mxu0  ;;  %v10833_v35 = vadd.f32 %v4408_v62, %v4064_v13  ;;  %v4067_v43 = vadd.f32 %v8952_v2, %v11791_v33  ;;  %9256 = vmatprep.mubr.msk.f32.mxu1 %vm347_vm0, %v9346_v0  ;;  %v9350_v33 = vld [vmem:[%s9549_s13 + $0x50] sm:$0xff] }
 0x296   : > { %v3991_v38 = vpop.f32.mrf.mxu1 }
 0x297   : > { %v4418_v10 = vpop.f32.mrf.mxu0  ;;  %v10838_v19 = vadd.f32 %v9008_v40, %v4067_v43  ;;  %v4066_v1 = vadd.f32 %v3991_v38, %v3639_v44 }
 0x298   : > { %v8955_v27 = vpop.f32.mrf.mxu1  ;;  %9257 = vmatmul.mubr.msk.f32.gmra.mxu1 %vm347_vm0, %v9347_v55 }
 0x299   : > { %v9011_v32 = vpop.f32.mrf.mxu0  ;;  %v10842_v24 = vadd.f32 %v4418_v10, %v4066_v1  ;;  %v4069_v60 = vadd.f32 %v8955_v27, %v11792_v51  ;;  %9259 = vmatprep.mubr.msk.f32.mxu1 %vm347_vm0, %v9348_v14  ;;  %v9351_v27 = vld [vmem:[%s9549_s13 + $0x58] sm:$0xff] }
 0x29a   : > { %v4001_v39 = vpop.f32.mrf.mxu1 }
 0x29b   : > { %v4428_v58 = vpop.f32.mrf.mxu0  ;;  %v10847_v30 = vadd.f32 %v9011_v32, %v4069_v60  ;;  %v4068_v5 = vadd.f32 %v4001_v39, %v10685_v29 }
 0x29c   : > { %v8958_v46 = vpop.f32.mrf.mxu1  ;;  %9260 = vmatmul.mubr.msk.f32.gmra.mxu1 %vm347_vm0, %v9349_v6 }
 0x29d   : > { %v9014_v63 = vpop.f32.mrf.mxu0  ;;  %v10852_v59 = vadd.f32 %v4428_v58, %v4068_v5  ;;  %v4071_v12 = vadd.f32 %v8958_v46, %v10689_v57  ;;  %9262 = vmatprep.mubr.msk.f32.mxu1 %vm347_vm0, %v9350_v33  ;;  %v9353_v5 = vld [vmem:[%s9549_s13 + $0x68] sm:$0xff] }
 0x29e   : > { %v4011_v62 = vpop.f32.mrf.mxu1  ;;  %v9357_v33 = vld [vmem:[%s9549_s13 + $0x88] sm:$0xff] }
 0x29f   : > { %v4438_v13 = vpop.f32.mrf.mxu0  ;;  %v10857_v2 = vadd.f32 %v9014_v63, %v4071_v12  ;;  %v4070_v29 = vadd.f32 %v4011_v62, %v10695_v17  ;;  %v9354_v63 = vld [vmem:[%s9549_s13 + $0x70] sm:$0xff] }
 0x2a0   : > { %v8961_v40 = vpop.f32.mrf.mxu1  ;;  %9263 = vmatmul.mubr.msk.f32.gmra.mxu1 %vm347_vm0, %v9351_v27  ;;  %v9359_v27 = vld [vmem:[%s9549_s13 + $0x98] sm:$0xff] }
 0x2a1   : > { %v9017_v52 = vpop.f32.mrf.mxu0  ;;  %v10862_v44 = vadd.f32 %v4438_v13, %v4070_v29  ;;  %v4073_v57 = vadd.f32 %v8961_v40, %v10701_v56  ;;  %9265 = vmatprep.mubr.msk.f32.mxu1 %vm347_vm0, %v9352_v54  ;;  %v9355_v13 = vld [vmem:[%s9549_s13 + $0x78] sm:$0xff]  ;;  %v9356_v29 = vld [vmem:[%s9549_s13 + $0x80] sm:$0xff] }
 0x2a2   : > { %v4021_v43 = vpop.f32.mrf.mxu1 }
 0x2a3   : > { %v4448_v49 = vpop.f32.mrf.mxu0  ;;  %v10867_v38 = vadd.f32 %v9017_v52, %v4073_v57  ;;  %v4072_v17 = vadd.f32 %v4021_v43, %v10710_v16  ;;  %v9358_v43 = vld [vmem:[%s9549_s13 + $0x90] sm:$0xff] }
 0x2a4   : > { %v8964_v10 = vpop.f32.mrf.mxu1  ;;  %9266 = vmatmul.mubr.msk.f32.gmra.mxu1 %vm347_vm0, %v9353_v5  ;;  %v9362_v5 = vld [vmem:[%s9549_s13 + $0xb0] sm:$0xff] }
 0x2a5   : > { %v9020_v1 = vpop.f32.mrf.mxu0  ;;  %v10872_v32 = vadd.f32 %v4448_v49, %v4072_v17  ;;  %v4075_v56 = vadd.f32 %v8964_v10, %v10714_v22  ;;  %9268 = vmatprep.mubr.msk.f32.mxu1 %vm347_vm0, %v9354_v63 }
 0x2a6   : > { %v4031_v51 = vpop.f32.mrf.mxu1 }
 0x2a7   : > { %v4458_v60 = vpop.f32.mrf.mxu0  ;;  %v10877_v0 = vadd.f32 %v9020_v1, %v4075_v56  ;;  %v4074_v16 = vadd.f32 %v4031_v51, %v10718_v15  ;;  %v9360_v56 = vld [vmem:[%s9549_s13 + $0xa0] sm:$0xff] }
 0x2a8   : > { %v9025_v39 = vpop.f32.mrf.mxu1  ;;  %9269 = vmatmul.mubr.msk.f32.gmra.mxu1 %vm347_vm0, %v9355_v13 }
 0x2a9   : > { %v10880_v58 = vpop.f32.mrf.mxu0  ;;  %v10884_v46 = vadd.f32 %v4458_v60, %v4074_v16  ;;  %v10887_v22 = vadd.f32 %v9025_v39, %v10722_v3  ;;  %9271 = vmatprep.mubr.msk.f32.mxu1 %vm347_vm0, %v9356_v29  ;;  %v9361_v39 = vld [vmem:[%s9549_s13 + $0xa8] sm:$0xff]  ;;  %v9363_v29 = vld [vmem:[%s9549_s13 + $0xb8] sm:$0xff] }
 0x2aa   : > { %v4715_v55 = vpop.f32.mrf.mxu1 }
 0x2ab   : > { %v10891_v12 = vpop.f32.mrf.mxu0  ;;  %v10894_v15 = vadd.f32 %v4715_v55, %v10727_v42 }
 0x2ac   : > { %v9028_v14 = vpop.f32.mrf.mxu1  ;;  %9272 = vmatmul.mubr.msk.f32.gmra.mxu1 %vm347_vm0, %v9357_v33 }
 0x2ad   : > { %v10896_v62 = vpop.f32.mrf.mxu0  ;;  %v10901_v3 = vadd.f32 %v9028_v14, %v10731_v48  ;;  %9274 = vmatprep.mubr.msk.f32.mxu1 %vm347_vm0, %v9358_v43 }
 0x2ae   : > { %v4725_v40 = vpop.f32.mrf.mxu1 }
 0x2af   : > { %v10905_v52 = vpop.f32.mrf.mxu0  ;;  %v10908_v42 = vadd.f32 %v4725_v40, %v10736_v8  ;;  %v9364_v40 = vld [vmem:[%s9549_s13 + $0xc0] sm:$0xff] }
 0x2b0   : > { %v9031_v6 = vpop.f32.mrf.mxu1  ;;  %9275 = vmatmul.mubr.msk.f32.gmra.mxu1 %vm347_vm0, %v9359_v27  ;;  %v9366_v27 = vld [vmem:[%s9549_s13 + $0xd0] sm:$0xff] }
 0x2b1   : > { %v10910_v57 = vpop.f32.mrf.mxu0  ;;  %v10915_v48 = vadd.f32 %v9031_v6, %v10740_v34  ;;  %9277 = vmatprep.mubr.msk.f32.mxu1 %vm347_vm0, %v9360_v56 }
 0x2b2   : > { %v4735_v49 = vpop.f32.mrf.mxu1 }
 0x2b3   : > { %v10919_v17 = vpop.f32.mrf.mxu0  ;;  %v10922_v8 = vadd.f32 %v4735_v49, %v10745_v23 }
 0x2b4   : > { %v9034_v10 = vpop.f32.mrf.mxu1  ;;  %9278 = vmatmul.mubr.msk.f32.gmra.mxu1 %vm347_vm0, %v9361_v39 }
 0x2b5   : > { %v10924_v1 = vpop.f32.mrf.mxu0  ;;  %v10929_v34 = vadd.f32 %v9034_v10, %v10752_v21  ;;  %9280 = vmatprep.mubr.msk.f32.mxu1 %vm347_vm0, %v9362_v5  ;;  %v9365_v10 = vld [vmem:[%s9549_s13 + $0xc8] sm:$0xff]  ;;  %v9367_v5 = vld [vmem:[%s9549_s13 + $0xd8] sm:$0xff] }
 0x2b6   : > { %v4745_v54 = vpop.f32.mrf.mxu1 }
 0x2b7   : > { %v10933_v51 = vpop.f32.mrf.mxu0  ;;  %v10936_v23 = vadd.f32 %v4745_v54, %v10757_v7 }
 0x2b8   : > { %v9037_v60 = vpop.f32.mrf.mxu1  ;;  %9281 = vmatmul.mubr.msk.f32.gmra.mxu1 %vm347_vm0, %v9363_v29 }
 0x2b9   : > { %v10938_v16 = vpop.f32.mrf.mxu0  ;;  %v10943_v21 = vadd.f32 %v9037_v60, %v10761_v53  ;;  %9283 = vmatprep.mubr.msk.f32.mxu1 %vm347_vm0, %v9364_v40 }
 0x2ba   : > { %v4755_v63 = vpop.f32.mrf.mxu1 }
 0x2bb   : > { %v10947_v55 = vpop.f32.mrf.mxu0  ;;  %v10950_v7 = vadd.f32 %v4755_v63, %v10766_v37  ;;  %v9368_v63 = vld [vmem:[%s9549_s13 + $0xe0] sm:$0xff] }
 0x2bc   : > { %v9040_v14 = vpop.f32.mrf.mxu1  ;;  %9284 = vmatmul.mubr.msk.f32.gmra.mxu1 %vm347_vm0, %v9365_v10 }
 0x2bd   : > { %v10952_v13 = vpop.f32.mrf.mxu0  ;;  %v10957_v53 = vadd.f32 %v9040_v14, %v10771_v36  ;;  %9286 = vmatprep.mubr.msk.f32.mxu1 %vm347_vm0, %v9366_v27 }
 0x2be   : > { %v4765_v6 = vpop.f32.mrf.mxu1 }
 0x2bf   : > { %v10961_v33 = vpop.f32.mrf.mxu0  ;;  %v10964_v37 = vadd.f32 %v4765_v6, %v10775_v45 }
 0x2c0   : > { %v9043_v43 = vpop.f32.mrf.mxu1  ;;  %9287 = vmatmul.mubr.msk.f32.gmra.mxu1 %vm347_vm0, %v9367_v5 }
 0x2c1   : > { %v10966_v49 = vpop.f32.mrf.mxu0  ;;  %v10971_v36 = vadd.f32 %v9043_v43, %v10778_v4  ;;  %9289 = vmatprep.mubr.msk.f32.mxu1 %vm347_vm0, %v9368_v63  ;;  %v9369_v43 = vld [vmem:[%s9549_s13 + $0xe8] sm:$0xff]  ;;  %v9371_v63 = vld [vmem:[%s9549_s13 + $0xf8] sm:$0xff] }
 0x2c2   : > { %v4775_v56 = vpop.f32.mrf.mxu1 }
 0x2c3   : > { %v10975_v54 = vpop.f32.mrf.mxu0  ;;  %v10978_v45 = vadd.f32 %v4775_v56, %v10782_v31 }
 0x2c4   : > { %v9046_v60 = vpop.f32.mrf.mxu1  ;;  %9290 = vmatmul.mubr.msk.f32.gmra.mxu1 %vm347_vm0, %v9369_v43 }
 0x2c5   : > { %v10980_v39 = vpop.f32.mrf.mxu0  ;;  %v10985_v4 = vadd.f32 %v9046_v60, %v10785_v18  ;;  %v9370_v18 = vld [vmem:[%s9549_s13 + $0xf0] sm:$0xff]  ;;  %s9436_s13 = smov [#allocation3]  }
 0x2c6   : > { %v4785_v14 = vpop.f32.mrf.mxu1  ;;  %9292 = vmatprep.mubr.msk.f32.mxu1 %vm347_vm0, %v9370_v18  ;;  %s9376_s10 = sshll.u32 %s9436_s13, 4  ;;  %s9377_s10 = int_to_ptr.vmem [resolvable:$false] %s9376_s10 }
 0x2c7   : > { %v10989_v29 = vpop.f32.mrf.mxu0  ;;  %v10992_v31 = vadd.f32 %v4785_v14, %v10789_v26  ;;  %s9378_s12 = scalar_lea.vmem %s9377_s10, 8192  ;;  %p9379_p0 = scmp.lt.s32.totalorder %s11721_s22, %s9377_s10 }
 0x2c8   : > { %v9049_v40 = vpop.f32.mrf.mxu1  ;;  %9293 = vmatmul.mubr.msk.f32.gmra.mxu1 %vm347_vm0, %v9371_v63  ;;  %p9380_p1 = scmp.lt.s32.totalorder %s9378_s12, %s9372_s26 }
 0x2c9   : > { %v10994_v6 = vpop.f32.mrf.mxu0  ;;  %v10999_v10 = vadd.f32 %v9049_v40, %v10792_v20 }
 0x2ca   : > { %v4795_v27 = vpop.f32.mrf.mxu1  ;;  %p9381_p2 = por %p9380_p1, %p9379_p0 }
 0x2cb   : > { %v11003_v56 = vpop.f32.mrf.mxu0  ;;  %v11006_v60 = vadd.f32 %v4795_v27, %v10796_v47 }
 0x2cc   : > { %11793 = vst [vmem:[#allocation7_spill] sm:$0xff] %v11003_v56  ;;  %v9052_v26 = vpop.f32.mrf.mxu1  ;;  %p9382_p3 = pnand %p9381_p2, %p9375_p13 }
 0x2cd   : > { %v11008_v5 = vpop.f32.mrf.mxu0  ;;  %v11013_v14 = vadd.f32 %v9052_v26, %v10799_v50 }
 0x2ce   : > { %11794 = vst [vmem:[#allocation8_spill] sm:$0xff] %v11008_v5  ;;  %v4805_v20 = vpop.f32.mrf.mxu1 }
 0x2cf   : > { %v11015_v40 = vpop.f32.mrf.mxu0  ;;  %v11018_v43 = vadd.f32 %v4805_v20, %v10803_v9 }
 0x2d0   : > { %11795 = vst [vmem:[#allocation9_spill] sm:$0xff] %v11015_v40  ;;  %v9055_v18 = vpop.f32.mrf.mxu1 }
 0x2d1   : > { %v11020_v56 = vpop.f32.mrf.mxu0  ;;  %v11023_v47 = vadd.f32 %v9055_v18, %v10806_v28 }
 0x2d2   : > { %11796 = vst [vmem:[#allocation10_spill] sm:$0xff] %v11020_v56  ;;  %v4815_v27 = vpop.f32.mrf.mxu1 }
 0x2d3   : > { %v11025_v5 = vpop.f32.mrf.mxu0  ;;  %v11028_v63 = vadd.f32 %v4815_v27, %v10810_v41 }
 0x2d4   : > { %11797 = vst [vmem:[#allocation11_spill] sm:$0xff] %v11025_v5  ;;  %v9058_v50 = vpop.f32.mrf.mxu1 }
 0x2d5   : > { %11798 = vst [vmem:[#allocation12_spill] sm:$0xff] %v11028_v63  ;;  %v11030_v26 = vpop.f32.mrf.mxu0  ;;  %v11033_v40 = vadd.f32 %v9058_v50, %v10816_v11 }
 0x2d6   : > { %11799 = vst [vmem:[#allocation13_spill] sm:$0xff] %v11030_v26  ;;  %v4825_v9 = vpop.f32.mrf.mxu1 }
 0x2d7   : > { %11800 = vst [vmem:[#allocation14_spill] sm:$0xff] %v11033_v40  ;;  %v11035_v20 = vpop.f32.mrf.mxu0  ;;  %v11038_v56 = vadd.f32 %v4825_v9, %v10822_v25 }
 0x2d8   : > { %11801 = vst [vmem:[#allocation15_spill] sm:$0xff] %v11035_v20  ;;  %v9061_v28 = vpop.f32.mrf.mxu1 }
 0x2d9   : > { %v11040_v18 = vpop.f32.mrf.mxu0  ;;  %v11043_v5 = vadd.f32 %v9061_v28, %v10827_v61 }
 0x2da   : > { %11802 = vst [vmem:[#allocation16_spill] sm:$0xff] %v11040_v18  ;;  %v4835_v41 = vpop.f32.mrf.mxu1 }
 0x2db   : > { %11803 = vst [vmem:[#allocation17_spill] sm:$0xff] %v11043_v5  ;;  %v11045_v27 = vpop.f32.mrf.mxu0  ;;  %v11048_v26 = vadd.f32 %v4835_v41, %v10833_v35 }
 0x2dc   : > { %11804 = vst [vmem:[#allocation18_spill] sm:$0xff] %v11045_v27  ;;  %v9064_v11 = vpop.f32.mrf.mxu1 }
 0x2dd   : > { %11805 = vst [vmem:[#allocation19_spill] sm:$0xff] %v11048_v26  ;;  %v9120_v50 = vpop.f32.mrf.mxu0  ;;  %v4921_v40 = vadd.f32 %v9064_v11, %v10838_v19 }
 0x2de   : > { %v4845_v20 = vpop.f32.mrf.mxu1 }
 0x2df   : > { %v5272_v63 = vpop.f32.mrf.mxu0  ;;  %v4920_v25 = vadd.f32 %v4845_v20, %v10842_v24 }
 0x2e0   : > { %v9067_v9 = vpop.f32.mrf.mxu1 }
 0x2e1   : > { %v11053_v18 = vadd.f32 %v9067_v9, %v10847_v30  ;;  %v11055_v61 = vpop.f32.mrf.mxu0 }
 0x2e2   : > { %11806 = vst [vmem:[#allocation20_spill] sm:$0xff] %v11055_v61  ;;  %v4855_v28 = vpop.f32.mrf.mxu1 }
 0x2e3   : > { %v4922_v27 = vadd.f32 %v4855_v28, %v10852_v59  ;;  %v5282_v41 = vpop.f32.mrf.mxu0  ;;  %v5323_v28 = vadd.f32 %v10905_v52, %v10908_v42  ;;  %v11111_v52 = vadd.f32 %v10952_v13, %v10957_v53  ;;  %v11115_v42 = vadd.f32 %v10961_v33, %v10964_v37  ;;  %v11809_v33 = vld [vmem:[#allocation9_spill] sm:$0xff] }
 0x2e4   : > { %v9070_v5 = vpop.f32.mrf.mxu1  ;;  %v11148_v37 = vadd.f32 %v11809_v33, %v11018_v43 }
 0x2e5   : > { %v4925_v35 = vadd.f32 %v9070_v5, %v10857_v2  ;;  %v9126_v20 = vpop.f32.mrf.mxu0  ;;  %v5322_v2 = vadd.f32 %v10880_v58, %v10887_v22  ;;  %v5324_v5 = vadd.f32 %v10896_v62, %v10901_v3  ;;  %v11090_v22 = vadd.f32 %v10924_v1, %v10929_v34 }
 0x2e6   : > { %v4865_v26 = vpop.f32.mrf.mxu1  ;;  %v11102_v62 = vadd.f32 %v10947_v55, %v10950_v7  ;;  %v11131_v1 = vadd.f32 %v10989_v29, %v10992_v31  ;;  %v11135_v34 = vadd.f32 %v10994_v6, %v10999_v10  ;;  %v11808_v55 = vld [vmem:[#allocation8_spill] sm:$0xff]  ;;  %v11814_v29 = vld [vmem:[#allocation13_spill] sm:$0xff]  ;;  %v11815_v10 = vld [vmem:[#allocation15_spill] sm:$0xff] }
 0x2e7   : > { %v11060_v19 = vadd.f32 %v4865_v26, %v10862_v44  ;;  %v5321_v44 = vadd.f32 %v10891_v12, %v10894_v15  ;;  %v11094_v12 = vadd.f32 %v10933_v51, %v10936_v23  ;;  %v11098_v15 = vadd.f32 %v10938_v16, %v10943_v21  ;;  %v11807_v16 = vld [vmem:[#allocation7_spill] sm:$0xff] }
 0x2e8   : > { %v9073_v11 = vpop.f32.mrf.mxu1  ;;  %v11139_v21 = vadd.f32 %v11807_v16, %v11006_v60  ;;  %v11143_v7 = vadd.f32 %v11808_v55, %v11013_v14  ;;  %v11164_v60 = vadd.f32 %v11815_v10, %v11038_v56  ;;  %v11820_v55 = vld [vmem:[#allocation6_spill] sm:$0xff] }
 0x2e9   : > { %v11063_v24 = vadd.f32 %v9073_v11, %v10867_v38  ;;  %v5292_v38 = vpop.f32.mrf.mxu0  ;;  %v11816_v11 = vld [vmem:[#allocation17_spill] sm:$0xff] }
 0x2ea   : > { %v4875_v30 = vpop.f32.mrf.mxu1  ;;  %v11192_v10 = vadd.f32 %v5292_v38, %v11060_v19 }
 0x2eb   : > { %v11066_v9 = vadd.f32 %v4875_v30, %v10872_v32  ;;  %v5326_v32 = vadd.f32 %v10910_v57, %v10915_v48  ;;  %v11119_v57 = vadd.f32 %v10966_v49, %v10971_v36  ;;  %v9129_v51 = vpop.f32.mrf.mxu0  ;;  %v11810_v49 = vld [vmem:[#allocation10_spill] sm:$0xff] }
 0x2ec   : > { %v9076_v61 = vpop.f32.mrf.mxu1  ;;  %v11152_v36 = vadd.f32 %v11810_v49, %v11023_v47  ;;  %v11817_v47 = vld [vmem:[#allocation16_spill] sm:$0xff]  ;;  %v11201_v38 = vadd.f32 %v9129_v51, %v11063_v24 }
 0x2ed   : > { %v11069_v59 = vadd.f32 %v9076_v61, %v10877_v0  ;;  %v11083_v0 = vadd.f32 %v10919_v17, %v10922_v8  ;;  %v11123_v17 = vadd.f32 %v10975_v54, %v10978_v45  ;;  %v11127_v8 = vadd.f32 %v10980_v39, %v10985_v4  ;;  %v11811_v54 = vld [vmem:[#allocation12_spill] sm:$0xff]  ;;  %v11812_v45 = vld [vmem:[#allocation11_spill] sm:$0xff]  ;;  %v11813_v4 = vld [vmem:[#allocation14_spill] sm:$0xff] }
 0x2ee   : > { %v4885_v26 = vpop.f32.mrf.mxu1  ;;  %v11156_v39 = vadd.f32 %v11812_v45, %v11811_v54  ;;  %v11160_v31 = vadd.f32 %v11814_v29, %v11813_v4  ;;  %v11169_v30 = vadd.f32 %v11817_v47, %v11816_v11  ;;  %v11185_v54 = vadd.f32 %v5282_v41, %v4922_v27 }
 0x2ef   : > { %v11086_v58 = vadd.f32 %v4885_v26, %v10884_v46  ;;  %v11107_v46 = vld [vmem:[%s11775_s6] ss:$0 sm:$0xff]  ;;  %v11187_v45 = vadd.f32 %v9126_v20, %v4925_v35 }
 0x2f0   : > { %v9137_v3 = vpop.f32.mrf.mxu1 }
 0x2f1   : > { %v5749_v48 = vadd.f32 %v9137_v3, %v5322_v2  ;;  %v11818_v2 = vld [vmem:[#allocation19_spill] sm:$0xff]  ;;  %v11175_v3 = vadd.f32 %v9120_v50, %v4921_v40 }
 0x2f2   : > { %v5569_v23 = vpop.f32.mrf.mxu1 }
 0x2f3   : > { %v5792_v13 = vadd.f32 %v11107_v46, %v5749_v48  ;;  %v5748_v53 = vadd.f32 %v5569_v23, %v5321_v44  ;;  %v11819_v44 = vld [vmem:[#allocation18_spill] sm:$0xff]  ;;  %v11177_v48 = vadd.f32 %v5272_v63, %v4920_v25  ;;  %v5302_v23 = vpop.f32.mrf.mxu0 }
 0x2f4   : > { %v9140_v6 = vpop.f32.mrf.mxu1  ;;  %v11173_v26 = vadd.f32 %v11819_v44, %v11818_v2 }
 0x2f5   : > { %v5828_v14 = vmax.f32 %v5792_v13, 0.0  ;;  %v5791_v43 = vadd.f32 %v11107_v46, %v5748_v53  ;;  %v5751_v61 = vadd.f32 %v9140_v6, %v5324_v5  ;;  %v11821_v53 = vld [vmem:[#allocation20_spill] sm:$0xff]  ;;  %v9132_v40 = vpop.f32.mrf.mxu0 }
 0x2f6   : > { %v5579_v16 = vpop.f32.mrf.mxu1  ;;  %v11183_v49 = vadd.f32 %v11821_v53, %v11053_v18 }
 0x2f7   : > { %v5916_v56 = vcombine.high %v5828_v14, %v5828_v14  ;;  %v5923_v13 = vrot.slane %v5828_v14, %v11820_v55  ;;  %v5827_v33 = vmax.f32 %v5791_v43, 0.0  ;;  %v5794_v5 = vadd.f32 %v11107_v46, %v5751_v61  ;;  %v5312_v61 = vpop.f32.mrf.mxu0 }
 0x2f8   : > { %v5750_v50 = vadd.f32 %v5579_v16, %v5323_v28  ;;  %v9143_v63 = vpop.f32.mrf.mxu1  ;;  %v11216_v24 = vadd.f32 %v5312_v61, %v11086_v58 }
 0x2f9   : > { %v5930_v25 = vrot.slane %v5916_v56, %v11820_v55  ;;  %v5931_v4 = vcombine.high %v5923_v13, %v5923_v13  ;;  %v5899_v29 = vcombine.high %v5827_v33, %v5827_v33  ;;  %v5906_v6 = vrot.slane %v5827_v33, %v11820_v55 }
 0x2fa   : > { %v5830_v14 = vmax.f32 %v5794_v5, 0.0  ;;  %v5793_v18 = vadd.f32 %v11107_v46, %v5750_v50  ;;  %v5753_v43 = vadd.f32 %v9143_v63, %v5326_v32  ;;  %v5589_v27 = vpop.f32.mrf.mxu1  ;;  %v11210_v63 = vadd.f32 %v5302_v23, %v11066_v9  ;;  %11822 = vst [vmem:[#allocation7_spill] sm:$0xff] %v11216_v24 }
 0x2fb   : > { %v5932_v41 = vcombine.high %v5930_v25, %v5930_v25  ;;  %v11195_v35 = vcombine.low %v5923_v13, %v5931_v4  ;;  %v5913_v20 = vrot.slane %v5899_v29, %v11820_v55  ;;  %v5914_v28 = vcombine.high %v5906_v6, %v5906_v6 }
 0x2fc   : > { %v5950_v11 = vcombine.high %v5830_v14, %v5830_v14  ;;  %v5957_v47 = vrot.slane %v5830_v14, %v11820_v55  ;;  %v5829_v2 = vmax.f32 %v5793_v18, 0.0  ;;  %v5796_v44 = vadd.f32 %v11107_v46, %v5753_v43  ;;  %v9146_v19 = vpop.f32.mrf.mxu1 }
 0x2fd   : > { %v11203_v16 = vcombine.low %v5930_v25, %v5932_v41  ;;  %v5915_v32 = vcombine.high %v5913_v20, %v5913_v20  ;;  %v11205_v56 = vcombine.low %v5906_v6, %v5914_v28  ;;  %v11213_v4 = vadd.f32 %v9132_v40, %v11069_v59 }
 0x2fe   : > { %v5964_v13 = vrot.slane %v5950_v11, %v11820_v55  ;;  %v5965_v33 = vcombine.high %v5957_v47, %v5957_v47  ;;  %v5933_v5 = vcombine.high %v5829_v2, %v5829_v2  ;;  %v5940_v53 = vrot.slane %v5829_v2, %v11820_v55  ;;  %v5599_v50 = vpop.f32.mrf.mxu1 }
 0x2ff   : > { %v5832_v51 = vmax.f32 %v5796_v44, 0.0  ;;  %v6536_v25 = vrot.slane %v11195_v35, %v11820_v55  ;;  %v6543_v29 = vrot.slane %v11203_v16, %v11820_v55  ;;  %v5752_v14 = vadd.f32 %v5589_v27, %v11083_v0 }
 0x300   : > { %v5947_v6 = vrot.slane %v5933_v5, %v11820_v55  ;;  %v9149_v18 = vpop.f32.mrf.mxu1  ;;  %v11224_v9 = vcombine.low %v5913_v20, %v5915_v32  ;;  %v6562_v40 = vcombine.low %v5965_v33, %v5964_v13  ;;  %v5948_v43 = vcombine.high %v5940_v53, %v5940_v53 }
 0x301   : > { %v5983_v23 = vcombine.high %v5832_v51, %v5832_v51  ;;  %v5990_v58 = vrot.slane %v5832_v51, %v11820_v55  ;;  %v5795_v35 = vadd.f32 %v11107_v46, %v5752_v14  ;;  %v5755_v0 = vadd.f32 %v9146_v19, %v11090_v22 }
 0x302   : > { %v5949_v41 = vcombine.high %v5947_v6, %v5947_v6  ;;  %v5609_v28 = vpop.f32.mrf.mxu1  ;;  %v5754_v27 = vadd.f32 %v5599_v50, %v11094_v12  ;;  %v5757_v44 = vadd.f32 %v9149_v18, %v11098_v15  ;;  %v5966_v5 = vcombine.high %v5964_v13, %v5964_v13 }
 0x303   : > { %v5997_v61 = vrot.slane %v5983_v23, %v11820_v55  ;;  %v5998_v11 = vcombine.high %v5990_v58, %v5990_v58  ;;  %v5831_v2 = vmax.f32 %v5795_v35, 0.0  ;;  %v5756_v16 = vadd.f32 %v5609_v28, %v11102_v62 }
 0x304   : > { %v11233_v20 = vcombine.low %v5949_v41, %v5957_v47  ;;  %v9152_v32 = vpop.f32.mrf.mxu1  ;;  %v5798_v53 = vadd.f32 %v11107_v46, %v5755_v0  ;;  %v5797_v51 = vadd.f32 %v11107_v46, %v5754_v27  ;;  %v5800_v22 = vadd.f32 %v11107_v46, %v5757_v44 }
 0x305   : > { %v5999_v33 = vcombine.high %v5997_v61, %v5997_v61  ;;  %v5967_v14 = vcombine.high %v5831_v2, %v5831_v2  ;;  %v5974_v23 = vrot.slane %v5831_v2, %v11820_v55  ;;  %v5799_v12 = vadd.f32 %v11107_v46, %v5756_v16 }
 0x306   : > { %v5619_v47 = vpop.f32.mrf.mxu1  ;;  %v6570_v19 = vrot.slane %v6562_v40, %v11820_v55  ;;  %v11243_v15 = vcombine.low %v5990_v58, %v5998_v11  ;;  %v5834_v62 = vmax.f32 %v5798_v53, 0.0  ;;  %v5833_v50 = vmax.f32 %v5797_v51, 0.0 }
 0x307   : > { %v6596_v18 = vcombine.low %v5997_v61, %v5999_v33  ;;  %v5981_v13 = vrot.slane %v5967_v14, %v11820_v55  ;;  %v6563_v41 = vcombine.low %v5966_v5, %v5974_v23  ;;  %v5836_v35 = vmax.f32 %v5800_v22, 0.0 }
 0x308   : > { %v9155_v28 = vpop.f32.mrf.mxu1  ;;  %v6017_v0 = vcombine.high %v5834_v62, %v5834_v62  ;;  %v6024_v27 = vrot.slane %v5834_v62, %v11820_v55  ;;  %v6000_v2 = vcombine.high %v5833_v50, %v5833_v50  ;;  %v5835_v44 = vmax.f32 %v5799_v12, 0.0 }
 0x309   : > { %v5982_v59 = vcombine.high %v5981_v13, %v5981_v13  ;;  %v6577_v16 = vrot.slane %v6563_v41, %v11820_v55  ;;  %v6007_v40 = vrot.slane %v5833_v50, %v11820_v55  ;;  %v6050_v58 = vcombine.high %v5836_v35, %v5836_v35 }
 0x30a   : > { %v5629_v11 = vpop.f32.mrf.mxu1  ;;  %v6544_v53 = vcombine.low %v6536_v25, %v6543_v29  ;;  %v6545_v51 = vcombine.low %v5948_v43, %v5947_v6  ;;  %v6031_v61 = vrot.slane %v6017_v0, %v11820_v55  ;;  %v6014_v33 = vrot.slane %v6000_v2, %v11820_v55 }
 0x30b   : > { %v6594_v5 = vrot.slane %v11243_v15, %v11820_v55  ;;  %v6578_v14 = vcombine.low %v6570_v19, %v6577_v16  ;;  %v6032_v23 = vcombine.high %v6024_v27, %v6024_v27  ;;  %v6015_v22 = vcombine.high %v6007_v40, %v6007_v40 }
 0x30c   : > { %v9158_v12 = vpop.f32.mrf.mxu1  ;;  %v6604_v62 = vrot.slane %v6596_v18, %v11820_v55  ;;  %v11254_v41 = vcombine.low %v5981_v13, %v5982_v59  ;;  %v6016_v50 = vcombine.high %v6014_v33, %v6014_v33  ;;  %v6057_v24 = vrot.slane %v5836_v35, %v11820_v55 }
 0x30d   : > { %v6597_v25 = vcombine.low %v6007_v40, %v6015_v22  ;;  %v11258_v29 = vrot.slane %v6050_v58, %v11820_v55  ;;  %v6034_v6 = vcombine.high %v5835_v44, %v5835_v44  ;;  %v6041_v43 = vrot.slane %v5835_v44, %v11820_v55 }
 0x30e   : > { %v11261_v0 = vpop.f32.mrf.mxu1  ;;  %v11263_v19 = vcombine.low %v6016_v50, %v6024_v27  ;;  %v6033_v2 = vcombine.high %v6031_v61, %v6031_v61  ;;  %v5759_v16 = vadd.f32 %v9152_v32, %v11111_v52  ;;  %v6526_v59 = vrot.slane %v11224_v9, %v11820_v55 }
 0x30f   : > { %v11268_v18 = vcombine.low %v6032_v23, %v6031_v61  ;;  %v6611_v13 = vrot.slane %v6597_v25, %v11820_v55  ;;  %v6048_v35 = vrot.slane %v6034_v6, %v11820_v55  ;;  %v6049_v40 = vcombine.high %v6041_v43, %v6041_v43 }
 0x310   : > { %v11272_v58 = vpop.f32.mrf.mxu1  ;;  %v6065_v44 = vcombine.high %v6057_v24, %v6057_v24  ;;  %v6630_v33 = vcombine.low %v6033_v2, %v6041_v43  ;;  %v5802_v27 = vadd.f32 %v11107_v46, %v5759_v16  ;;  %v11823_v22 = vrot.slane %v11205_v56, %v11820_v55 }
 0x311   : > { %v6612_v32 = vcombine.low %v6604_v62, %v6611_v13  ;;  %v6631_v50 = vcombine.low %v6049_v40, %v6048_v35  ;;  %v5758_v9 = vadd.f32 %v5619_v47, %v11115_v42  ;;  %v5761_v61 = vadd.f32 %v9155_v28, %v11119_v57 }
 0x312   : > { %v6527_v52 = vcombine.low %v11823_v22, %v6526_v59  ;;  %v11280_v23 = vpop.f32.mrf.mxu1  ;;  %v6638_v25 = vrot.slane %v6630_v33, %v11820_v55  ;;  %v5838_v6 = vmax.f32 %v5802_v27, 0.0  ;;  %v6553_v43 = vrot.slane %v6545_v51, %v11820_v55 }
 0x313   : > { %v6560_v2 = vrot.slane %v11233_v20, %v11820_v55  ;;  %v6645_v56 = vrot.slane %v6631_v50, %v11820_v55  ;;  %v5801_v62 = vadd.f32 %v11107_v46, %v5758_v9  ;;  %v5804_v42 = vadd.f32 %v11107_v46, %v5761_v61 }
 0x314   : > { %9191 = vmatprep.mubr.msk.f32.mxu0 %vm701_vm1, %v6527_v52  ;;  %v5760_v57 = vadd.f32 %v5629_v11, %v11123_v17  ;;  %v11292_v47 = vpop.f32.mrf.mxu1  ;;  %v6084_v28 = vcombine.high %v5838_v6, %v5838_v6  ;;  %v6091_v16 = vrot.slane %v5838_v6, %v11820_v55  ;;  %v5763_v51 = vadd.f32 %v9158_v12, %v11127_v8 }
 0x315   : > { %9192 = vmatmul.mubr.msk.f32.vlgmr.msra.gmra.mxu0 %vm701_vm1, %v6544_v53  ;;  %v6561_v59 = vcombine.low %v6553_v43, %v6560_v2  ;;  %v11296_v13 = vcombine.low %v6638_v25, %v6645_v56  ;;  %v5837_v20 = vmax.f32 %v5801_v62, 0.0  ;;  %v5840_v35 = vmax.f32 %v5804_v42, 0.0 }
 0x316   : > { %v5803_v40 = vadd.f32 %v11107_v46, %v5760_v57  ;;  %v11299_v33 = vpop.f32.mrf.mxu1  ;;  %v6066_v53 = vcombine.high %v11258_v29, %v11258_v29  ;;  %v6098_v17 = vrot.slane %v6084_v28, %v11820_v55  ;;  %v5806_v11 = vadd.f32 %v11107_v46, %v5763_v51 }
 0x317   : > { %9194 = vmatprep.mubr.msk.f32.mxu0 %vm701_vm1, %v6561_v59  ;;  %v6587_v8 = vrot.slane %v11254_v41, %v11820_v55  ;;  %v11308_v12 = vcombine.low %v6057_v24, %v6065_v44  ;;  %v6067_v27 = vcombine.high %v5837_v20, %v5837_v20  ;;  %v6074_v22 = vrot.slane %v5837_v20, %v11820_v55 }
 0x318   : > { %v6118_v52 = vcombine.high %v5840_v35, %v5840_v35  ;;  %v11312_v50 = vpop.f32.mrf.mxu1  ;;  %v6099_v9 = vcombine.high %v6091_v16, %v6091_v16  ;;  %v5839_v61 = vmax.f32 %v5803_v40, 0.0  ;;  %v6100_v25 = vcombine.high %v6098_v17, %v6098_v17 }
 0x319   : > { %9195 = vmatmul.mubr.msk.f32.gmra.mxu0 %vm701_vm1, %v6578_v14  ;;  %v5842_v6 = vmax.f32 %v5806_v11, 0.0  ;;  %v6081_v43 = vrot.slane %v6067_v27, %v11820_v55  ;;  %v6082_v2 = vcombine.high %v6074_v22, %v6074_v22  ;;  %v6595_v24 = vcombine.low %v6587_v8, %v6594_v5 }
 0x31a   : > { %v6132_v56 = vrot.slane %v6118_v52, %v11820_v55  ;;  %v6101_v41 = vcombine.high %v5839_v61, %v5839_v61  ;;  %v6108_v44 = vrot.slane %v5839_v61, %v11820_v55  ;;  %v11321_v42 = vpop.f32.mrf.mxu1  ;;  %v5762_v59 = vadd.f32 %v11261_v0, %v11131_v1 }
 0x31b   : > { %v6151_v62 = vcombine.high %v5842_v6, %v5842_v6  ;;  %v6158_v14 = vrot.slane %v5842_v6, %v11820_v55  ;;  %v6083_v57 = vcombine.high %v6081_v43, %v6081_v43  ;;  %v6664_v28 = vcombine.low %v6074_v22, %v6082_v2  ;;  %9197 = vmatprep.mubr.msk.f32.mxu0 %vm701_vm1, %v6595_v24 }
 0x31c   : > { %v6133_v16 = vcombine.high %v6132_v56, %v6132_v56  ;;  %v6648_v51 = vcombine.low %v11258_v29, %v6066_v53  ;;  %v6655_v15 = vrot.slane %v11308_v12, %v11820_v55  ;;  %v6115_v5 = vrot.slane %v6101_v41, %v11820_v55  ;;  %v11338_v53 = vpop.f32.mrf.mxu1 }
 0x31d   : > { %v11330_v20 = vcombine.low %v6100_v25, %v6108_v44  ;;  %9198 = vmatmul.mubr.msk.f32.gmra.mxu0 %vm701_vm1, %v6612_v32  ;;  %v6665_v40 = vcombine.low %v6081_v43, %v6083_v57  ;;  %v6125_v11 = vrot.slane %v5840_v35, %v11820_v55  ;;  %v6116_v8 = vcombine.high %v6108_v44, %v6108_v44 }
 0x31e   : > { %v6165_v27 = vrot.slane %v6151_v62, %v11820_v55  ;;  %v11335_v22 = vcombine.low %v6099_v9, %v6098_v17  ;;  %v6672_v1 = vrot.slane %v6664_v28, %v11820_v55  ;;  %v6117_v29 = vcombine.high %v6115_v5, %v6115_v5  ;;  %v11363_v44 = vpop.f32.mrf.mxu1 }
 0x31f   : > { %v6166_v0 = vcombine.high %v6158_v14, %v6158_v14  ;;  %v11340_v12 = vcombine.low %v6132_v56, %v6133_v16  ;;  %v6696_v52 = vrot.slane %v11330_v20, %v11820_v55  ;;  %v5805_v32 = vadd.f32 %v11107_v46, %v5762_v59 }
 0x320   : > { %v5765_v35 = vadd.f32 %v11272_v58, %v11135_v34  ;;  %v6679_v61 = vrot.slane %v6665_v40, %v11820_v55  ;;  %v11348_v17 = vcombine.low %v6117_v29, %v6125_v11  ;;  %v6621_v9 = vrot.slane %v11263_v19, %v11820_v55 }
 0x321   : > { %v6628_v25 = vrot.slane %v11268_v18, %v11820_v55  ;;  %v11354_v6 = vcombine.low %v6116_v8, %v6115_v5  ;;  %v6167_v43 = vcombine.high %v6165_v27, %v6165_v27  ;;  %v5841_v2 = vmax.f32 %v5805_v32, 0.0  ;;  %v11377_v8 = vpop.f32.mrf.mxu1 }
 0x322   : > { %v5808_v56 = vadd.f32 %v11107_v46, %v5765_v35  ;;  %v11357_v24 = vcombine.low %v6158_v14, %v6166_v0  ;;  %v5764_v34 = vadd.f32 %v11280_v23, %v11139_v21  ;;  %v5767_v58 = vadd.f32 %v11292_v47, %v11143_v7 }
 0x323   : > { %v6629_v41 = vcombine.low %v6621_v9, %v6628_v25  ;;  %v6134_v19 = vcombine.high %v5841_v2, %v5841_v2  ;;  %v6141_v18 = vrot.slane %v5841_v2, %v11820_v55  ;;  %v6662_v57 = vrot.slane %v6648_v51, %v11820_v55 }
 0x324   : > { %v5844_v62 = vmax.f32 %v5808_v56, 0.0  ;;  %v6680_v28 = vcombine.low %v6672_v1, %v6679_v61  ;;  %v5807_v14 = vadd.f32 %v11107_v46, %v5764_v34  ;;  %v5810_v16 = vadd.f32 %v11107_v46, %v5767_v58  ;;  %v11396_v34 = vpop.f32.mrf.mxu1 }
 0x325   : > { %9200 = vmatprep.mubr.msk.f32.mxu0 %vm701_vm1, %v6629_v41  ;;  %v5766_v21 = vadd.f32 %v11299_v33, %v11148_v37  ;;  %v6148_v7 = vrot.slane %v6134_v19, %v11820_v55  ;;  %v6149_v23 = vcombine.high %v6141_v18, %v6141_v18  ;;  %v6663_v40 = vcombine.low %v6655_v15, %v6662_v57 }
 0x326   : > { %v6185_v47 = vcombine.high %v5844_v62, %v5844_v62  ;;  %v6192_v59 = vrot.slane %v5844_v62, %v11820_v55  ;;  %9201 = vmatmul.mubr.msk.f32.gmra.mxu0 %vm701_vm1, %v11296_v13  ;;  %v5843_v51 = vmax.f32 %v5807_v14, 0.0  ;;  %v5846_v5 = vmax.f32 %v5810_v16, 0.0 }
 0x327   : > { %v5809_v11 = vadd.f32 %v11107_v46, %v5766_v21  ;;  %v6150_v27 = vcombine.high %v6148_v7, %v6148_v7  ;;  %v11379_v1 = vcombine.low %v6141_v18, %v6149_v23  ;;  %9203 = vmatprep.mubr.msk.f32.mxu0 %vm701_vm1, %v6663_v40  ;;  %v6706_v13 = vrot.slane %v11354_v6, %v11820_v55 }
 0x328   : > { %v6199_v37 = vrot.slane %v6185_v47, %v11820_v55  ;;  %v6200_v33 = vcombine.high %v6192_v59, %v6192_v59  ;;  %v6168_v29 = vcombine.high %v5843_v51, %v5843_v51  ;;  %v6175_v0 = vrot.slane %v5843_v51, %v11820_v55  ;;  %v11416_v47 = vpop.f32.mrf.mxu1 }
 0x329   : > { %v6218_v32 = vcombine.high %v5846_v5, %v5846_v5  ;;  %v6225_v35 = vrot.slane %v5846_v5, %v11820_v55  ;;  %v6747_v15 = vrot.slane %v11357_v24, %v11820_v55  ;;  %v5845_v61 = vmax.f32 %v5809_v11, 0.0 }
 0x32a   : > { %v5769_v9 = vadd.f32 %v11312_v50, %v11152_v36  ;;  %9204 = vmatmul.mubr.msk.f32.gmra.mxu0 %vm701_vm1, %v6680_v28  ;;  %v6732_v25 = vcombine.low %v6148_v7, %v6150_v27  ;;  %v6182_v2 = vrot.slane %v6168_v29, %v11820_v55  ;;  %v11393_v56 = vcombine.low %v6167_v43, %v6175_v0 }
 0x32b   : > { %v6232_v41 = vrot.slane %v6218_v32, %v11820_v55  ;;  %v11398_v58 = vcombine.low %v6200_v33, %v6199_v37  ;;  %v6183_v6 = vcombine.high %v6175_v0, %v6175_v0  ;;  %v6233_v19 = vcombine.high %v6225_v35, %v6225_v35 }
 0x32c   : > { %v6201_v18 = vcombine.high %v5845_v61, %v5845_v61  ;;  %v6713_v62 = vrot.slane %v11348_v17, %v11820_v55  ;;  %v6730_v36 = vrot.slane %v11379_v1, %v11820_v55  ;;  %v6184_v50 = vcombine.high %v6182_v2, %v6182_v2 }
 0x32d   : > { %v6234_v57 = vcombine.high %v6232_v41, %v6232_v41  ;;  %v11404_v28 = vcombine.low %v6225_v35, %v6233_v19  ;;  %v6208_v43 = vrot.slane %v5845_v61, %v11820_v55  ;;  %v5812_v16 = vadd.f32 %v11107_v46, %v5769_v9  ;;  %v11434_v61 = vpop.f32.mrf.mxu1 }
 0x32e   : > { %v6215_v14 = vrot.slane %v6201_v18, %v11820_v55  ;;  %v6740_v21 = vrot.slane %v6732_v25, %v11820_v55  ;;  %v11410_v7 = vcombine.low %v6184_v50, %v6192_v59  ;;  %v5768_v17 = vadd.f32 %v11321_v42, %v11156_v39 }
 0x32f   : > { %v6689_v23 = vrot.slane %v11335_v22, %v11820_v55  ;;  %v6781_v51 = vrot.slane %v11398_v58, %v11820_v55  ;;  %v6750_v5 = vcombine.low %v6183_v6, %v6182_v2  ;;  %v6801_v40 = vcombine.low %v6232_v41, %v6234_v57  ;;  %v9179_v50 = vpop.f32.mrf.mxu1 }
 0x330   : > { %v5848_v11 = vmax.f32 %v5812_v16, 0.0  ;;  %v6757_v27 = vrot.slane %v11393_v56, %v11820_v55  ;;  %v6808_v59 = vrot.slane %v11404_v28, %v11820_v55  ;;  %v5811_v1 = vadd.f32 %v11107_v46, %v5768_v17 }
 0x331   : > { %v6697_v39 = vcombine.low %v6689_v23, %v6696_v52  ;;  %v6216_v42 = vcombine.high %v6208_v43, %v6208_v43  ;;  %v6217_v22 = vcombine.high %v6215_v14, %v6215_v14  ;;  %v6774_v29 = vrot.slane %v11410_v7, %v11820_v55 }
 0x332   : > { %v6252_v37 = vcombine.high %v5848_v11, %v5848_v11  ;;  %v6259_v33 = vrot.slane %v5848_v11, %v11820_v55  ;;  %v5847_v0 = vmax.f32 %v5811_v1, 0.0  ;;  %v5771_v32 = vadd.f32 %v11338_v53, %v11160_v31  ;;  %v5709_v1 = vpop.f32.mrf.mxu1 }
 0x333   : > { %9206 = vmatprep.mubr.msk.f32.mxu0 %vm701_vm1, %v6697_v39  ;;  %v6714_v35 = vcombine.low %v6706_v13, %v6713_v62  ;;  %v6815_v20 = vrot.slane %v6801_v40, %v11820_v55  ;;  %v5770_v25 = vadd.f32 %v11363_v44, %v11164_v60  ;;  %v6723_v31 = vrot.slane %v11340_v12, %v11820_v55 }
 0x334   : > { %v6266_v52 = vrot.slane %v6252_v37, %v11820_v55  ;;  %v6267_v9 = vcombine.high %v6259_v33, %v6259_v33  ;;  %v6235_v2 = vcombine.high %v5847_v0, %v5847_v0  ;;  %v6242_v56 = vrot.slane %v5847_v0, %v11820_v55 }
 0x335   : > { %v5814_v41 = vadd.f32 %v11107_v46, %v5771_v32  ;;  %9207 = vmatmul.mubr.msk.f32.gmra.mxu0 %vm701_vm1, %v6714_v35  ;;  %v11445_v53 = vcombine.low %v6208_v43, %v6216_v42  ;;  %v11447_v13 = vcombine.low %v6215_v14, %v6217_v22  ;;  %v5813_v6 = vadd.f32 %v11107_v46, %v5770_v25 }
 0x336   : > { %v5773_v19 = vadd.f32 %v11377_v8, %v11169_v30  ;;  %v6834_v60 = vcombine.low %v6267_v9, %v6266_v52  ;;  %v6249_v44 = vrot.slane %v6235_v2, %v11820_v55  ;;  %v6731_v62 = vcombine.low %v6723_v31, %v6730_v36  ;;  %v9182_v2 = vpop.f32.mrf.mxu1 }
 0x337   : > { %v5850_v18 = vmax.f32 %v5814_v41, 0.0  ;;  %v5849_v57 = vmax.f32 %v5813_v6, 0.0  ;;  %v6268_v28 = vcombine.high %v6266_v52, %v6266_v52  ;;  %v6748_v12 = vcombine.low %v6740_v21, %v6747_v15 }
 0x338   : > { %v5816_v16 = vadd.f32 %v11107_v46, %v5773_v19  ;;  %v6250_v43 = vcombine.high %v6242_v56, %v6242_v56  ;;  %v6251_v14 = vcombine.high %v6249_v44, %v6249_v44  ;;  %9209 = vmatprep.mubr.msk.f32.mxu0 %vm701_vm1, %v6731_v62  ;;  %v5772_v40 = vadd.f32 %v11396_v34, %v11173_v26  ;;  %v5719_v62 = vpop.f32.mrf.mxu1 }
 0x339   : > { %v6285_v17 = vcombine.high %v5850_v18, %v5850_v18  ;;  %v6292_v23 = vrot.slane %v5850_v18, %v11820_v55  ;;  %v6269_v30 = vcombine.high %v5849_v57, %v5849_v57  ;;  %v6276_v8 = vrot.slane %v5849_v57, %v11820_v55  ;;  %9210 = vmatmul.mubr.msk.f32.gmra.mxu0 %vm701_vm1, %v6748_v12 }
 0x33a   : > { %v5852_v36 = vmax.f32 %v5816_v16, 0.0  ;;  %v11463_v11 = vcombine.low %v6251_v14, %v6259_v33  ;;  %v6764_v21 = vrot.slane %v6750_v5, %v11820_v55  ;;  %v6816_v39 = vcombine.low %v6808_v59, %v6815_v20 }
 0x33b   : > { %v6299_v24 = vrot.slane %v6285_v17, %v11820_v55  ;;  %v6300_v15 = vcombine.high %v6292_v23, %v6292_v23  ;;  %v6283_v42 = vrot.slane %v6269_v30, %v11820_v55  ;;  %v6835_v22 = vcombine.low %v6268_v28, %v6276_v8  ;;  %v9185_v8 = vpop.f32.mrf.mxu1 }
 0x33c   : > { %v6319_v37 = vcombine.high %v5852_v36, %v5852_v36  ;;  %v11469_v32 = vrot.slane %v5852_v36, %v11820_v55  ;;  %v5815_v35 = vadd.f32 %v11107_v46, %v5772_v40  ;;  %v6765_v26 = vcombine.low %v6757_v27, %v6764_v21 }
 0x33d   : > { %v6301_v0 = vcombine.high %v6299_v24, %v6299_v24  ;;  %v6791_v34 = vrot.slane %v11445_v53, %v11820_v55  ;;  %v6842_v33 = vrot.slane %v6834_v60, %v11820_v55  ;;  %v11475_v52 = vcombine.low %v6250_v43, %v6249_v44 }
 0x33e   : > { %v6849_v5 = vrot.slane %v6835_v22, %v11820_v55  ;;  %v11478_v59 = vcombine.low %v6292_v23, %v6300_v15  ;;  %v5851_v9 = vmax.f32 %v5815_v35, 0.0  ;;  %9212 = vmatprep.mubr.msk.f32.mxu0 %vm701_vm1, %v6765_v26  ;;  %v5775_v25 = vadd.f32 %v11416_v47, %v11175_v3 }
 0x33f   : > { %v6868_v20 = vcombine.low %v6299_v24, %v6301_v0  ;;  %v6284_v27 = vcombine.high %v6283_v42, %v6283_v42  ;;  %v6333_v41 = vrot.slane %v6319_v37, %v11820_v55  ;;  %v6782_v31 = vcombine.low %v6774_v29, %v6781_v51 }
 0x340   : > { %v11483_v56 = vcombine.low %v6842_v33, %v6849_v5  ;;  %v6334_v53 = vcombine.high %v11469_v32, %v11469_v32  ;;  %v6302_v6 = vcombine.high %v5851_v9, %v5851_v9  ;;  %v6309_v19 = vrot.slane %v5851_v9, %v11820_v55 }
 0x341   : > { %v5818_v3 = vadd.f32 %v11107_v46, %v5775_v25  ;;  %v6876_v47 = vrot.slane %v6868_v20, %v11820_v55  ;;  %9213 = vmatmul.mubr.msk.f32.gmra.mxu0 %vm701_vm1, %v6782_v31  ;;  %v5774_v60 = vadd.f32 %v11434_v61, %v11177_v48  ;;  %v5777_v58 = vadd.f32 %v9179_v50, %v11183_v49  ;;  %v5729_v20 = vpop.f32.mrf.mxu1 }
 0x342   : > { %v6798_v7 = vrot.slane %v11447_v13, %v11820_v55  ;;  %v6316_v51 = vrot.slane %v6302_v6, %v11820_v55  ;;  %v6317_v29 = vcombine.high %v6309_v19, %v6309_v19  ;;  %v5776_v18 = vadd.f32 %v5709_v1, %v11185_v54 }
 0x343   : > { %v5854_v44 = vmax.f32 %v5818_v3, 0.0  ;;  %v5817_v57 = vadd.f32 %v11107_v46, %v5774_v60  ;;  %v5820_v28 = vadd.f32 %v11107_v46, %v5777_v58  ;;  %v5779_v12 = vadd.f32 %v9182_v2, %v11187_v45 }
 0x344   : > { %v6799_v16 = vcombine.low %v6791_v34, %v6798_v7  ;;  %v6318_v48 = vcombine.high %v6316_v51, %v6316_v51  ;;  %v6869_v61 = vcombine.low %v6309_v19, %v6317_v29  ;;  %v6335_v43 = vcombine.high %v6333_v41, %v6333_v41  ;;  %v9188_v51 = vpop.f32.mrf.mxu1 }
 0x345   : > { %v6352_v49 = vcombine.high %v5854_v44, %v5854_v44  ;;  %v6359_v50 = vrot.slane %v5854_v44, %v11820_v55  ;;  %v5853_v13 = vmax.f32 %v5817_v57, 0.0  ;;  %v5856_v14 = vmax.f32 %v5820_v28, 0.0 }
 0x346   : > { %9215 = vmatprep.mubr.msk.f32.mxu0 %vm701_vm1, %v6799_v16  ;;  %v5819_v54 = vadd.f32 %v11107_v46, %v5776_v18  ;;  %v6883_v17 = vrot.slane %v6869_v61, %v11820_v55  ;;  %v11513_v23 = vcombine.low %v6318_v48, %v11469_v32  ;;  %v5822_v15 = vadd.f32 %v11107_v46, %v5779_v12 }
 0x347   : > { %v6366_v30 = vrot.slane %v6352_v49, %v11820_v55  ;;  %v6367_v45 = vcombine.high %v6359_v50, %v6359_v50  ;;  %9216 = vmatmul.mubr.msk.f32.gmra.mxu0 %vm701_vm1, %v6816_v39  ;;  %v6336_v36 = vcombine.high %v5853_v13, %v5853_v13  ;;  %v6343_v40 = vrot.slane %v5853_v13, %v11820_v55 }
 0x348   : > { %v6386_v24 = vcombine.high %v5856_v14, %v5856_v14  ;;  %v6866_v21 = vrot.slane %v11478_v59, %v11820_v55  ;;  %v6884_v1 = vcombine.low %v6876_v47, %v6883_v17  ;;  %v6393_v22 = vrot.slane %v5856_v14, %v11820_v55 }
 0x349   : > { %v5855_v37 = vmax.f32 %v5819_v54, 0.0  ;;  %v6851_v0 = vcombine.low %v6283_v42, %v6284_v27  ;;  %v6350_v32 = vrot.slane %v6336_v36, %v11820_v55  ;;  %v6351_v35 = vcombine.high %v6343_v40, %v6343_v40 }
 0x34a   : > { %v6902_v26 = vcombine.low %v6335_v43, %v6343_v40  ;;  %v11523_v39 = vcombine.low %v6334_v53, %v6333_v41  ;;  %v6368_v34 = vcombine.high %v6366_v30, %v6366_v30  ;;  %v11525_v33 = vcombine.low %v6359_v50, %v6367_v45 }
 0x34b   : > { %v6369_v5 = vcombine.high %v5855_v37, %v5855_v37  ;;  %v6903_v9 = vcombine.low %v6351_v35, %v6350_v32  ;;  %v6400_v25 = vrot.slane %v6386_v24, %v11820_v55  ;;  %v6376_v59 = vrot.slane %v5855_v37, %v11820_v55 }
 0x34c   : > { %v11529_v2 = vmax.f32 %v5822_v15, 0.0  ;;  %v6401_v31 = vcombine.high %v6393_v22, %v6393_v22  ;;  %v6825_v27 = vrot.slane %v11475_v52, %v11820_v55  ;;  %v6832_v41 = vrot.slane %v11463_v11, %v11820_v55 }
 0x34d   : > { %v6383_v42 = vrot.slane %v6369_v5, %v11820_v55  ;;  %v6910_v53 = vrot.slane %v6902_v26, %v11820_v55  ;;  %v6917_v6 = vrot.slane %v6903_v9, %v11820_v55  ;;  %v6384_v19 = vcombine.high %v6376_v59, %v6376_v59 }
 0x34e   : > { %v6420_v3 = vcombine.high %v11529_v2, %v11529_v2  ;;  %v11540_v47 = vcombine.low %v6366_v30, %v6368_v34  ;;  %v6833_v58 = vcombine.low %v6825_v27, %v6832_v41  ;;  %v5778_v7 = vadd.f32 %v5719_v62, %v11192_v10 }
 0x34f   : > { %v6385_v60 = vcombine.high %v6383_v42, %v6383_v42  ;;  %v6927_v52 = vrot.slane %v11525_v33, %v11820_v55  ;;  %v11545_v29 = vcombine.low %v6910_v53, %v6917_v6  ;;  %v5781_v44 = vadd.f32 %v9185_v8, %v11201_v38 }
 0x350   : > { %v6434_v11 = vrot.slane %v6420_v3, %v11820_v55  ;;  %9218 = vmatprep.mubr.msk.f32.mxu0 %vm701_vm1, %v6833_v58  ;;  %v5821_v57 = vadd.f32 %v11107_v46, %v5778_v7  ;;  %v6859_v28 = vrot.slane %v6851_v0, %v11820_v55  ;;  %v5780_v16 = vadd.f32 %v5729_v20, %v11210_v63 }
 0x351   : > { %v6937_v18 = vcombine.low %v6383_v42, %v6385_v60  ;;  %v11553_v10 = vcombine.low %v6401_v31, %v6400_v25  ;;  %v6936_v62 = vcombine.low %v6376_v59, %v6384_v19  ;;  %9219 = vmatmul.mubr.msk.f32.gmra.mxu0 %vm701_vm1, %v11483_v56  ;;  %v5824_v12 = vadd.f32 %v11107_v46, %v5781_v44  ;;  %v5739_v59 = vpop.f32.mrf.mxu1  ;;  %v11824_v60 = vld [vmem:[#allocation7_spill] sm:$0xff] }
 0x352   : > { %v5783_v48 = vadd.f32 %v9188_v51, %v11213_v4  ;;  %v6427_v38 = vrot.slane %v11529_v2, %v11820_v55  ;;  %v5857_v61 = vmax.f32 %v5821_v57, 0.0  ;;  %v6867_v49 = vcombine.low %v6859_v28, %v6866_v21 }
 0x353   : > { %v5823_v50 = vadd.f32 %v11107_v46, %v5780_v16  ;;  %v6435_v13 = vcombine.high %v6434_v11, %v6434_v11  ;;  %v6402_v43 = vcombine.high %v6400_v25, %v6400_v25  ;;  %v5860_v63 = vmax.f32 %v5824_v12, 0.0 }
 0x354   : > { %v5826_v14 = vadd.f32 %v11107_v46, %v5783_v48  ;;  %v6951_v54 = vrot.slane %v6937_v18, %v11820_v55  ;;  %v6403_v17 = vcombine.high %v5857_v61, %v5857_v61  ;;  %v6410_v56 = vrot.slane %v5857_v61, %v11820_v55  ;;  %9221 = vmatprep.mubr.msk.f32.mxu0 %vm701_vm1, %v6867_v49 }
 0x355   : > { %v5859_v4 = vmax.f32 %v5823_v50, 0.0  ;;  %v6944_v30 = vrot.slane %v6936_v62, %v11820_v55  ;;  %v6453_v45 = vcombine.high %v5860_v63, %v5860_v63  ;;  %v6460_v8 = vrot.slane %v5860_v63, %v11820_v55  ;;  %9222 = vmatmul.mubr.msk.f32.gmra.mxu0 %vm701_vm1, %v6884_v1 }
 0x356   : > { %v5862_v36 = vmax.f32 %v5826_v14, 0.0  ;;  %v6417_v40 = vrot.slane %v6403_v17, %v11820_v55  ;;  %v6418_v24 = vcombine.high %v6410_v56, %v6410_v56  ;;  %v6954_v15 = vcombine.low %v6402_v43, %v6410_v56 }
 0x357   : > { %v6436_v21 = vcombine.high %v5859_v4, %v5859_v4  ;;  %v6987_v22 = vcombine.low %v6434_v11, %v6435_v13  ;;  %v6468_v37 = vcombine.high %v6460_v8, %v6460_v8  ;;  %v6443_v0 = vrot.slane %v5859_v4, %v11820_v55 }
 0x358   : > { %v6893_v32 = vrot.slane %v11513_v23, %v11820_v55  ;;  %v6952_v35 = vcombine.low %v6944_v30, %v6951_v54  ;;  %v6419_v26 = vcombine.high %v6417_v40, %v6417_v40  ;;  %v6970_v34 = vcombine.low %v6418_v24, %v6417_v40 }
 0x359   : > { %v6450_v5 = vrot.slane %v6436_v21, %v11820_v55  ;;  %v6467_v1 = vrot.slane %v6453_v45, %v11820_v55  ;;  %v7005_v20 = vcombine.low %v6460_v8, %v6468_v37  ;;  %v6451_v9 = vcombine.high %v6443_v0, %v6443_v0  ;;  %v9249_v45 = vpop.f32.mrf.mxu1 }
 0x35a   : > { %v6900_v25 = vrot.slane %v11523_v39, %v11820_v55  ;;  %v6968_v2 = vrot.slane %v6954_v15, %v11820_v55  ;;  %v6971_v31 = vcombine.low %v6419_v26, %v6427_v38  ;;  %v6487_v27 = vcombine.high %v5862_v36, %v5862_v36 }
 0x35b   : > { %v6452_v42 = vcombine.high %v6450_v5, %v6450_v5  ;;  %v6978_v23 = vrot.slane %v6970_v34, %v11820_v55  ;;  %v6988_v41 = vcombine.low %v6443_v0, %v6451_v9  ;;  %v6494_v53 = vrot.slane %v5862_v36, %v11820_v55  ;;  %v7414_v8 = vpop.f32.mrf.mxu1 }
 0x35c   : > { %v6901_v6 = vcombine.low %v6893_v32, %v6900_v25  ;;  %v6985_v19 = vrot.slane %v6971_v31, %v11820_v55  ;;  %v5782_v58 = vadd.f32 %v5739_v59, %v11824_v60  ;;  %v6934_v39 = vrot.slane %v11540_v47, %v11820_v55 }
 0x35d   : > { %v7004_v3 = vcombine.low %v6450_v5, %v6452_v42  ;;  %v7019_v7 = vrot.slane %v7005_v20, %v11820_v55  ;;  %v7002_v51 = vrot.slane %v6988_v41, %v11820_v55  ;;  %v6961_v11 = vrot.slane %v11553_v10, %v11820_v55  ;;  %v9252_v36 = vpop.f32.mrf.mxu1 }
 0x35e   : > { %9224 = vmatprep.mubr.msk.f32.mxu0 %vm701_vm1, %v6901_v6  ;;  %v6995_v44 = vrot.slane %v6987_v22, %v11820_v55  ;;  %v5825_v57 = vadd.f32 %v11107_v46, %v5782_v58  ;;  %v6935_v47 = vcombine.low %v6927_v52, %v6934_v39  ;;  %v6986_v28 = vcombine.low %v6978_v23, %v6985_v19 }
 0x35f   : > { %v7012_v18 = vrot.slane %v7004_v3, %v11820_v55  ;;  %9225 = vmatmul.mubr.msk.f32.gmra.mxu0 %vm701_vm1, %v11545_v29  ;;  %v6969_v16 = vcombine.low %v6961_v11, %v6968_v2  ;;  %v6469_v48 = vcombine.high %v6467_v1, %v6467_v1  ;;  %v6501_v38 = vrot.slane %v6487_v27, %v11820_v55  ;;  %v7424_v40 = vpop.f32.mrf.mxu1 }
 0x360   : > { %v7003_v62 = vcombine.low %v6995_v44, %v7002_v51  ;;  %v5861_v12 = vmax.f32 %v5825_v57, 0.0  ;;  %9227 = vmatprep.mubr.msk.f32.mxu0 %vm701_vm1, %v6935_v47  ;;  %v6502_v61 = vcombine.high %v6494_v53, %v6494_v53 }
 0x361   : > { %v7020_v10 = vcombine.low %v7012_v18, %v7019_v7  ;;  %v9255_v24 = vpop.f32.mrf.mxu1 }
 0x362   : > { %v6470_v49 = vcombine.high %v5861_v12, %v5861_v12  ;;  %v6477_v46 = vrot.slane %v5861_v12, %v11820_v55  ;;  %v7039_v50 = vcombine.low %v6502_v61, %v6501_v38 }
 0x363   : > { %9228 = vmatmul.mubr.msk.f32.gmra.mxu0 %vm701_vm1, %v6952_v35  ;;  %v7434_v15 = vpop.f32.mrf.mxu1 }
 0x364   : > { %9230 = vmatprep.mubr.msk.f32.mxu0 %vm701_vm1, %v6969_v16  ;;  %v6484_v33 = vrot.slane %v6470_v49, %v11820_v55  ;;  %v6485_v52 = vcombine.high %v6477_v46, %v6477_v46  ;;  %v7021_v29 = vcombine.low %v6469_v48, %v6477_v46  ;;  %v7053_v17 = vrot.slane %v7039_v50, %v11820_v55 }
 0x365   : > { %v9258_v21 = vpop.f32.mrf.mxu1 }
 0x366   : > { %v6486_v13 = vcombine.high %v6484_v33, %v6484_v33  ;;  %v7022_v43 = vcombine.low %v6485_v52, %v6484_v33  ;;  %v7029_v63 = vrot.slane %v7021_v29, %v11820_v55 }
 0x367   : > { %9231 = vmatmul.mubr.msk.f32.gmra.mxu0 %vm701_vm1, %v6986_v28  ;;  %v7444_v0 = vpop.f32.mrf.mxu1 }
 0x368   : > { %9233 = vmatprep.mubr.msk.f32.mxu0 %vm701_vm1, %v7003_v62  ;;  %v7038_v14 = vcombine.low %v6486_v13, %v6494_v53  ;;  %v7036_v54 = vrot.slane %v7022_v43, %v11820_v55 }
 0x369   : > { %v9261_v34 = vpop.f32.mrf.mxu1 }
 0x36a   : > { %v7046_v56 = vrot.slane %v7038_v14, %v11820_v55  ;;  %v7037_v4 = vcombine.low %v7029_v63, %v7036_v54  ;;  %v11615_v55 = vld [vmem:[%s11776_s7] ss:$0 sm:$0xff] }
 0x36b   : > { %9234 = vmatmul.mubr.msk.f32.gmra.mxu0 %vm701_vm1, %v7020_v10  ;;  %v7454_v42 = vpop.f32.mrf.mxu1 }
 0x36c   : > { %9236 = vmatprep.mubr.msk.f32.mxu0 %vm701_vm1, %v7037_v4  ;;  %v7054_v30 = vcombine.low %v7046_v56, %v7053_v17 }
 0x36d   : > { %v9264_v3 = vpop.f32.mrf.mxu1 }
 0x36f   : > { %9237 = vmatmul.mubr.msk.f32.gmra.mxu0 %vm701_vm1, %v7054_v30  ;;  %v7464_v51 = vpop.f32.mrf.mxu1 }
 0x371   : > { %v9267_v57 = vpop.f32.mrf.mxu1 }
 0x373   : > { %v7474_v38 = vpop.f32.mrf.mxu1 }
 0x375   : > { %v9270_v50 = vpop.f32.mrf.mxu1 }
 0x377   : > { %v7484_v43 = vpop.f32.mrf.mxu1 }
 0x379   : > { %v9273_v17 = vpop.f32.mrf.mxu1 }
 0x3d5   : > { %v9193_v22 = vpop.f32.mrf.mxu0 }
 0x3d6   : > { %v7191_v37 = vadd.f32 %v9193_v22, %v11615_v55 }
 0x3d7   : > { %v7185_v32 = vpop.f32.mrf.mxu0 }
 0x3d8   : > { %v7186_v35 = vadd.f32 %v11615_v55, %v7185_v32  ;;  %v7574_v26 = vadd.f32 %v9249_v45, %v7191_v37 }
 0x3d9   : > { %v9196_v5 = vpop.f32.mrf.mxu0 }
 0x3da   : > { %v7606_v1 = vmax.f32 %v7574_v26, 0.0  ;;  %v7201_v20 = vadd.f32 %v9196_v5, %v11615_v55  ;;  %v7573_v9 = vadd.f32 %v7414_v8, %v7186_v35 }
 0x3db   : > { %v7195_v25 = vpop.f32.mrf.mxu0 }
 0x3dc   : > { %7639 = vst.msk [vmem:[%s11623_s20 + $0x8] sm:$0xff] %vm7637_vm2, %v7606_v1  ;;  %v7605_v59 = vmax.f32 %v7573_v9, 0.0  ;;  %v7196_v2 = vadd.f32 %v11615_v55, %v7195_v25  ;;  %v7576_v31 = vadd.f32 %v9252_v36, %v7201_v20 }
 0x3dd   : > { %v9199_v41 = vpop.f32.mrf.mxu0 }
 0x3de   : > { %7638 = vst.msk [vmem:[%s11623_s20] sm:$0xff] %vm7637_vm2, %v7605_v59  ;;  %v7608_v27 = vmax.f32 %v7576_v31, 0.0  ;;  %v7575_v23 = vadd.f32 %v7424_v40, %v7196_v2  ;;  %v7211_v53 = vadd.f32 %v9199_v41, %v11615_v55  ;;  %v7494_v40 = vpop.f32.mrf.mxu1 }
 0x3df   : > { %v7205_v19 = vpop.f32.mrf.mxu0 }
 0x3e0   : > { %7641 = vst.msk [vmem:[%s11623_s20 + $0x18] sm:$0xff] %vm7637_vm2, %v7608_v27  ;;  %v7607_v6 = vmax.f32 %v7575_v23, 0.0  ;;  %v7206_v60 = vadd.f32 %v11615_v55, %v7205_v19  ;;  %v7578_v58 = vadd.f32 %v9255_v24, %v7211_v53  ;;  %v9276_v32 = vpop.f32.mrf.mxu1 }
 0x3e2   : > { %7640 = vst.msk [vmem:[%s11623_s20 + $0x10] sm:$0xff] %vm7637_vm2, %v7607_v6  ;;  %v7610_v39 = vmax.f32 %v7578_v58, 0.0  ;;  %v7577_v7 = vadd.f32 %v7434_v15, %v7206_v60  ;;  %v7504_v5 = vpop.f32.mrf.mxu1 }
 0x3e4   : > { %7643 = vst.msk [vmem:[%s11623_s20 + $0x28] sm:$0xff] %vm7637_vm2, %v7610_v39  ;;  %v7609_v11 = vmax.f32 %v7577_v7, 0.0  ;;  %v9279_v31 = vpop.f32.mrf.mxu1 }
 0x3e6   : > { %v9202_v44 = vpop.f32.mrf.mxu0  ;;  %7642 = vst.msk [vmem:[%s11623_s20 + $0x20] sm:$0xff] %vm7637_vm2, %v7609_v11  ;;  %v7514_v6 = vpop.f32.mrf.mxu1 }
 0x3e7   : > { %v7221_v18 = vadd.f32 %v9202_v44, %v11615_v55 }
 0x3e8   : > { %v7215_v47 = vpop.f32.mrf.mxu0  ;;  %v9282_v58 = vpop.f32.mrf.mxu1 }
 0x3e9   : > { %v7216_v28 = vadd.f32 %v11615_v55, %v7215_v47  ;;  %v7580_v16 = vadd.f32 %v9258_v21, %v7221_v18 }
 0x3ea   : > { %v9205_v62 = vpop.f32.mrf.mxu0 }
 0x3eb   : > { %v7612_v12 = vmax.f32 %v7580_v16, 0.0  ;;  %v7579_v10 = vadd.f32 %v7444_v0, %v7216_v28  ;;  %v7231_v48 = vadd.f32 %v9205_v62, %v11615_v55 }
 0x3ec   : > { %v7225_v61 = vpop.f32.mrf.mxu0 }
 0x3ed   : > { %7645 = vst.msk [vmem:[%s11623_s20 + $0x38] sm:$0xff] %vm7637_vm2, %v7612_v12  ;;  %v7611_v49 = vmax.f32 %v7579_v10, 0.0  ;;  %v7226_v46 = vadd.f32 %v11615_v55, %v7225_v61  ;;  %v7582_v33 = vadd.f32 %v9261_v34, %v7231_v48 }
 0x3ef   : > { %7644 = vst.msk [vmem:[%s11623_s20 + $0x30] sm:$0xff] %vm7637_vm2, %v7611_v49  ;;  %v7614_v52 = vmax.f32 %v7582_v33, 0.0  ;;  %v7581_v29 = vadd.f32 %v7454_v42, %v7226_v46 }
 0x3f1   : > { %7647 = vst.msk [vmem:[%s11623_s20 + $0x48] sm:$0xff] %vm7637_vm2, %v7614_v52  ;;  %v7613_v13 = vmax.f32 %v7581_v29, 0.0 }
 0x3f3   : > { %7646 = vst.msk [vmem:[%s11623_s20 + $0x40] sm:$0xff] %vm7637_vm2, %v7613_v13 }
 0x3f5   : > { %v9208_v63 = vpop.f32.mrf.mxu0 }
 0x3f6   : > { %v7241_v14 = vadd.f32 %v9208_v63, %v11615_v55 }
 0x3f7   : > { %v7235_v54 = vpop.f32.mrf.mxu0 }
 0x3f8   : > { %v7236_v56 = vadd.f32 %v11615_v55, %v7235_v54  ;;  %v7584_v4 = vadd.f32 %v9264_v3, %v7241_v14 }
 0x3f9   : > { %v9211_v45 = vpop.f32.mrf.mxu0 }
 0x3fa   : > { %v7616_v30 = vmax.f32 %v7584_v4, 0.0  ;;  %v7583_v8 = vadd.f32 %v7464_v51, %v7236_v56  ;;  %v7251_v36 = vadd.f32 %v9211_v45, %v11615_v55  ;;  %v7524_v51 = vpop.f32.mrf.mxu1 }
 0x3fb   : > { %v7245_v15 = vpop.f32.mrf.mxu0 }
 0x3fc   : > { %7649 = vst.msk [vmem:[%s11623_s20 + $0x58] sm:$0xff] %vm7637_vm2, %v7616_v30  ;;  %v7615_v24 = vmax.f32 %v7583_v8, 0.0  ;;  %v7246_v21 = vadd.f32 %v11615_v55, %v7245_v15  ;;  %v7586_v22 = vadd.f32 %v9267_v57, %v7251_v36  ;;  %v9285_v62 = vpop.f32.mrf.mxu1 }
 0x3fe   : > { %7648 = vst.msk [vmem:[%s11623_s20 + $0x50] sm:$0xff] %vm7637_vm2, %v7615_v24  ;;  %v7618_v37 = vmax.f32 %v7586_v22, 0.0  ;;  %v7585_v0 = vadd.f32 %v7474_v38, %v7246_v21  ;;  %v7534_v46 = vpop.f32.mrf.mxu1 }
 0x400   : > { %7651 = vst.msk [vmem:[%s11623_s20 + $0x68] sm:$0xff] %vm7637_vm2, %v7618_v37  ;;  %v7617_v35 = vmax.f32 %v7585_v0, 0.0  ;;  %v9288_v29 = vpop.f32.mrf.mxu1 }
 0x401   : > { %v9214_v26 = vpop.f32.mrf.mxu0 }
 0x402   : > { %v7261_v34 = vadd.f32 %v9214_v26, %v11615_v55  ;;  %7650 = vst.msk [vmem:[%s11623_s20 + $0x60] sm:$0xff] %vm7637_vm2, %v7617_v35  ;;  %v7544_v54 = vpop.f32.mrf.mxu1 }
 0x403   : > { %v7255_v1 = vpop.f32.mrf.mxu0 }
 0x404   : > { %v7256_v20 = vadd.f32 %v11615_v55, %v7255_v1  ;;  %v7588_v9 = vadd.f32 %v9270_v50, %v7261_v34  ;;  %v9291_v24 = vpop.f32.mrf.mxu1 }
 0x406   : > { %v7620_v25 = vmax.f32 %v7588_v9, 0.0  ;;  %v7587_v59 = vadd.f32 %v7484_v43, %v7256_v20  ;;  %v7554_v34 = vpop.f32.mrf.mxu1 }
 0x407   : > { %v9217_v2 = vpop.f32.mrf.mxu0 }
 0x408   : > { %v7271_v42 = vadd.f32 %v9217_v2, %v11615_v55  ;;  %7653 = vst.msk [vmem:[%s11623_s20 + $0x78] sm:$0xff] %vm7637_vm2, %v7620_v25  ;;  %v7619_v27 = vmax.f32 %v7587_v59, 0.0 }
 0x409   : > { %v7265_v23 = vpop.f32.mrf.mxu0 }
 0x40a   : > { %v7266_v41 = vadd.f32 %v11615_v55, %v7265_v23  ;;  %v7590_v53 = vadd.f32 %v9273_v17, %v7271_v42  ;;  %7652 = vst.msk [vmem:[%s11623_s20 + $0x70] sm:$0xff] %vm7637_vm2, %v7619_v27  ;;  %v9294_v42 = vpop.f32.mrf.mxu1 }
 0x40c   : > { %v7622_v19 = vmax.f32 %v7590_v53, 0.0  ;;  %v7589_v3 = vadd.f32 %v7494_v40, %v7266_v41 }
 0x40e   : > { %7655 = vst.msk [vmem:[%s11623_s20 + $0x88] sm:$0xff] %vm7637_vm2, %v7622_v19  ;;  %v7621_v60 = vmax.f32 %v7589_v3, 0.0 }
 0x410   : > { %7654 = vst.msk [vmem:[%s11623_s20 + $0x80] sm:$0xff] %vm7637_vm2, %v7621_v60  ;;  %v7564_v60 = vpop.f32.mrf.mxu1 }
 0x411   : > { %v9220_v39 = vpop.f32.mrf.mxu0 }
 0x412   : > { %v7281_v7 = vadd.f32 %v9220_v39, %v11615_v55 }
 0x413   : > { %v7275_v11 = vpop.f32.mrf.mxu0 }
 0x414   : > { %v7276_v44 = vadd.f32 %v11615_v55, %v7275_v11  ;;  %v7592_v18 = vadd.f32 %v9276_v32, %v7281_v7 }
 0x415   : > { %v9223_v57 = vpop.f32.mrf.mxu0 }
 0x416   : > { %v7624_v47 = vmax.f32 %v7592_v18, 0.0  ;;  %v7591_v28 = vadd.f32 %v7504_v5, %v7276_v44  ;;  %v7291_v16 = vadd.f32 %v9223_v57, %v11615_v55 }
 0x417   : > { %v7285_v12 = vpop.f32.mrf.mxu0 }
 0x418   : > { %7657 = vst.msk [vmem:[%s11623_s20 + $0x98] sm:$0xff] %vm7637_vm2, %v7624_v47  ;;  %v7623_v10 = vmax.f32 %v7591_v28, 0.0  ;;  %v7286_v48 = vadd.f32 %v11615_v55, %v7285_v12  ;;  %v7594_v38 = vadd.f32 %v9279_v31, %v7291_v16 }
 0x41a   : > { %7656 = vst.msk [vmem:[%s11623_s20 + $0x90] sm:$0xff] %vm7637_vm2, %v7623_v10  ;;  %v7626_v61 = vmax.f32 %v7594_v38, 0.0  ;;  %v7593_v49 = vadd.f32 %v7514_v6, %v7286_v48 }
 0x41c   : > { %7659 = vst.msk [vmem:[%s11623_s20 + $0xa8] sm:$0xff] %vm7637_vm2, %v7626_v61  ;;  %v7625_v33 = vmax.f32 %v7593_v49, 0.0 }
 0x41e   : > { %7658 = vst.msk [vmem:[%s11623_s20 + $0xa0] sm:$0xff] %vm7637_vm2, %v7625_v33 }
 0x41f   : > { %v9226_v52 = vpop.f32.mrf.mxu0 }
 0x420   : > { %v7301_v50 = vadd.f32 %v9226_v52, %v11615_v55 }
 0x421   : > { %v7295_v13 = vpop.f32.mrf.mxu0 }
 0x422   : > { %v7296_v43 = vadd.f32 %v11615_v55, %v7295_v13  ;;  %v7596_v63 = vadd.f32 %v9282_v58, %v7301_v50 }
 0x423   : > { %v9229_v14 = vpop.f32.mrf.mxu0 }
 0x424   : > { %v7628_v17 = vmax.f32 %v7596_v63, 0.0  ;;  %v7595_v56 = vadd.f32 %v7524_v51, %v7296_v43  ;;  %v7311_v4 = vadd.f32 %v9229_v14, %v11615_v55 }
 0x425   : > { %v7305_v30 = vpop.f32.mrf.mxu0 }
 0x426   : > { %7661 = vst.msk [vmem:[%s11623_s20 + $0xb8] sm:$0xff] %vm7637_vm2, %v7628_v17  ;;  %v7627_v45 = vmax.f32 %v7595_v56, 0.0  ;;  %v7598_v8 = vadd.f32 %v9285_v62, %v7311_v4  ;;  %v7306_v36 = vadd.f32 %v11615_v55, %v7305_v30 }
 0x427   : > { %v9232_v40 = vpop.f32.mrf.mxu0 }
 0x428   : > { %7660 = vst.msk [vmem:[%s11623_s20 + $0xb0] sm:$0xff] %vm7637_vm2, %v7627_v45  ;;  %v7630_v15 = vmax.f32 %v7598_v8, 0.0  ;;  %v7597_v21 = vadd.f32 %v7534_v46, %v7306_v36  ;;  %v7321_v22 = vadd.f32 %v9232_v40, %v11615_v55 }
 0x429   : > { %v7315_v37 = vpop.f32.mrf.mxu0 }
 0x42a   : > { %7663 = vst.msk [vmem:[%s11623_s20 + $0xc8] sm:$0xff] %vm7637_vm2, %v7630_v15  ;;  %v7629_v0 = vmax.f32 %v7597_v21, 0.0  ;;  %v7600_v32 = vadd.f32 %v9288_v29, %v7321_v22  ;;  %v7316_v35 = vadd.f32 %v11615_v55, %v7315_v37 }
 0x42b   : > { %v9235_v26 = vpop.f32.mrf.mxu0 }
 0x42c   : > { %7662 = vst.msk [vmem:[%s11623_s20 + $0xc0] sm:$0xff] %vm7637_vm2, %v7629_v0  ;;  %v7632_v5 = vmax.f32 %v7600_v32, 0.0  ;;  %v7599_v1 = vadd.f32 %v7544_v54, %v7316_v35  ;;  %v7331_v20 = vadd.f32 %v9235_v26, %v11615_v55 }
 0x42d   : > { %v7325_v9 = vpop.f32.mrf.mxu0 }
 0x42e   : > { %7665 = vst.msk [vmem:[%s11623_s20 + $0xd8] sm:$0xff] %vm7637_vm2, %v7632_v5  ;;  %v7631_v25 = vmax.f32 %v7599_v1, 0.0  ;;  %v7602_v59 = vadd.f32 %v9291_v24, %v7331_v20  ;;  %v7326_v2 = vadd.f32 %v11615_v55, %v7325_v9 }
 0x42f   : > { %v9238_v31 = vpop.f32.mrf.mxu0 }
 0x430   : > { %7664 = vst.msk [vmem:[%s11623_s20 + $0xd0] sm:$0xff] %vm7637_vm2, %v7631_v25  ;;  %v7634_v27 = vmax.f32 %v7602_v59, 0.0  ;;  %v7601_v23 = vadd.f32 %v7554_v34, %v7326_v2  ;;  %v7341_v41 = vadd.f32 %v9238_v31, %v11615_v55 }
 0x431   : > { %v7335_v53 = vpop.f32.mrf.mxu0 }
 0x432   : > { %7667 = vst.msk [vmem:[%s11623_s20 + $0xe8] sm:$0xff] %vm7637_vm2, %v7634_v27  ;;  %v7633_v6 = vmax.f32 %v7601_v23, 0.0  ;;  %v7604_v19 = vadd.f32 %v9294_v42, %v7341_v41  ;;  %v7336_v3 = vadd.f32 %v11615_v55, %v7335_v53 }
 0x434   : > { %7666 = vst.msk [vmem:[%s11623_s20 + $0xe0] sm:$0xff] %vm7637_vm2, %v7633_v6  ;;  %v7636_v58 = vmax.f32 %v7604_v19, 0.0  ;;  %v7603_v39 = vadd.f32 %v7564_v60, %v7336_v3 }
 0x436   : > { %7669 = vst.msk [vmem:[%s11623_s20 + $0xf8] sm:$0xff] %vm7637_vm2, %v7636_v58  ;;  %v7635_v55 = vmax.f32 %v7603_v39, 0.0 }
 0x438   : > { %7668 = vst.msk [vmem:[%s11623_s20 + $0xf0] sm:$0xff] %vm7637_vm2, %v7635_v55 }
 0x439   : > { %9385 = shalt.err (!%p9382_p3)
}
 0x43a   : > { %s9386_s17 = scalar_lea.hbm %s11719_s25, 4096  ;;  %s9390_s20 = scalar_lea.hbm %s11777_s8, 8192 }
 0x43b   : > { %p9387_p4 = scmp.ne.s32.totalorder %s11719_s25, %s9386_s17  ;;  %p9391_p9 = scmp.lt.s32.totalorder %s11719_s25, %s11777_s8 }
 0x43c   : > { %p9392_p10 = scmp.lt.s32.totalorder %s9390_s20, %s9386_s17 }
 0x43d   : > { %p9388_p7 = pnand %p9387_p4, %p9522_p5 }
 0x43e   : > { %p9393_p11 = por %p9392_p10, %p9391_p9 }
 0x43f   : > { %p9389_p8 = pneg %p9388_p7 }
 0x441   : > { %p9394_p12 = pnand %p9393_p11, %p9389_p8 }
 0x443   : > { %9397 = shalt.err (!%p9394_p12)
}
 0x444   : > { %s9437_s24 = smov 128   ;;  %s9438_s26 = smov 8  }
 0x445   : > { %9295 = dma.vmem_to_hbm [thread:$0]  (%p9522_p5), %s11721_s22, 4096, %s11719_s25, %s11729_s9, %s9437_s24, %s9437_s24, %s9438_s26  }
 0x446 PF: > { %p9301_p13 = scmp.ge.s32.totalorder %s9432_s30, 2  ;;  %s7699_s13 = sand.u32 1, %s9420_s27  }
 0x447   : > { %s7700_s10 = scalar_lea.sflag [#allocation4], %s7699_s13 }
 0x448   : > { %p9298_p0 = pnand %p9301_p13, %p9526_p6 }
 0x44a   : > { %p9299_p1 = pneg %p9298_p0 }
 0x44c   : > { %9415 = dma.done.wait (%p9299_p1), %s7700_s10, 4096  }
 0x44d   : > { %9417 = vsyncadd (%p9299_p1), %s7700_s10, 4294963200  ;;  %p18_p2 = scmp.ge.s32.totalorder %s9509_s11, 4   ;;  %s11825_s27 = smov %s9424_s28 }
 0x44e   : > { %s11826_s28 = smov %s9428_s29  ;;  %s11827_s29 = smov %s9520_s14 }
 0x44f   : > { %s11828_s30 = smov %s9509_s11  ;;  %20 = sbr.rel (!%p18_p2) target bundleno = 3 (0x3), region = 95 }
 0x454   :  { %7705 = vsyncpa [#allocation4], 1 }
 0x455   :  { %7707 = vsyncpa [#allocation4 + $0x1], 1 }

</bundles_post_ra>
